<compile_context>
chip_gen: v6e
topology: v6e:2x2x1
jax: 0.10.0
libtpu: 0.0.40
codegen_flags: <defaults>
</compile_context>

<pallas_src>
import functools
import math

import jax
import jax.numpy as jnp
import numpy as np
from jax.experimental import pallas as pl
from jax.experimental.pallas import tpu as pltpu

LN_EPS = 1e-5  # torch.nn.LayerNorm default


def _gelu_erf(x):
    # Exact GELU (PyTorch nn.GELU default, erf-based).
    return 0.5 * x * (1.0 + jax.lax.erf(x * (1.0 / math.sqrt(2.0))))


def _gelu_tanh(x):
    # tanh-approx GELU: transcendental goes to the EUP slot. Differs numerically
    # from PyTorch's erf default, hence gated behind gelu_approx=True.
    return jax.nn.gelu(x, approximate=True)


def _layernorm(x, w, b):
    # LayerNorm over the last axis (dim), population variance (PyTorch semantics),
    # one-pass variance to avoid the centered temporary.
    mu = jnp.mean(x, axis=-1, keepdims=True)
    var = jnp.mean(x * x, axis=-1, keepdims=True) - mu * mu
    return (x - mu) * jax.lax.rsqrt(var + LN_EPS) * w + b


def mixer_block_kernel(z_ref,
                       ln1_w_ref, ln1_b_ref,
                       w1t_ref, b1t_ref, w2t_ref, b2t_ref,
                       ln2_w_ref, ln2_b_ref,
                       w1ct_ref, b1c_ref, w2ct_ref, b2c_ref,
                       out_ref, *, gelu_approx):
    Bt, P, D = z_ref.shape
    mm_dtype = w1ct_ref.dtype          # MXU operand dtype (bf16 default / f32 fallback)
    gelu = _gelu_tanh if gelu_approx else _gelu_erf

    # Elementwise math (LayerNorm / GELU / residuals) stays in fp32.
    x3 = z_ref[...].astype(jnp.float32)                           # (Bt, P, D)

    # ---- token mixer: LN(dim) -> Conv1d(P->Ht,k=1) -> GELU -> Conv1d(Ht->P,k=1) -> +residual
    xn3 = _layernorm(x3, ln1_w_ref[...], ln1_b_ref[...])          # (Bt, P, D)
    # Weight-stationary 2D matmuls: fold batch into the N (lane) axis so each
    # token-mixer weight is pushed into the MXU once per block, not once per
    # batch element. (Bt,P,D)->(P,Bt*D) is a tile-level move (P%8==0, D%128==0).
    xn2 = jnp.transpose(xn3, (1, 0, 2)).reshape(P, Bt * D)        # (P, Bt*D)
    h = jnp.dot(w1t_ref[...], xn2.astype(mm_dtype),
                preferred_element_type=jnp.float32)               # (Ht, Bt*D)
    h = gelu(h + b1t_ref[...])                                    # bias (Ht,1) bcast over lanes
    y = jnp.dot(w2t_ref[...], h.astype(mm_dtype),
                preferred_element_type=jnp.float32) + b2t_ref[...]  # (P, Bt*D)
    u3 = jnp.transpose(y.reshape(P, Bt, D), (1, 0, 2)) + x3       # back to (Bt, P, D), +residual

    # ---- channel mixer on flattened rows: LN(dim) -> Linear(D->Hc) -> GELU -> Linear(Hc->D) -> +residual
    u2 = u3.reshape(Bt * P, D)                                    # merge leading dims (free)
    un = _layernorm(u2, ln2_w_ref[...], ln2_b_ref[...])           # (Bt*P, D)
    h2 = jnp.dot(un.astype(mm_dtype), w1ct_ref[...],              # w1ct pre-transposed: (D, Hc)
                 preferred_element_type=jnp.float32)
    h2 = gelu(h2 + b1c_ref[...])                                  # (Bt*P, Hc), f32
    y2 = jnp.dot(h2.astype(mm_dtype), w2ct_ref[...],              # w2ct pre-transposed: (Hc, D)
                 preferred_element_type=jnp.float32) + b2c_ref[...]

    out_ref[...] = (y2 + u2).reshape(Bt, P, D).astype(out_ref.dtype)


def _vmem_capacity_bytes():
    """Per-core VMEM capacity (v5e/v6e: 128 MiB, v7x: 64 MiB); conservative fallback."""
    try:
        cap = int(pltpu.get_tpu_info().vmem_capacity_bytes)
        if cap > 0:
            return cap
    except Exception:
        pass
    return 64 * 1024 * 1024


def _pick_block_b(B, P, D, Ht, Hc, act_bytes, w_bytes, budget_bytes, max_block_b):
    """Largest divisor of B (<= max_block_b) whose per-step VMEM estimate fits budget."""
    def est(bb):
        rows = bb * P
        e = 2 * rows * D * act_bytes                        # input block, double-buffered
        e += 2 * rows * D * act_bytes                       # output block, double-buffered
        e += (2 * Ht * P + 2 * D * Hc) * w_bytes            # weights, single-buffered
        e += (4 * rows * D + bb * Ht * D + rows * Hc) * 4   # peak f32 intermediates (x, temps, h, h2)
        e += (rows * D + rows * Hc) * w_bytes               # matmul operand downcasts
        e += 8 * 1024 * 1024                                # compiler internal scratch / spill slop
        return e

    best = 1
    for d in range(1, max_block_b + 1):
        if B % d == 0 and est(d) <= budget_bytes:
            best = d
    return best


def mixer_block(z, params, *, block_b=None, matmul_dtype=jnp.bfloat16,
                gelu_approx=False, min_grid_steps=4):
    B, P, D = z.shape
    Ht = params["w1_tok"].shape[0]
    Hc = params["w1_ch"].shape[0]
    matmul_dtype = jnp.dtype(matmul_dtype)

    # Pre-transpose channel-mixer weights once (no per-step .T inside the kernel)
    # and cast matmul weights to the MXU operand dtype.
    w1t = params["w1_tok"].astype(matmul_dtype)        # (Ht, P)
    w2t = params["w2_tok"].astype(matmul_dtype)        # (P, Ht)
    w1ct = params["w1_ch"].T.astype(matmul_dtype)      # (D, Hc)
    w2ct = params["w2_ch"].T.astype(matmul_dtype)      # (Hc, D)

    f32 = lambda a: a.astype(jnp.float32)
    ln1_w, ln1_b = f32(params["ln1_w"]), f32(params["ln1_b"])
    ln2_w, ln2_b = f32(params["ln2_w"]), f32(params["ln2_b"])
    b1t, b2t = f32(params["b1_tok"]), f32(params["b2_tok"])
    b1c, b2c = f32(params["b1_ch"]), f32(params["b2_ch"])

    # Generation-aware VMEM budget / limit.
    vmem_cap = _vmem_capacity_bytes()
    budget = int(0.70 * vmem_cap)
    vmem_limit = int(0.80 * vmem_cap)

    if block_b is None:
        # Keep the grid at >= min_grid_steps steps: (a) v7x shards "parallel"
        # steps across its 2 TensorCores, (b) the pipeline always has an i+1
        # prefetch / i-1 writeback to overlap with compute.
        min_steps = max(1, min(min_grid_steps, B))
        block_b = _pick_block_b(B, P, D, Ht, Hc,
                                jnp.dtype(z.dtype).itemsize,
                                matmul_dtype.itemsize,
                                budget, max(1, B // min_steps))
    assert B % block_b == 0, "block_b must divide the batch size"

    consts = [ln1_w, ln1_b, w1t, b1t, w2t, b2t, ln2_w, ln2_b, w1ct, b1c, w2ct, b2c]
    kernel = functools.partial(mixer_block_kernel, gelu_approx=gelu_approx)

    def build_call(single_buffer_consts):
        def const_spec(shape):
            n = len(shape)
            index_map = lambda b: (0,) * n
            if single_buffer_consts:
                try:
                    # Constant blocks are never re-fetched: single-buffer them.
                    return pl.BlockSpec(shape, index_map, pipeline_mode=pl.Buffered(1))
                except TypeError:       # older jax without pipeline_mode kwarg
                    pass
            return pl.BlockSpec(shape, index_map)

        in_specs = [pl.BlockSpec((block_b, P, D), lambda b: (b, 0, 0))]
        in_specs += [const_spec(a.shape) for a in consts]

        return pl.pallas_call(
            kernel,
            out_shape=jax.ShapeDtypeStruct((B, P, D), z.dtype),
            grid_spec=pltpu.PrefetchScalarGridSpec(
                num_scalar_prefetch=0,
                grid=(B // block_b,),
                in_specs=in_specs,
                out_specs=pl.BlockSpec((block_b, P, D), lambda b: (b, 0, 0)),
            ),
            compiler_params=pltpu.CompilerParams(
                dimension_semantics=("parallel",),
                vmem_limit_bytes=vmem_limit,
            ),
        )

    try:
        return build_call(True)(z, *consts)
    except Exception:
        # Fallback: default double-buffered constant blocks (identical numerics).
        return build_call(False)(z, *consts)


def init_params(key, dim, n_patches, spatial_scale=0.5, channel_scale=4):
    token_hidden = int(dim * spatial_scale)
    channel_hidden = int(dim * channel_scale)
    ks = jax.random.split(key, 8)

    def uni(k, shape, fan_in):
        bound = 1.0 / math.sqrt(fan_in)
        return jax.random.uniform(k, shape, jnp.float32, -bound, bound)

    return {
        # token-mixer pre-norm (LayerNorm(dim): weight=1, bias=0)
        "ln1_w": jnp.ones((1, dim), jnp.float32),
        "ln1_b": jnp.zeros((1, dim), jnp.float32),
        # token FFN: Conv1d(n_patches -> token_hidden, k=1), Conv1d(token_hidden -> n_patches, k=1)
        "w1_tok": uni(ks[0], (token_hidden, n_patches), n_patches),
        "b1_tok": uni(ks[1], (token_hidden, 1), n_patches),
        "w2_tok": uni(ks[2], (n_patches, token_hidden), token_hidden),
        "b2_tok": uni(ks[3], (n_patches, 1), token_hidden),
        # channel-mixer pre-norm
        "ln2_w": jnp.ones((1, dim), jnp.float32),
        "ln2_b": jnp.zeros((1, dim), jnp.float32),
        # channel FFN: Linear(dim -> channel_hidden), Linear(channel_hidden -> dim)
        "w1_ch": uni(ks[4], (channel_hidden, dim), dim),
        "b1_ch": uni(ks[5], (1, channel_hidden), dim),
        "w2_ch": uni(ks[6], (dim, channel_hidden), channel_hidden),
        "b2_ch": uni(ks[7], (1, dim), channel_hidden),
    }


def mixer_block_ref(z, p):
    # Pure-JAX reference mirroring the PyTorch forward (exact erf GELU).
    def ln(x, w, b):
        mu = jnp.mean(x, axis=-1, keepdims=True)
        var = jnp.mean((x - mu) ** 2, axis=-1, keepdims=True)
        return (x - mu) / jnp.sqrt(var + LN_EPS) * w + b

    x = z
    xn = ln(x, p["ln1_w"][0], p["ln1_b"][0])
    h = jnp.einsum("hp,bpd->bhd", p["w1_tok"], xn) + p["b1_tok"][None, :, :]
    h = _gelu_erf(h)
    y = jnp.einsum("ph,bhd->bpd", p["w2_tok"], h) + p["b2_tok"][None, :, :]
    u = y + x

    un = ln(u, p["ln2_w"][0], p["ln2_b"][0])
    h2 = _gelu_erf(un @ p["w1_ch"].T + p["b1_ch"][0])
    y2 = h2 @ p["w2_ch"].T + p["b2_ch"][0]
    return y2 + u


if __name__ == "__main__":
    # MXU-friendly small shapes: dim lane-dense (128), n_patches multiple of 8.
    # block_b picker caps the grid at 4 steps (block_b=2 -> 64 rows per step).
    B, P, D = 8, 32, 128   # token_hidden = 64, channel_hidden = 512
    key = jax.random.PRNGKey(0)
    k_z, k_p = jax.random.split(key)

    z = jax.random.normal(k_z, (B, P, D), jnp.float32)
    params = init_params(k_p, dim=D, n_patches=P)

    ref = mixer_block_ref(z, params)

    # Exact-semantics path: f32 MXU operands + erf GELU (matches PyTorch forward).
    out_f32 = jax.block_until_ready(mixer_block(z, params, matmul_dtype=jnp.float32))
    np.testing.assert_allclose(np.asarray(out_f32), np.asarray(ref), rtol=2e-3, atol=2e-3)

    # Default fast path: bf16 MXU operands, f32 accumulation + f32 elementwise.
    out = jax.block_until_ready(mixer_block(z, params))
    np.testing.assert_allclose(np.asarray(out), np.asarray(ref), rtol=1e-1, atol=1e-1)

    print("KERNEL_OK")
</pallas_src>

<mosaic_0001>
module attributes {stable_mosaic.version = 11 : i64} {
  func.func @mixer_block_kernel(%arg0: i32, %arg1: memref<2x32x128xf32, #tpu.memory_space<vmem>>, %arg2: memref<1x128xf32, #tpu.memory_space<vmem>>, %arg3: memref<1x128xf32, #tpu.memory_space<vmem>>, %arg4: memref<64x32xf32, #tpu.memory_space<vmem>>, %arg5: memref<64x1xf32, #tpu.memory_space<vmem>>, %arg6: memref<32x64xf32, #tpu.memory_space<vmem>>, %arg7: memref<32x1xf32, #tpu.memory_space<vmem>>, %arg8: memref<1x128xf32, #tpu.memory_space<vmem>>, %arg9: memref<1x128xf32, #tpu.memory_space<vmem>>, %arg10: memref<128x512xf32, #tpu.memory_space<vmem>>, %arg11: memref<1x512xf32, #tpu.memory_space<vmem>>, %arg12: memref<512x128xf32, #tpu.memory_space<vmem>>, %arg13: memref<1x128xf32, #tpu.memory_space<vmem>>, %arg14: memref<2x32x128xf32, #tpu.memory_space<vmem>>) attributes {dimension_semantics = [#tpu.dimension_semantics<parallel>], iteration_bounds = array<i64: 4>, scalar_prefetch = 0 : i64, scratch_operands = 0 : i64, tpu.core_type = #tpu.core_type<tc>, window_params = [{transform_indices = @transform_0, window_bounds = array<i64: 2, 32, 128>}, {pipeline_mode = #tpu.pipeline_mode<synchronous>, transform_indices = @transform_1, window_bounds = array<i64: 1, 128>}, {pipeline_mode = #tpu.pipeline_mode<synchronous>, transform_indices = @transform_2, window_bounds = array<i64: 1, 128>}, {pipeline_mode = #tpu.pipeline_mode<synchronous>, transform_indices = @transform_3, window_bounds = array<i64: 64, 32>}, {pipeline_mode = #tpu.pipeline_mode<synchronous>, transform_indices = @transform_4, window_bounds = array<i64: 64, 1>}, {pipeline_mode = #tpu.pipeline_mode<synchronous>, transform_indices = @transform_5, window_bounds = array<i64: 32, 64>}, {pipeline_mode = #tpu.pipeline_mode<synchronous>, transform_indices = @transform_6, window_bounds = array<i64: 32, 1>}, {pipeline_mode = #tpu.pipeline_mode<synchronous>, transform_indices = @transform_7, window_bounds = array<i64: 1, 128>}, {pipeline_mode = #tpu.pipeline_mode<synchronous>, transform_indices = @transform_8, window_bounds = array<i64: 1, 128>}, {pipeline_mode = #tpu.pipeline_mode<synchronous>, transform_indices = @transform_9, window_bounds = array<i64: 128, 512>}, {pipeline_mode = #tpu.pipeline_mode<synchronous>, transform_indices = @transform_10, window_bounds = array<i64: 1, 512>}, {pipeline_mode = #tpu.pipeline_mode<synchronous>, transform_indices = @transform_11, window_bounds = array<i64: 512, 128>}, {pipeline_mode = #tpu.pipeline_mode<synchronous>, transform_indices = @transform_12, window_bounds = array<i64: 1, 128>}, {transform_indices = @transform_13, window_bounds = array<i64: 2, 32, 128>}]} {
    %c0 = arith.constant 0 : index
    %c0_0 = arith.constant 0 : index
    %c0_1 = arith.constant 0 : index
    %0 = vector.load %arg1[%c0, %c0_0, %c0_1] : memref<2x32x128xf32, #tpu.memory_space<vmem>>, vector<2x32x128xf32>
    %c0_2 = arith.constant 0 : index
    %c0_3 = arith.constant 0 : index
    %1 = vector.load %arg2[%c0_2, %c0_3] : memref<1x128xf32, #tpu.memory_space<vmem>>, vector<1x128xf32>
    %c0_4 = arith.constant 0 : index
    %c0_5 = arith.constant 0 : index
    %2 = vector.load %arg3[%c0_4, %c0_5] : memref<1x128xf32, #tpu.memory_space<vmem>>, vector<1x128xf32>
    %cst = arith.constant dense<0.000000e+00> : vector<2x32xf32>
    %3 = vector.multi_reduction <add>, %0, %cst [2] : vector<2x32x128xf32> to vector<2x32xf32>
    %4 = vector.shape_cast %3 : vector<2x32xf32> to vector<2x32x1xf32>
    %cst_6 = arith.constant 1.280000e+02 : f32
    %5 = vector.broadcast %cst_6 : f32 to vector<2x32x1xf32>
    %6 = arith.divf %4, %5 : vector<2x32x1xf32>
    %7 = arith.mulf %0, %0 : vector<2x32x128xf32>
    %cst_7 = arith.constant dense<0.000000e+00> : vector<2x32xf32>
    %8 = vector.multi_reduction <add>, %7, %cst_7 [2] : vector<2x32x128xf32> to vector<2x32xf32>
    %9 = vector.shape_cast %8 : vector<2x32xf32> to vector<2x32x1xf32>
    %cst_8 = arith.constant 1.280000e+02 : f32
    %10 = vector.broadcast %cst_8 : f32 to vector<2x32x1xf32>
    %11 = arith.divf %9, %10 : vector<2x32x1xf32>
    %12 = arith.mulf %6, %6 : vector<2x32x1xf32>
    %13 = arith.subf %11, %12 : vector<2x32x1xf32>
    %14 = vector.broadcast %6 : vector<2x32x1xf32> to vector<2x32x128xf32>
    %15 = arith.subf %0, %14 : vector<2x32x128xf32>
    %cst_9 = arith.constant 9.99999974E-6 : f32
    %16 = vector.broadcast %cst_9 : f32 to vector<2x32x1xf32>
    %17 = arith.addf %13, %16 : vector<2x32x1xf32>
    %18 = math.rsqrt %17 : vector<2x32x1xf32>
    %19 = vector.broadcast %18 : vector<2x32x1xf32> to vector<2x32x128xf32>
    %20 = arith.mulf %15, %19 : vector<2x32x128xf32>
    %21 = vector.shape_cast %1 : vector<1x128xf32> to vector<1x1x128xf32>
    %22 = vector.broadcast %21 : vector<1x1x128xf32> to vector<2x32x128xf32>
    %23 = arith.mulf %20, %22 : vector<2x32x128xf32>
    %24 = vector.shape_cast %2 : vector<1x128xf32> to vector<1x1x128xf32>
    %25 = vector.broadcast %24 : vector<1x1x128xf32> to vector<2x32x128xf32>
    %26 = arith.addf %23, %25 : vector<2x32x128xf32>
    %27 = tpu.transpose %26, [1, 0, 2] : vector<2x32x128xf32> -> vector<32x2x128xf32>
    %28 = vector.shape_cast %27 : vector<32x2x128xf32> to vector<32x256xf32>
    %c0_10 = arith.constant 0 : index
    %c0_11 = arith.constant 0 : index
    %29 = vector.load %arg4[%c0_10, %c0_11] : memref<64x32xf32, #tpu.memory_space<vmem>>, vector<64x32xf32>
    %cst_12 = arith.constant dense<0.000000e+00> : vector<64x256xf32>
    %30 = tpu.matmul %29, %28, %cst_12 {dimension_numbers = #tpu.dot_dimension_numbers<[1], [0], [0], [1], [0, 0, 1, 1], [], []>} : vector<64x32xf32>, vector<32x256xf32>, vector<64x256xf32> -> vector<64x256xf32>
    %c0_13 = arith.constant 0 : index
    %c0_14 = arith.constant 0 : index
    %31 = vector.load %arg5[%c0_13, %c0_14] : memref<64x1xf32, #tpu.memory_space<vmem>>, vector<64x1xf32>
    %32 = vector.broadcast %31 : vector<64x1xf32> to vector<64x256xf32>
    %33 = arith.addf %30, %32 : vector<64x256xf32>
    %cst_15 = arith.constant 5.000000e-01 : f32
    %34 = vector.broadcast %cst_15 : f32 to vector<64x256xf32>
    %35 = arith.mulf %34, %33 : vector<64x256xf32>
    %cst_16 = arith.constant 0.707106769 : f32
    %36 = vector.broadcast %cst_16 : f32 to vector<64x256xf32>
    %37 = arith.mulf %33, %36 : vector<64x256xf32>
    %38 = math.erf %37 : vector<64x256xf32>
    %cst_17 = arith.constant 1.000000e+00 : f32
    %39 = vector.broadcast %cst_17 : f32 to vector<64x256xf32>
    %40 = arith.addf %39, %38 : vector<64x256xf32>
    %41 = arith.mulf %35, %40 : vector<64x256xf32>
    %c0_18 = arith.constant 0 : index
    %c0_19 = arith.constant 0 : index
    %42 = vector.load %arg6[%c0_18, %c0_19] : memref<32x64xf32, #tpu.memory_space<vmem>>, vector<32x64xf32>
    %cst_20 = arith.constant dense<0.000000e+00> : vector<32x256xf32>
    %43 = tpu.matmul %42, %41, %cst_20 {dimension_numbers = #tpu.dot_dimension_numbers<[1], [0], [0], [1], [0, 0, 1, 1], [], []>} : vector<32x64xf32>, vector<64x256xf32>, vector<32x256xf32> -> vector<32x256xf32>
    %c0_21 = arith.constant 0 : index
    %c0_22 = arith.constant 0 : index
    %44 = vector.load %arg7[%c0_21, %c0_22] : memref<32x1xf32, #tpu.memory_space<vmem>>, vector<32x1xf32>
    %45 = vector.broadcast %44 : vector<32x1xf32> to vector<32x256xf32>
    %46 = arith.addf %43, %45 : vector<32x256xf32>
    %47 = vector.shape_cast %46 : vector<32x256xf32> to vector<32x2x128xf32>
    %48 = tpu.transpose %47, [1, 0, 2] : vector<32x2x128xf32> -> vector<2x32x128xf32>
    %49 = arith.addf %48, %0 : vector<2x32x128xf32>
    %50 = vector.shape_cast %49 : vector<2x32x128xf32> to vector<64x128xf32>
    %c0_23 = arith.constant 0 : index
    %c0_24 = arith.constant 0 : index
    %51 = vector.load %arg8[%c0_23, %c0_24] : memref<1x128xf32, #tpu.memory_space<vmem>>, vector<1x128xf32>
    %c0_25 = arith.constant 0 : index
    %c0_26 = arith.constant 0 : index
    %52 = vector.load %arg9[%c0_25, %c0_26] : memref<1x128xf32, #tpu.memory_space<vmem>>, vector<1x128xf32>
    %cst_27 = arith.constant dense<0.000000e+00> : vector<64xf32>
    %53 = vector.multi_reduction <add>, %50, %cst_27 [1] : vector<64x128xf32> to vector<64xf32>
    %54 = vector.shape_cast %53 : vector<64xf32> to vector<64x1xf32>
    %cst_28 = arith.constant 1.280000e+02 : f32
    %55 = vector.broadcast %cst_28 : f32 to vector<64x1xf32>
    %56 = arith.divf %54, %55 : vector<64x1xf32>
    %57 = arith.mulf %50, %50 : vector<64x128xf32>
    %cst_29 = arith.constant dense<0.000000e+00> : vector<64xf32>
    %58 = vector.multi_reduction <add>, %57, %cst_29 [1] : vector<64x128xf32> to vector<64xf32>
    %59 = vector.shape_cast %58 : vector<64xf32> to vector<64x1xf32>
    %cst_30 = arith.constant 1.280000e+02 : f32
    %60 = vector.broadcast %cst_30 : f32 to vector<64x1xf32>
    %61 = arith.divf %59, %60 : vector<64x1xf32>
    %62 = arith.mulf %56, %56 : vector<64x1xf32>
    %63 = arith.subf %61, %62 : vector<64x1xf32>
    %64 = vector.broadcast %56 : vector<64x1xf32> to vector<64x128xf32>
    %65 = arith.subf %50, %64 : vector<64x128xf32>
    %cst_31 = arith.constant 9.99999974E-6 : f32
    %66 = vector.broadcast %cst_31 : f32 to vector<64x1xf32>
    %67 = arith.addf %63, %66 : vector<64x1xf32>
    %68 = math.rsqrt %67 : vector<64x1xf32>
    %69 = vector.broadcast %68 : vector<64x1xf32> to vector<64x128xf32>
    %70 = arith.mulf %65, %69 : vector<64x128xf32>
    %71 = vector.broadcast %51 : vector<1x128xf32> to vector<64x128xf32>
    %72 = arith.mulf %70, %71 : vector<64x128xf32>
    %73 = vector.broadcast %52 : vector<1x128xf32> to vector<64x128xf32>
    %74 = arith.addf %72, %73 : vector<64x128xf32>
    %c0_32 = arith.constant 0 : index
    %c0_33 = arith.constant 0 : index
    %75 = vector.load %arg10[%c0_32, %c0_33] : memref<128x512xf32, #tpu.memory_space<vmem>>, vector<128x512xf32>
    %cst_34 = arith.constant dense<0.000000e+00> : vector<64x512xf32>
    %76 = tpu.matmul %74, %75, %cst_34 {dimension_numbers = #tpu.dot_dimension_numbers<[1], [0], [0], [1], [0, 0, 1, 1], [], []>} : vector<64x128xf32>, vector<128x512xf32>, vector<64x512xf32> -> vector<64x512xf32>
    %c0_35 = arith.constant 0 : index
    %c0_36 = arith.constant 0 : index
    %77 = vector.load %arg11[%c0_35, %c0_36] : memref<1x512xf32, #tpu.memory_space<vmem>>, vector<1x512xf32>
    %78 = vector.broadcast %77 : vector<1x512xf32> to vector<64x512xf32>
    %79 = arith.addf %76, %78 : vector<64x512xf32>
    %cst_37 = arith.constant 5.000000e-01 : f32
    %80 = vector.broadcast %cst_37 : f32 to vector<64x512xf32>
    %81 = arith.mulf %80, %79 : vector<64x512xf32>
    %cst_38 = arith.constant 0.707106769 : f32
    %82 = vector.broadcast %cst_38 : f32 to vector<64x512xf32>
    %83 = arith.mulf %79, %82 : vector<64x512xf32>
    %84 = math.erf %83 : vector<64x512xf32>
    %cst_39 = arith.constant 1.000000e+00 : f32
    %85 = vector.broadcast %cst_39 : f32 to vector<64x512xf32>
    %86 = arith.addf %85, %84 : vector<64x512xf32>
    %87 = arith.mulf %81, %86 : vector<64x512xf32>
    %c0_40 = arith.constant 0 : index
    %c0_41 = arith.constant 0 : index
    %88 = vector.load %arg12[%c0_40, %c0_41] : memref<512x128xf32, #tpu.memory_space<vmem>>, vector<512x128xf32>
    %cst_42 = arith.constant dense<0.000000e+00> : vector<64x128xf32>
    %89 = tpu.matmul %87, %88, %cst_42 {dimension_numbers = #tpu.dot_dimension_numbers<[1], [0], [0], [1], [0, 0, 1, 1], [], []>} : vector<64x512xf32>, vector<512x128xf32>, vector<64x128xf32> -> vector<64x128xf32>
    %c0_43 = arith.constant 0 : index
    %c0_44 = arith.constant 0 : index
    %90 = vector.load %arg13[%c0_43, %c0_44] : memref<1x128xf32, #tpu.memory_space<vmem>>, vector<1x128xf32>
    %91 = vector.broadcast %90 : vector<1x128xf32> to vector<64x128xf32>
    %92 = arith.addf %89, %91 : vector<64x128xf32>
    %93 = arith.addf %92, %50 : vector<64x128xf32>
    %94 = vector.shape_cast %93 : vector<64x128xf32> to vector<2x32x128xf32>
    %c0_45 = arith.constant 0 : index
    %c0_46 = arith.constant 0 : index
    %c0_47 = arith.constant 0 : index
    %95 = vector.load %arg14[%c0_45, %c0_46, %c0_47] : memref<2x32x128xf32, #tpu.memory_space<vmem>>, vector<2x32x128xf32>
    tpu.vector_store %arg14[%c0_45, %c0_46, %c0_47], %94 {strides = array<i32>} : memref<2x32x128xf32, #tpu.memory_space<vmem>>, vector<2x32x128xf32>,
    return
  }
  func.func @transform_0(%arg0: i32) -> (i32, i32, i32) {
    %c0_i32 = arith.constant 0 : i32
    %c0_i32_0 = arith.constant 0 : i32
    %c0_i32_1 = arith.constant 0 : i32
    return %arg0, %c0_i32, %c0_i32_0 : i32, i32, i32
  }
  func.func @transform_1(%arg0: i32) -> (i32, i32) {
    %c0_i32 = arith.constant 0 : i32
    %c0_i32_0 = arith.constant 0 : i32
    %c0_i32_1 = arith.constant 0 : i32
    return %c0_i32, %c0_i32_0 : i32, i32
  }
  func.func @transform_2(%arg0: i32) -> (i32, i32) {
    %c0_i32 = arith.constant 0 : i32
    %c0_i32_0 = arith.constant 0 : i32
    %c0_i32_1 = arith.constant 0 : i32
    return %c0_i32, %c0_i32_0 : i32, i32
  }
  func.func @transform_3(%arg0: i32) -> (i32, i32) {
    %c0_i32 = arith.constant 0 : i32
    %c0_i32_0 = arith.constant 0 : i32
    %c0_i32_1 = arith.constant 0 : i32
    return %c0_i32, %c0_i32_0 : i32, i32
  }
  func.func @transform_4(%arg0: i32) -> (i32, i32) {
    %c0_i32 = arith.constant 0 : i32
    %c0_i32_0 = arith.constant 0 : i32
    %c0_i32_1 = arith.constant 0 : i32
    return %c0_i32, %c0_i32_0 : i32, i32
  }
  func.func @transform_5(%arg0: i32) -> (i32, i32) {
    %c0_i32 = arith.constant 0 : i32
    %c0_i32_0 = arith.constant 0 : i32
    %c0_i32_1 = arith.constant 0 : i32
    return %c0_i32, %c0_i32_0 : i32, i32
  }
  func.func @transform_6(%arg0: i32) -> (i32, i32) {
    %c0_i32 = arith.constant 0 : i32
    %c0_i32_0 = arith.constant 0 : i32
    %c0_i32_1 = arith.constant 0 : i32
    return %c0_i32, %c0_i32_0 : i32, i32
  }
  func.func @transform_7(%arg0: i32) -> (i32, i32) {
    %c0_i32 = arith.constant 0 : i32
    %c0_i32_0 = arith.constant 0 : i32
    %c0_i32_1 = arith.constant 0 : i32
    return %c0_i32, %c0_i32_0 : i32, i32
  }
  func.func @transform_8(%arg0: i32) -> (i32, i32) {
    %c0_i32 = arith.constant 0 : i32
    %c0_i32_0 = arith.constant 0 : i32
    %c0_i32_1 = arith.constant 0 : i32
    return %c0_i32, %c0_i32_0 : i32, i32
  }
  func.func @transform_9(%arg0: i32) -> (i32, i32) {
    %c0_i32 = arith.constant 0 : i32
    %c0_i32_0 = arith.constant 0 : i32
    %c0_i32_1 = arith.constant 0 : i32
    return %c0_i32, %c0_i32_0 : i32, i32
  }
  func.func @transform_10(%arg0: i32) -> (i32, i32) {
    %c0_i32 = arith.constant 0 : i32
    %c0_i32_0 = arith.constant 0 : i32
    %c0_i32_1 = arith.constant 0 : i32
    return %c0_i32, %c0_i32_0 : i32, i32
  }
  func.func @transform_11(%arg0: i32) -> (i32, i32) {
    %c0_i32 = arith.constant 0 : i32
    %c0_i32_0 = arith.constant 0 : i32
    %c0_i32_1 = arith.constant 0 : i32
    return %c0_i32, %c0_i32_0 : i32, i32
  }
  func.func @transform_12(%arg0: i32) -> (i32, i32) {
    %c0_i32 = arith.constant 0 : i32
    %c0_i32_0 = arith.constant 0 : i32
    %c0_i32_1 = arith.constant 0 : i32
    return %c0_i32, %c0_i32_0 : i32, i32
  }
  func.func @transform_13(%arg0: i32) -> (i32, i32, i32) {
    %c0_i32 = arith.constant 0 : i32
    %c0_i32_0 = arith.constant 0 : i32
    %c0_i32_1 = arith.constant 0 : i32
    return %arg0, %c0_i32, %c0_i32_0 : i32, i32, i32
  }
}

module attributes {stable_mosaic.version = 11 : i64} {
  func.func @mixer_block_kernel(%arg0: i32, %arg1: memref<2x32x128xf32, #tpu.memory_space<vmem>>, %arg2: memref<1x128xf32, #tpu.memory_space<vmem>>, %arg3: memref<1x128xf32, #tpu.memory_space<vmem>>, %arg4: memref<64x32xf32, #tpu.memory_space<vmem>>, %arg5: memref<64x1xf32, #tpu.memory_space<vmem>>, %arg6: memref<32x64xf32, #tpu.memory_space<vmem>>, %arg7: memref<32x1xf32, #tpu.memory_space<vmem>>, %arg8: memref<1x128xf32, #tpu.memory_space<vmem>>, %arg9: memref<1x128xf32, #tpu.memory_space<vmem>>, %arg10: memref<128x512xf32, #tpu.memory_space<vmem>>, %arg11: memref<1x512xf32, #tpu.memory_space<vmem>>, %arg12: memref<512x128xf32, #tpu.memory_space<vmem>>, %arg13: memref<1x128xf32, #tpu.memory_space<vmem>>, %arg14: memref<2x32x128xf32, #tpu.memory_space<vmem>>) attributes {dimension_semantics = [#tpu.dimension_semantics<parallel>], iteration_bounds = array<i64: 4>, scalar_prefetch = 0 : i64, scratch_operands = 0 : i64, tpu.core_type = #tpu.core_type<tc>, window_params = [{transform_indices = @transform_0, window_bounds = array<i64: 2, 32, 128>}, {pipeline_mode = #tpu.pipeline_mode<synchronous>, transform_indices = @transform_1, window_bounds = array<i64: 1, 128>}, {pipeline_mode = #tpu.pipeline_mode<synchronous>, transform_indices = @transform_2, window_bounds = array<i64: 1, 128>}, {pipeline_mode = #tpu.pipeline_mode<synchronous>, transform_indices = @transform_3, window_bounds = array<i64: 64, 32>}, {pipeline_mode = #tpu.pipeline_mode<synchronous>, transform_indices = @transform_4, window_bounds = array<i64: 64, 1>}, {pipeline_mode = #tpu.pipeline_mode<synchronous>, transform_indices = @transform_5, window_bounds = array<i64: 32, 64>}, {pipeline_mode = #tpu.pipeline_mode<synchronous>, transform_indices = @transform_6, window_bounds = array<i64: 32, 1>}, {pipeline_mode = #tpu.pipeline_mode<synchronous>, transform_indices = @transform_7, window_bounds = array<i64: 1, 128>}, {pipeline_mode = #tpu.pipeline_mode<synchronous>, transform_indices = @transform_8, window_bounds = array<i64: 1, 128>}, {pipeline_mode = #tpu.pipeline_mode<synchronous>, transform_indices = @transform_9, window_bounds = array<i64: 128, 512>}, {pipeline_mode = #tpu.pipeline_mode<synchronous>, transform_indices = @transform_10, window_bounds = array<i64: 1, 512>}, {pipeline_mode = #tpu.pipeline_mode<synchronous>, transform_indices = @transform_11, window_bounds = array<i64: 512, 128>}, {pipeline_mode = #tpu.pipeline_mode<synchronous>, transform_indices = @transform_12, window_bounds = array<i64: 1, 128>}, {transform_indices = @transform_13, window_bounds = array<i64: 2, 32, 128>}]} {
    %c0 = arith.constant 0 : index
    %c0_0 = arith.constant 0 : index
    %c0_1 = arith.constant 0 : index
    %0 = vector.load %arg1[%c0, %c0_0, %c0_1] : memref<2x32x128xf32, #tpu.memory_space<vmem>>, vector<2x32x128xf32>
    %c0_2 = arith.constant 0 : index
    %c0_3 = arith.constant 0 : index
    %1 = vector.load %arg2[%c0_2, %c0_3] : memref<1x128xf32, #tpu.memory_space<vmem>>, vector<1x128xf32>
    %c0_4 = arith.constant 0 : index
    %c0_5 = arith.constant 0 : index
    %2 = vector.load %arg3[%c0_4, %c0_5] : memref<1x128xf32, #tpu.memory_space<vmem>>, vector<1x128xf32>
    %cst = arith.constant dense<0.000000e+00> : vector<2x32xf32>
    %3 = vector.multi_reduction <add>, %0, %cst [2] : vector<2x32x128xf32> to vector<2x32xf32>
    %4 = vector.shape_cast %3 : vector<2x32xf32> to vector<2x32x1xf32>
    %cst_6 = arith.constant 1.280000e+02 : f32
    %5 = vector.broadcast %cst_6 : f32 to vector<2x32x1xf32>
    %6 = arith.divf %4, %5 : vector<2x32x1xf32>
    %7 = arith.mulf %0, %0 : vector<2x32x128xf32>
    %cst_7 = arith.constant dense<0.000000e+00> : vector<2x32xf32>
    %8 = vector.multi_reduction <add>, %7, %cst_7 [2] : vector<2x32x128xf32> to vector<2x32xf32>
    %9 = vector.shape_cast %8 : vector<2x32xf32> to vector<2x32x1xf32>
    %cst_8 = arith.constant 1.280000e+02 : f32
    %10 = vector.broadcast %cst_8 : f32 to vector<2x32x1xf32>
    %11 = arith.divf %9, %10 : vector<2x32x1xf32>
    %12 = arith.mulf %6, %6 : vector<2x32x1xf32>
    %13 = arith.subf %11, %12 : vector<2x32x1xf32>
    %14 = vector.broadcast %6 : vector<2x32x1xf32> to vector<2x32x128xf32>
    %15 = arith.subf %0, %14 : vector<2x32x128xf32>
    %cst_9 = arith.constant 9.99999974E-6 : f32
    %16 = vector.broadcast %cst_9 : f32 to vector<2x32x1xf32>
    %17 = arith.addf %13, %16 : vector<2x32x1xf32>
    %18 = math.rsqrt %17 : vector<2x32x1xf32>
    %19 = vector.broadcast %18 : vector<2x32x1xf32> to vector<2x32x128xf32>
    %20 = arith.mulf %15, %19 : vector<2x32x128xf32>
    %21 = vector.shape_cast %1 : vector<1x128xf32> to vector<1x1x128xf32>
    %22 = vector.broadcast %21 : vector<1x1x128xf32> to vector<2x32x128xf32>
    %23 = arith.mulf %20, %22 : vector<2x32x128xf32>
    %24 = vector.shape_cast %2 : vector<1x128xf32> to vector<1x1x128xf32>
    %25 = vector.broadcast %24 : vector<1x1x128xf32> to vector<2x32x128xf32>
    %26 = arith.addf %23, %25 : vector<2x32x128xf32>
    %27 = tpu.transpose %26, [1, 0, 2] : vector<2x32x128xf32> -> vector<32x2x128xf32>
    %28 = vector.shape_cast %27 : vector<32x2x128xf32> to vector<32x256xf32>
    %c0_10 = arith.constant 0 : index
    %c0_11 = arith.constant 0 : index
    %29 = vector.load %arg4[%c0_10, %c0_11] : memref<64x32xf32, #tpu.memory_space<vmem>>, vector<64x32xf32>
    %cst_12 = arith.constant dense<0.000000e+00> : vector<64x256xf32>
    %30 = tpu.matmul %29, %28, %cst_12 {dimension_numbers = #tpu.dot_dimension_numbers<[1], [0], [0], [1], [0, 0, 1, 1], [], []>} : vector<64x32xf32>, vector<32x256xf32>, vector<64x256xf32> -> vector<64x256xf32>
    %c0_13 = arith.constant 0 : index
    %c0_14 = arith.constant 0 : index
    %31 = vector.load %arg5[%c0_13, %c0_14] : memref<64x1xf32, #tpu.memory_space<vmem>>, vector<64x1xf32>
    %32 = vector.broadcast %31 : vector<64x1xf32> to vector<64x256xf32>
    %33 = arith.addf %30, %32 : vector<64x256xf32>
    %cst_15 = arith.constant 5.000000e-01 : f32
    %34 = vector.broadcast %cst_15 : f32 to vector<64x256xf32>
    %35 = arith.mulf %34, %33 : vector<64x256xf32>
    %cst_16 = arith.constant 0.707106769 : f32
    %36 = vector.broadcast %cst_16 : f32 to vector<64x256xf32>
    %37 = arith.mulf %33, %36 : vector<64x256xf32>
    %38 = math.erf %37 : vector<64x256xf32>
    %cst_17 = arith.constant 1.000000e+00 : f32
    %39 = vector.broadcast %cst_17 : f32 to vector<64x256xf32>
    %40 = arith.addf %39, %38 : vector<64x256xf32>
    %41 = arith.mulf %35, %40 : vector<64x256xf32>
    %c0_18 = arith.constant 0 : index
    %c0_19 = arith.constant 0 : index
    %42 = vector.load %arg6[%c0_18, %c0_19] : memref<32x64xf32, #tpu.memory_space<vmem>>, vector<32x64xf32>
    %cst_20 = arith.constant dense<0.000000e+00> : vector<32x256xf32>
    %43 = tpu.matmul %42, %41, %cst_20 {dimension_numbers = #tpu.dot_dimension_numbers<[1], [0], [0], [1], [0, 0, 1, 1], [], []>} : vector<32x64xf32>, vector<64x256xf32>, vector<32x256xf32> -> vector<32x256xf32>
    %c0_21 = arith.constant 0 : index
    %c0_22 = arith.constant 0 : index
    %44 = vector.load %arg7[%c0_21, %c0_22] : memref<32x1xf32, #tpu.memory_space<vmem>>, vector<32x1xf32>
    %45 = vector.broadcast %44 : vector<32x1xf32> to vector<32x256xf32>
    %46 = arith.addf %43, %45 : vector<32x256xf32>
    %47 = vector.shape_cast %46 : vector<32x256xf32> to vector<32x2x128xf32>
    %48 = tpu.transpose %47, [1, 0, 2] : vector<32x2x128xf32> -> vector<2x32x128xf32>
    %49 = arith.addf %48, %0 : vector<2x32x128xf32>
    %50 = vector.shape_cast %49 : vector<2x32x128xf32> to vector<64x128xf32>
    %c0_23 = arith.constant 0 : index
    %c0_24 = arith.constant 0 : index
    %51 = vector.load %arg8[%c0_23, %c0_24] : memref<1x128xf32, #tpu.memory_space<vmem>>, vector<1x128xf32>
    %c0_25 = arith.constant 0 : index
    %c0_26 = arith.constant 0 : index
    %52 = vector.load %arg9[%c0_25, %c0_26] : memref<1x128xf32, #tpu.memory_space<vmem>>, vector<1x128xf32>
    %cst_27 = arith.constant dense<0.000000e+00> : vector<64xf32>
    %53 = vector.multi_reduction <add>, %50, %cst_27 [1] : vector<64x128xf32> to vector<64xf32>
    %54 = vector.shape_cast %53 : vector<64xf32> to vector<64x1xf32>
    %cst_28 = arith.constant 1.280000e+02 : f32
    %55 = vector.broadcast %cst_28 : f32 to vector<64x1xf32>
    %56 = arith.divf %54, %55 : vector<64x1xf32>
    %57 = arith.mulf %50, %50 : vector<64x128xf32>
    %cst_29 = arith.constant dense<0.000000e+00> : vector<64xf32>
    %58 = vector.multi_reduction <add>, %57, %cst_29 [1] : vector<64x128xf32> to vector<64xf32>
    %59 = vector.shape_cast %58 : vector<64xf32> to vector<64x1xf32>
    %cst_30 = arith.constant 1.280000e+02 : f32
    %60 = vector.broadcast %cst_30 : f32 to vector<64x1xf32>
    %61 = arith.divf %59, %60 : vector<64x1xf32>
    %62 = arith.mulf %56, %56 : vector<64x1xf32>
    %63 = arith.subf %61, %62 : vector<64x1xf32>
    %64 = vector.broadcast %56 : vector<64x1xf32> to vector<64x128xf32>
    %65 = arith.subf %50, %64 : vector<64x128xf32>
    %cst_31 = arith.constant 9.99999974E-6 : f32
    %66 = vector.broadcast %cst_31 : f32 to vector<64x1xf32>
    %67 = arith.addf %63, %66 : vector<64x1xf32>
    %68 = math.rsqrt %67 : vector<64x1xf32>
    %69 = vector.broadcast %68 : vector<64x1xf32> to vector<64x128xf32>
    %70 = arith.mulf %65, %69 : vector<64x128xf32>
    %71 = vector.broadcast %51 : vector<1x128xf32> to vector<64x128xf32>
    %72 = arith.mulf %70, %71 : vector<64x128xf32>
    %73 = vector.broadcast %52 : vector<1x128xf32> to vector<64x128xf32>
    %74 = arith.addf %72, %73 : vector<64x128xf32>
    %c0_32 = arith.constant 0 : index
    %c0_33 = arith.constant 0 : index
    %75 = vector.load %arg10[%c0_32, %c0_33] : memref<128x512xf32, #tpu.memory_space<vmem>>, vector<128x512xf32>
    %cst_34 = arith.constant dense<0.000000e+00> : vector<64x512xf32>
    %76 = tpu.matmul %74, %75, %cst_34 {dimension_numbers = #tpu.dot_dimension_numbers<[1], [0], [0], [1], [0, 0, 1, 1], [], []>} : vector<64x128xf32>, vector<128x512xf32>, vector<64x512xf32> -> vector<64x512xf32>
    %c0_35 = arith.constant 0 : index
    %c0_36 = arith.constant 0 : index
    %77 = vector.load %arg11[%c0_35, %c0_36] : memref<1x512xf32, #tpu.memory_space<vmem>>, vector<1x512xf32>
    %78 = vector.broadcast %77 : vector<1x512xf32> to vector<64x512xf32>
    %79 = arith.addf %76, %78 : vector<64x512xf32>
    %cst_37 = arith.constant 5.000000e-01 : f32
    %80 = vector.broadcast %cst_37 : f32 to vector<64x512xf32>
    %81 = arith.mulf %80, %79 : vector<64x512xf32>
    %cst_38 = arith.constant 0.707106769 : f32
    %82 = vector.broadcast %cst_38 : f32 to vector<64x512xf32>
    %83 = arith.mulf %79, %82 : vector<64x512xf32>
    %84 = math.erf %83 : vector<64x512xf32>
    %cst_39 = arith.constant 1.000000e+00 : f32
    %85 = vector.broadcast %cst_39 : f32 to vector<64x512xf32>
    %86 = arith.addf %85, %84 : vector<64x512xf32>
    %87 = arith.mulf %81, %86 : vector<64x512xf32>
    %c0_40 = arith.constant 0 : index
    %c0_41 = arith.constant 0 : index
    %88 = vector.load %arg12[%c0_40, %c0_41] : memref<512x128xf32, #tpu.memory_space<vmem>>, vector<512x128xf32>
    %cst_42 = arith.constant dense<0.000000e+00> : vector<64x128xf32>
    %89 = tpu.matmul %87, %88, %cst_42 {dimension_numbers = #tpu.dot_dimension_numbers<[1], [0], [0], [1], [0, 0, 1, 1], [], []>} : vector<64x512xf32>, vector<512x128xf32>, vector<64x128xf32> -> vector<64x128xf32>
    %c0_43 = arith.constant 0 : index
    %c0_44 = arith.constant 0 : index
    %90 = vector.load %arg13[%c0_43, %c0_44] : memref<1x128xf32, #tpu.memory_space<vmem>>, vector<1x128xf32>
    %91 = vector.broadcast %90 : vector<1x128xf32> to vector<64x128xf32>
    %92 = arith.addf %89, %91 : vector<64x128xf32>
    %93 = arith.addf %92, %50 : vector<64x128xf32>
    %94 = vector.shape_cast %93 : vector<64x128xf32> to vector<2x32x128xf32>
    %c0_45 = arith.constant 0 : index
    %c0_46 = arith.constant 0 : index
    %c0_47 = arith.constant 0 : index
    %95 = vector.load %arg14[%c0_45, %c0_46, %c0_47] : memref<2x32x128xf32, #tpu.memory_space<vmem>>, vector<2x32x128xf32>
    tpu.vector_store %arg14[%c0_45, %c0_46, %c0_47], %94 {strides = array<i32>} : memref<2x32x128xf32, #tpu.memory_space<vmem>>, vector<2x32x128xf32>,
    return
  }
  func.func @transform_0(%arg0: i32) -> (i32, i32, i32) {
    %c0_i32 = arith.constant 0 : i32
    %c0_i32_0 = arith.constant 0 : i32
    %c0_i32_1 = arith.constant 0 : i32
    return %arg0, %c0_i32, %c0_i32_0 : i32, i32, i32
  }
  func.func @transform_1(%arg0: i32) -> (i32, i32) {
    %c0_i32 = arith.constant 0 : i32
    %c0_i32_0 = arith.constant 0 : i32
    %c0_i32_1 = arith.constant 0 : i32
    return %c0_i32, %c0_i32_0 : i32, i32
  }
  func.func @transform_2(%arg0: i32) -> (i32, i32) {
    %c0_i32 = arith.constant 0 : i32
    %c0_i32_0 = arith.constant 0 : i32
    %c0_i32_1 = arith.constant 0 : i32
    return %c0_i32, %c0_i32_0 : i32, i32
  }
  func.func @transform_3(%arg0: i32) -> (i32, i32) {
    %c0_i32 = arith.constant 0 : i32
    %c0_i32_0 = arith.constant 0 : i32
    %c0_i32_1 = arith.constant 0 : i32
    return %c0_i32, %c0_i32_0 : i32, i32
  }
  func.func @transform_4(%arg0: i32) -> (i32, i32) {
    %c0_i32 = arith.constant 0 : i32
    %c0_i32_0 = arith.constant 0 : i32
    %c0_i32_1 = arith.constant 0 : i32
    return %c0_i32, %c0_i32_0 : i32, i32
  }
  func.func @transform_5(%arg0: i32) -> (i32, i32) {
    %c0_i32 = arith.constant 0 : i32
    %c0_i32_0 = arith.constant 0 : i32
    %c0_i32_1 = arith.constant 0 : i32
    return %c0_i32, %c0_i32_0 : i32, i32
  }
  func.func @transform_6(%arg0: i32) -> (i32, i32) {
    %c0_i32 = arith.constant 0 : i32
    %c0_i32_0 = arith.constant 0 : i32
    %c0_i32_1 = arith.constant 0 : i32
    return %c0_i32, %c0_i32_0 : i32, i32
  }
  func.func @transform_7(%arg0: i32) -> (i32, i32) {
    %c0_i32 = arith.constant 0 : i32
    %c0_i32_0 = arith.constant 0 : i32
    %c0_i32_1 = arith.constant 0 : i32
    return %c0_i32, %c0_i32_0 : i32, i32
  }
  func.func @transform_8(%arg0: i32) -> (i32, i32) {
    %c0_i32 = arith.constant 0 : i32
    %c0_i32_0 = arith.constant 0 : i32
    %c0_i32_1 = arith.constant 0 : i32
    return %c0_i32, %c0_i32_0 : i32, i32
  }
  func.func @transform_9(%arg0: i32) -> (i32, i32) {
    %c0_i32 = arith.constant 0 : i32
    %c0_i32_0 = arith.constant 0 : i32
    %c0_i32_1 = arith.constant 0 : i32
    return %c0_i32, %c0_i32_0 : i32, i32
  }
  func.func @transform_10(%arg0: i32) -> (i32, i32) {
    %c0_i32 = arith.constant 0 : i32
    %c0_i32_0 = arith.constant 0 : i32
    %c0_i32_1 = arith.constant 0 : i32
    return %c0_i32, %c0_i32_0 : i32, i32
  }
  func.func @transform_11(%arg0: i32) -> (i32, i32) {
    %c0_i32 = arith.constant 0 : i32
    %c0_i32_0 = arith.constant 0 : i32
    %c0_i32_1 = arith.constant 0 : i32
    return %c0_i32, %c0_i32_0 : i32, i32
  }
  func.func @transform_12(%arg0: i32) -> (i32, i32) {
    %c0_i32 = arith.constant 0 : i32
    %c0_i32_0 = arith.constant 0 : i32
    %c0_i32_1 = arith.constant 0 : i32
    return %c0_i32, %c0_i32_0 : i32, i32
  }
  func.func @transform_13(%arg0: i32) -> (i32, i32, i32) {
    %c0_i32 = arith.constant 0 : i32
    %c0_i32_0 = arith.constant 0 : i32
    %c0_i32_1 = arith.constant 0 : i32
    return %arg0, %c0_i32, %c0_i32_0 : i32, i32, i32
  }
}

</mosaic_0001>

<bundles_post_ra>
// kernel: tpu_custom_call.1
= control target key start
LH: loop header
LB: loop body
LE: loop exit
PB: predicated region body
PF: predicated region fallthrough
CT: control target
= control target key end

     0   :  { %s4737_s0 = inlined_call_operand.hbm [shape: f32[8,32,128], index: 0, kind: input, shape index: {}]   ;;  %s4738_s1 = inlined_call_operand.vmem [shape: f32[1,128], index: 1, kind: input, shape index: {}]   ;;  %s4739_s2 = inlined_call_operand.vmem [shape: f32[1,128], index: 2, kind: input, shape index: {}]   ;;  %s4740_s3 = inlined_call_operand.vmem [shape: f32[64,32], index: 3, kind: input, shape index: {}]   ;;  %s4741_s4 = inlined_call_operand.vmem [shape: f32[64,1], index: 4, kind: input, shape index: {}]   ;;  %s4742_s5 = inlined_call_operand.vmem [shape: f32[32,64], index: 5, kind: input, shape index: {}]   ;;  %s4743_s6 = inlined_call_operand.vmem [shape: f32[32,1], index: 6, kind: input, shape index: {}]   ;;  %s4744_s7 = inlined_call_operand.vmem [shape: f32[1,128], index: 7, kind: input, shape index: {}]   ;;  %s4745_s8 = inlined_call_operand.vmem [shape: f32[1,128], index: 8, kind: input, shape index: {}]   ;;  %s4746_s9 = inlined_call_operand.hbm [shape: f32[128,512], index: 9, kind: input, shape index: {}]   ;;  %s4747_s10 = inlined_call_operand.vmem [shape: f32[1,512], index: 10, kind: input, shape index: {}]   ;;  %s4748_s11 = inlined_call_operand.hbm [shape: f32[512,128], index: 11, kind: input, shape index: {}]   ;;  %s4749_s12 = inlined_call_operand.vmem [shape: f32[1,128], index: 12, kind: input, shape index: {}]   ;;  %s4750_s13 = inlined_call_operand.hbm [shape: f32[8,32,128], index: 13, kind: output, shape index: {}]  }
   0x1   :  { %4788 = sst [smem:[#allocation44_spill]] %s4746_s9 }
   0x2   :  { %4789 = sst [smem:[#allocation45_spill]] %s4748_s11 }
   0x3   :  { %18 = vsyncpa [#allocation3], 0 }
   0x4   :  { %20 = vsyncpa [#allocation3 + $0x1], 0 }
   0x5   :  { %21 = vsyncpa [#allocation6], 0 }
   0x6   :  { %22 = vsyncpa [#allocation4], 0 }
   0x7   :  { %24 = vsyncpa [#allocation4 + $0x1], 0  ;;  %s3634_s25 = smov 0   ;;  %s3636_s26 = smov 0  }
   0x8   :  { %s3638_s27 = smov 0   ;;  %s3640_s28 = smov 0  }
   0x9 LB: > { %4790 = sst [smem:[#allocation12_spill]] %s3536_s25  ;;  %s3655_s29 = sadd.s32 4294967295, %s3548_s28   ;;  %s3548_s28 = sphi %s3640_s28, %s4868_s28   ;;  %s3544_s27 = sphi %s3638_s27, %s4870_s27   ;;  %s3540_s26 = sphi %s3636_s26, %s4872_s26   ;;  %s3536_s25 = sphi %s3634_s25, %s4871_s25  }
   0xa   : > { %4791 = sst [smem:[#allocation13_spill]] %s3544_s27  ;;  %s2984_s30 = sadd.s32 4294967294, %s3548_s28  }
   0xb   : > { %p50_p0 = scmp.ne.s32.totalorder %s3540_s26, %s3536_s25  ;;  %p4751_p1 = scmp.eq.s32.totalorder %s3655_s29, 0 }
   0xc   : > { %p332_p3 = scmp.eq.s32.totalorder %s2984_s30, 3  ;;  %p2985_p5 = scmp.ge.s32.totalorder %s3548_s28, 1 }
   0xd   : > { %p3664_p4 = por %p4751_p1, %p50_p0  ;;  %p339_p7 = scmp.lt.s32.totalorder %s3548_s28, 5 }
   0xe   : > { %p3669_p6 = por %p332_p3, %p50_p0  ;;  %s3550_s17 = smov [#allocation5]  }
   0xf   : > { %s4792_s14 = scalar_select %p3664_p4, 1, 0 }
  0x10   : > { %s4793_s15 = scalar_select %p3669_p6, 1, 0 }
  0x11   : > { %p3674_p8 = pnand %p2985_p5, %p339_p7  ;;  %s375_s18 = sshll.u32 %s3550_s17, 4  ;;  %s376_s18 = int_to_ptr.vmem [resolvable:$true] %s375_s18 }
  0x12   : > { %4794 = sst [smem:[#allocation14_spill]] %s4793_s15  ;;  %s3551_s20 = smov [#allocation7]  }
  0x13   : > { %s4795_s16 = scalar_select %p3674_p8, 1, 0 }
  0x14   : > { %p3197_p9 = pneg %p3674_p8  ;;  %s391_s21 = sshll.u32 %s3551_s20, 4  ;;  %s392_s21 = int_to_ptr.vmem [resolvable:$true] %s391_s21 }
  0x15   : > { %s3411_s22 = scalar_lea.vmem %s376_s18, 8192  ;;  %p3419_p3 = scmp.lt.s32.totalorder %s376_s18, %s376_s18 }
  0x16   : > { %p3682_p10 = pnand %p3197_p9, %p4751_p1  ;;  %p3412_p12 = scmp.ne.s32.totalorder %s376_s18, %s3411_s22 }
  0x17   : > { %p3420_p5 = scmp.lt.s32.totalorder %s3411_s22, %s3411_s22 }
  0x18   : > { %p3402_p11 = pneg %p3682_p10 }
  0x19   : > { %p3421_p7 = por %p3420_p5, %p3419_p3 }
  0x1a   : > { %p3414_p13 = pnand %p3412_p12, %p3402_p11 }
  0x1c   : > { %p3415_p0 = pneg %p3414_p13 }
  0x1e   : > { %p3422_p9 = pnand %p3421_p7, %p3415_p0 }
  0x20   : > { %3425 = shalt.err (!%p3422_p9)
}
  0x21   : > { %s3552_s23 = smov 512   ;;  %s3553_s24 = smov 32  }
  0x22   : > { %s4797_s9 = sld [smem:[#allocation44_spill]]  ;;  %s3437_s20 = scalar_lea.vmem %s392_s21, 8192 }
  0x23   : > { %p3438_p1 = scmp.ne.s32.totalorder %s392_s21, %s3437_s20  ;;  %p3445_p2 = scmp.lt.s32.totalorder %s392_s21, %s392_s21 }
  0x24   : > { %p3446_p6 = scmp.lt.s32.totalorder %s3437_s20, %s3437_s20 }
  0x25   : > { %p3440_p12 = pnand %p3438_p1, %p3402_p11 }
  0x26   : > { %p3447_p3 = por %p3446_p6, %p3445_p2 }
  0x27   : > { %p3441_p13 = pneg %p3440_p12 }
  0x28   : > { %3200 = dma.hbm_to_vmem [thread:$0]  (!%p3682_p10), %s4797_s9, 8192, %s376_s18, [#allocation6], %s3552_s23, %s3552_s23, %s3553_s24  }
  0x29   : > { %p3448_p0 = pnand %p3447_p3, %p3441_p13 }
  0x2b   : > { %3451 = shalt.err (!%p3448_p0)
}
  0x2c   : > { %s4753_s22 = smov 128   ;;  %s4754_s18 = smov 8  }
  0x2d   : > { %s4798_s11 = sld [smem:[#allocation45_spill]]  ;;  %s3708_s30 = sadd.s32 1, %s3548_s28  }
  0x2e   : > { %4799 = sst [smem:[#allocation15_spill]] %s3708_s30  ;;  %s34_s17 = ssub.s32 %s3548_s28, %s3708_s30 }
  0x2f   : > { %p35_p1 = scmp.eq.s32.totalorder %s34_s17, 0  ;;  %s37_s20 = sadd.s32 1, %s3544_s27 }
  0x30   : > { %p44_p2 = scmp.ne.s32.totalorder %s3544_s27, %s3540_s26  ;;  %p45_p6 = scmp.eq.s32.totalorder %s3548_s28, 0 }
  0x31   : > { %s3717_s9 = scalar_select %p35_p1, %s3544_s27, %s37_s20  }
  0x32   : > { %p46_p11 = por %p45_p6, %p44_p2  ;;  %p4801_p5 = scmp.eq.s32.totalorder %s3655_s29, 3 }
  0x33   : > { %3203 = dma.hbm_to_vmem [thread:$0]  (!%p3682_p10), %s4798_s11, 8192, %s392_s21, [#allocation6], %s4753_s22, %s4753_s22, %s4754_s18  }
  0x34   : > { %4800 = sst [smem:[#allocation16_spill]] %s3717_s9  ;;  %p3721_p7 = por %p4801_p5, %p44_p2 }
  0x35   : > { %p3214_p9 = scmp.lt.s32.totalorder %s3548_s28, 4  ;;  %s408_s15 = sand.u32 1, %s3544_s27  }
  0x36   : > { %s4802_s19 = scalar_select %p3721_p7, 1, 0 }
  0x37   : > { %s2989_s23 = sshll.u32 %s408_s15, 6  ;;  %s3038_s21 = sshll.u32 %s3548_s28, 10 }
  0x38   : > { %s3731_s18 = scalar_lea.hbm %s4737_s0, %s3038_s21  ;;  %s412_s17 = scalar_lea.vmem [#allocation2], %s2989_s23 }
  0x39   : > { %s420_s20 = sshll.u32 %s412_s17, 4  ;;  %p3735_p10 = pnand %p3214_p9, %p46_p11  ;;  %s3733_s20 = int_to_ptr.vmem [resolvable:$true] %s420_s20 }
  0x3a   : > { %s3739_s9 = scalar_lea.sflag [#allocation3], %s408_s15  ;;  %s3452_s27 = scalar_lea.hbm %s3731_s18, 1024 }
  0x3b   : > { %p3453_p12 = scmp.ne.s32.totalorder %s3731_s18, %s3452_s27  ;;  %p3454_p13 = pneg %p3735_p10 }
  0x3c   : > { %s3457_s23 = scalar_lea.hbm %s4737_s0, 4096  ;;  %p3458_p1 = scmp.lt.s32.totalorder %s3731_s18, %s4737_s0 }
  0x3d   : > { %p3455_p3 = pnand %p3454_p13, %p3453_p12  ;;  %p3459_p2 = scmp.lt.s32.totalorder %s3457_s23, %s3452_s27 }
  0x3f   : > { %p3456_p0 = pneg %p3455_p3  ;;  %p3460_p6 = por %p3459_p2, %p3458_p1 }
  0x41   : > { %p3461_p11 = pnand %p3460_p6, %p3456_p0 }
  0x43   : > { %3464 = shalt.err (!%p3461_p11)
}
  0x44   : > { %s3465_s15 = scalar_lea.vmem %s3733_s20, 1024  ;;  %s3556_s30 = smov [#allocation2]  }
  0x45   : > { %p3466_p5 = scmp.ne.s32.totalorder %s3733_s20, %s3465_s15  ;;  %s3470_s25 = sshll.u32 %s3556_s30, 4  ;;  %s3471_s25 = int_to_ptr.vmem [resolvable:$false] %s3470_s25 }
  0x46   : > { %s3472_s22 = scalar_lea.vmem %s3471_s25, 2048  ;;  %p3473_p3 = scmp.lt.s32.totalorder %s3733_s20, %s3471_s25 }
  0x47   : > { %p3468_p9 = pnand %p3466_p5, %p3454_p13  ;;  %p3474_p7 = scmp.lt.s32.totalorder %s3472_s22, %s3465_s15 }
  0x49   : > { %p3469_p12 = pneg %p3468_p9  ;;  %p3475_p4 = por %p3474_p7, %p3473_p3 }
  0x4b   : > { %p3476_p8 = pnand %p3475_p4, %p3469_p12 }
  0x4d   : > { %3479 = shalt.err (!%p3476_p8)
}
  0x4e   : > { %s4804_s27 = smov 8   ;;  %s4805_s21 = smov 128  }
  0x4f   : > { %3207 = dma.hbm_to_vmem [thread:$0]  (!%p3735_p10), %s3731_s18, 1024, %s3733_s20, %s3739_s9, %s4805_s21, %s4805_s21, %s4804_s27  }
  0x50   : > { %p4806_p13 = scmp.ne.s32.totalorder %s4795_s16, 0 }
  0x52   : > { %432 = sbr.rel (%p4806_p13) target bundleno = 1440 (0x5a0), region = 72 }
  0x57   : > { %s3766_s30 = sand.u32 1, %s3540_s26   ;;  %p4807_p4 = scmp.ne.s32.totalorder %s4792_s14, 0 }
  0x58   : > { %s2994_s25 = sshll.u32 %s3766_s30, 6  ;;  %s435_s23 = scalar_lea.sflag [#allocation3], %s3766_s30 }
  0x59   : > { %s3772_s11 = scalar_lea.vmem [#allocation2], %s2994_s25 }
  0x5a   : > { %3523 = dma.done.wait (%p4807_p4), %s435_s23, 1024  }
  0x5b   : > { %3525 = vsyncadd (%p4807_p4), %s435_s23, 4294966272  ;;  %p4808_p8 = scmp.eq.s32.totalorder %s3655_s29, 0 }
  0x5d   : > { %3527 = dma.done.wait (%p4808_p8), [#allocation6], 16384   ;;  %p4809_p7 = pmov %p4808_p8 }
  0x5e   : > { %v3783_v0 = vld [vmem:[%s3772_s11 + $0x18] sm:$0xff]  ;;  %v3786_v1 = vld [vmem:[%s3772_s11 + $0x10] sm:$0xff]  ;;  %v3803_v6 = vld [vmem:[%s3772_s11 + $0x28] sm:$0xff]  ;;  %v3557_v16 = vmov 0.0   ;;  %v3558_v18 = vmov 0   ;;  %vm1154_vm0 = vcmask 261120  }
  0x5f   : > { %3529 = vsyncadd (%p4809_p7), [#allocation6], 4294950912  ;;  %507 = vadd.xlane.f32.xlu0 %v3783_v0  ;;  %505 = vadd.xlane.f32.xlu1 %v3786_v1  ;;  %v3791_v2 = vld [vmem:[%s3772_s11 + $0x38] sm:$0xff]  ;;  %v3794_v3 = vld [vmem:[%s3772_s11 + $0x30] sm:$0xff]  ;;  %v529_v4 = vmul.f32 %v3783_v0, %v3783_v0  ;;  %v528_v9 = vmul.f32 %v3786_v1, %v3786_v1  ;;  %v531_v12 = vmul.f32 %v3803_v6, %v3803_v6  ;;  %vm1400_vm1 = vcmask 523264   ;;  %s4664_s23 = scalar_lea.vmem [#allocation8], %s2994_s25 }
  0x60   : > { %v533_v5 = vmul.f32 %v3791_v2, %v3791_v2  ;;  %v3806_v7 = vld [vmem:[%s3772_s11 + $0x8] sm:$0xff]  ;;  %v532_v8 = vmul.f32 %v3794_v3, %v3794_v3  ;;  %v3815_v10 = vld [vmem:[%s3772_s11 + $0x20] sm:$0xff]  ;;  %1243 = vmatprep.mubr.f32.mxu0 %v3557_v16  ;;  %1477 = vmatprep.mubr.f32.mxu1 %v3557_v16  ;;  %v1112_v17 = vld [vmem:[%s4741_s4 + $0x30] sm:$0xff]  ;;  %s3040_s25 = sshll.u32 %s3655_s29, 10  ;;  %s2892_s9 = sshll.u32 %s4664_s23, 4  ;;  %s4692_s9 = int_to_ptr.vmem [resolvable:$true] %s2892_s9 }
  0x61   : > { %v3818_v11 = vld [vmem:[%s3772_s11] sm:$0xff]  ;;  %v527_v13 = vmul.f32 %v3806_v7, %v3806_v7  ;;  %v530_v14 = vmul.f32 %v3815_v10, %v3815_v10  ;;  %3263 = vset.pattern.permute.xlu1 %v3558_v18  ;;  %3262 = vset.pattern.permute.xlu0 %v3558_v18  ;;  %v1111_v19 = vld [vmem:[%s4741_s4 + $0x28] sm:$0xff]  ;;  %v1113_v20 = vld [vmem:[%s4741_s4 + $0x38] sm:$0xff]  ;;  %s4690_s18 = scalar_lea.hbm %s4750_s13, %s3040_s25  ;;  %s3480_s29 = scalar_lea.vmem %s4692_s9, 1024 }
  0x62   : > { %v526_v15 = vmul.f32 %v3818_v11, %v3818_v11  ;;  %v1377_v21 = vld [vmem:[%s4743_s6 + $0x8] sm:$0xff]  ;;  %v1110_v22 = vld [vmem:[%s4741_s4 + $0x20] sm:$0xff]  ;;  %v1379_v23 = vld [vmem:[%s4743_s6 + $0x18] sm:$0xff]  ;;  %p3481_p10 = scmp.ne.s32.totalorder %s4692_s9, %s3480_s29  ;;  %p4864_p0 = scmp.ne.s32.totalorder %s4802_s19, 0 }
  0x63   : > { %515 = vadd.xlane.f32.xlu0 %v3791_v2  ;;  %513 = vadd.xlane.f32.xlu1 %v3794_v3  ;;  %v1109_v24 = vld [vmem:[%s4741_s4 + $0x18] sm:$0xff]  ;;  %v1108_v25 = vld [vmem:[%s4741_s4 + $0x10] sm:$0xff]  ;;  %v1107_v26 = vld [vmem:[%s4741_s4 + $0x8] sm:$0xff]  ;;  %s3561_s20 = smov [#allocation8]  }
  0x64   : > { %v1106_v29 = vld [vmem:[%s4741_s4] sm:$0xff]  ;;  %v1378_v43 = vld [vmem:[%s4743_s6 + $0x10] sm:$0xff]  ;;  %p3482_p1 = pnand %p3481_p10, %p4864_p0  ;;  %s3484_s24 = sshll.u32 %s3561_s20, 4  ;;  %s3485_s24 = int_to_ptr.vmem [resolvable:$false] %s3484_s24 }
  0x65   : > { %v1376_v34 = vld [vmem:[%s4743_s6] sm:$0xff]  ;;  %s3486_s17 = scalar_lea.vmem %s3485_s24, 2048  ;;  %p3487_p6 = scmp.lt.s32.totalorder %s4692_s9, %s3485_s24 }
  0x66   : > { %p3483_p2 = pneg %p3482_p1  ;;  %p3488_p11 = scmp.lt.s32.totalorder %s3486_s17, %s3480_s29 }
  0x67   : > { %540 = vadd.xlane.f32.xlu0 %v529_v4  ;;  %548 = vadd.xlane.f32.xlu1 %v533_v5  ;;  %v3559_v4 = vmov 1983009808  }
  0x68   : > { %v636_v5 = vunpack.c.l.s4 %v3559_v4  ;;  %p3489_p5 = por %p3488_p11, %p3487_p6 }
  0x6a   : > { %p3490_p9 = pnand %p3489_p5, %p3483_p2 }
  0x6b   : > { %511 = vadd.xlane.f32.xlu1 %v3803_v6  ;;  %503 = vadd.xlane.f32.xlu0 %v3806_v7 }
  0x6f   : > { %546 = vadd.xlane.f32.xlu1 %v532_v8  ;;  %538 = vadd.xlane.f32.xlu0 %v528_v9  ;;  %v638_v8 = vlaneseq }
  0x73   : > { %509 = vadd.xlane.f32.xlu1 %v3815_v10  ;;  %501 = vadd.xlane.f32.xlu0 %v3818_v11 }
  0x77   : > { %544 = vadd.xlane.f32.xlu1 %v531_v12  ;;  %536 = vadd.xlane.f32.xlu0 %v527_v13 }
  0x7b   : > { %542 = vadd.xlane.f32.xlu1 %v530_v14  ;;  %534 = vadd.xlane.f32.xlu0 %v526_v15 }
  0x8c   : > { %1146 = vperm.xlu1 %3263, %v1112_v17  }
  0x90   : > { %1141 = vperm.xlu1 %3263, %v1111_v19  }
  0x91   : > { %1151 = vperm.xlu0 %3262, %v1113_v20   ;;  %v637_v20 = vunpack.c.0.s8 %v636_v5 }
  0x94   : > { %1136 = vperm.xlu1 %3263, %v1110_v22  }
  0x95   : > { %1387 = vperm.xlu0 %3262, %v1377_v21   ;;  %v3560_v21 = vmov 1934713408  }
  0x96   : > { %v667_v22 = vunpack.c.l.s4 %v3560_v21 }
  0x98   : > { %1131 = vperm.xlu1 %3263, %v1109_v24  }
  0x99   : > { %1397 = vperm.xlu0 %3262, %v1379_v23  }
  0x9c   : > { %1126 = vperm.xlu1 %3263, %v1108_v25  }
  0xa0   : > { %1121 = vperm.xlu1 %3263, %v1107_v26   ;;  %v3898_v26 = vshrl.u32 %v638_v8, 7 }
  0xa4   : > { %1116 = vperm.xlu1 %3263, %v1106_v29   ;;  %v3905_v29 = vld [vmem:[%s4738_s1] ss:$0 sm:$0xff] }
  0xa8   : > { %1382 = vperm.xlu1 %3263, %v1376_v34  }
  0xac   : > { %1392 = vperm.xlu1 %3263, %v1378_v43   ;;  %v3918_v43 = vsub.s32 %v637_v20, %v3898_v26 }
  0xe8   : > { %v508_v27 = vpop.xlane.xlu0 %507  ;;  %v506_v28 = vpop.xlane.xlu1 %505 }
  0xe9   : > { %v3862_v32 = vmul.f32 0.0078125, %v508_v27  ;;  %v3876_v46 = vmul.f32 0.0078125, %v506_v28 }
  0xeb   : > { %v561_v37 = vmul.f32 %v3862_v32, %v3862_v32  ;;  %v560_v52 = vmul.f32 %v3876_v46, %v3876_v46  ;;  %v577_v23 = vsub.f32 %v3783_v0, %v3862_v32 }
  0xec   : > { %v516_v30 = vpop.xlane.xlu0 %515  ;;  %v514_v31 = vpop.xlane.xlu1 %513 }
  0xed   : > { %v3864_v33 = vmul.f32 0.0078125, %v516_v30  ;;  %v3878_v47 = vmul.f32 0.0078125, %v514_v31 }
  0xef   : > { %v565_v38 = vmul.f32 %v3864_v33, %v3864_v33  ;;  %v564_v53 = vmul.f32 %v3878_v47, %v3878_v47  ;;  %v581_v28 = vsub.f32 %v3791_v2, %v3864_v33  ;;  %v3914_v33 = vld [vmem:[%s4739_s2] ss:$0 sm:$0xff] }
  0xf0   : > { %v541_v35 = vpop.xlane.xlu0 %540  ;;  %v549_v36 = vpop.xlane.xlu1 %548 }
  0xf1   : > { %v553_v39 = vmul.f32 0.0078125, %v541_v35  ;;  %v557_v40 = vmul.f32 0.0078125, %v549_v36 }
  0xf3   : > { %v569_v41 = vsub.f32 %v553_v39, %v561_v37  ;;  %v573_v42 = vsub.f32 %v557_v40, %v565_v38  ;;  %v668_v40 = vunpack.c.0.s8 %v667_v22 }
  0xf4   : > { %v512_v44 = vpop.xlane.xlu1 %511  ;;  %v504_v45 = vpop.xlane.xlu0 %503 }
  0xf5   : > { %v585_v48 = vadd.f32 1e-05, %v569_v41  ;;  %v589_v49 = vadd.f32 1e-05, %v573_v42  ;;  %v3884_v60 = vmul.f32 0.0078125, %v512_v44  ;;  %v3886_v61 = vmul.f32 0.0078125, %v504_v45 }
  0xf7   : > { %3264 = vrsqrt.f32 %v585_v48  ;;  %v563_v14 = vmul.f32 %v3884_v60, %v3884_v60  ;;  %v559_v15 = vmul.f32 %v3886_v61, %v3886_v61 }
  0xf8   : > { %3266 = vrsqrt.f32 %v589_v49  ;;  %v547_v50 = vpop.xlane.xlu1 %546  ;;  %v539_v51 = vpop.xlane.xlu0 %538 }
  0xf9   : > { %v556_v54 = vmul.f32 0.0078125, %v547_v50  ;;  %v552_v55 = vmul.f32 0.0078125, %v539_v51 }
  0xfb   : > { %v572_v56 = vsub.f32 %v556_v54, %v564_v53  ;;  %v568_v57 = vsub.f32 %v552_v55, %v560_v52  ;;  %v3924_v52 = vsub.s32 %v668_v40, %v3898_v26  ;;  %v580_v53 = vsub.f32 %v3794_v3, %v3878_v47 }
  0xfc   : > { %v510_v58 = vpop.xlane.xlu1 %509  ;;  %v502_v59 = vpop.xlane.xlu0 %501 }
  0xfd   : > { %v588_v62 = vadd.f32 1e-05, %v572_v56  ;;  %v584_v63 = vadd.f32 1e-05, %v568_v57  ;;  %v3888_v9 = vmul.f32 0.0078125, %v510_v58  ;;  %v3894_v19 = vmul.f32 0.0078125, %v502_v59 }
  0xfe   : > { %v576_v57 = vsub.f32 %v3786_v1, %v3876_v46 }
  0xff   : > { %3268 = vrsqrt.f32 %v588_v62  ;;  %v562_v30 = vmul.f32 %v3888_v9, %v3888_v9  ;;  %v558_v39 = vmul.f32 %v3894_v19, %v3894_v19 }
 0x100   : > { %3270 = vrsqrt.f32 %v584_v63  ;;  %v545_v12 = vpop.xlane.xlu1 %544  ;;  %v537_v13 = vpop.xlane.xlu0 %536 }
 0x101   : > { %v555_v17 = vmul.f32 0.0078125, %v545_v12  ;;  %v551_v18 = vmul.f32 0.0078125, %v537_v13  ;;  %v579_v12 = vsub.f32 %v3803_v6, %v3884_v60 }
 0x103   : > { %v571_v24 = vsub.f32 %v555_v17, %v563_v14  ;;  %v567_v25 = vsub.f32 %v551_v18, %v559_v15  ;;  %v575_v17 = vsub.f32 %v3806_v7, %v3886_v61  ;;  %v578_v18 = vsub.f32 %v3815_v10, %v3888_v9 }
 0x104   : > { %v3265_v27 = vpop.eup %3264  ;;  %v543_v31 = vpop.xlane.xlu1 %542 }
 0x105   : > { %v535_v34 = vpop.xlane.xlu0 %534  ;;  %v3267_v35 = vpop.eup %3266  ;;  %v601_v0 = vmul.f32 %v3265_v27, %v577_v23  ;;  %v587_v32 = vadd.f32 1e-05, %v571_v24  ;;  %v583_v36 = vadd.f32 1e-05, %v567_v25  ;;  %v554_v37 = vmul.f32 0.0078125, %v543_v31 }
 0x106   : > { %v605_v38 = vmul.f32 %v3267_v35, %v581_v28  ;;  %v550_v2 = vmul.f32 0.0078125, %v535_v34  ;;  %v574_v24 = vsub.f32 %v3818_v11, %v3894_v19 }
 0x107   : > { %3272 = vrsqrt.f32 %v587_v32  ;;  %v570_v41 = vsub.f32 %v554_v37, %v562_v30  ;;  %v615_v42 = vmul.f32 %v3905_v29, %v601_v0 }
 0x108   : > { %3274 = vrsqrt.f32 %v583_v36  ;;  %v566_v44 = vsub.f32 %v550_v2, %v558_v39  ;;  %v619_v45 = vmul.f32 %v3905_v29, %v605_v38 }
 0x109   : > { %v586_v48 = vadd.f32 1e-05, %v570_v41  ;;  %v629_v49 = vadd.f32 %v3914_v33, %v615_v42 }
 0x10a   : > { %v582_v50 = vadd.f32 1e-05, %v566_v44  ;;  %v633_v51 = vadd.f32 %v3914_v33, %v619_v45 }
 0x10b   : > { %3276 = vrsqrt.f32 %v586_v48  ;;  %v832_v54 = vcombine.high %v629_v49, %v3557_v16  ;;  %v839_v55 = vrot.slane %v629_v49, %v3918_v43 }
 0x10c   : > { %v3269_v56 = vpop.eup %3268  ;;  %3278 = vrsqrt.f32 %v582_v50  ;;  %v847_v58 = vcombine.high %v633_v51, %v3557_v16  ;;  %v854_v59 = vrot.slane %v633_v51, %v3918_v43 }
 0x10d   : > { %v3271_v62 = vpop.eup %3270  ;;  %v604_v63 = vmul.f32 %v3269_v56, %v580_v53  ;;  %v846_v4 = vrot.slane %v832_v54, %v3918_v43 }
 0x10e   : > { %v600_v5 = vmul.f32 %v3271_v62, %v576_v57  ;;  %v861_v3 = vrot.slane %v847_v58, %v3918_v43  ;;  %v862_v47 = vcombine.low %v839_v55, %v854_v59  ;;  %v863_v8 = vcombine.high %v839_v55, %v854_v59 }
 0x10f   : > { %v618_v13 = vmul.f32 %v3905_v29, %v604_v63 }
 0x110   : > { %v614_v1 = vmul.f32 %v3905_v29, %v600_v5  ;;  %v870_v46 = vrot.slane %v862_v47, %v3924_v52  ;;  %v877_v14 = vrot.slane %v863_v8, %v3924_v52  ;;  %v878_v15 = vcombine.low %v846_v4, %v861_v3 }
 0x111   : > { %v879_v20 = vcombine.high %v846_v4, %v861_v3  ;;  %v632_v21 = vadd.f32 %v3914_v33, %v618_v13 }
 0x112   : > { %v886_v6 = vrot.slane %v878_v15, %v3924_v52  ;;  %v1048_v60 = vcombine.low %v870_v46, %v877_v14  ;;  %v3006_v22 = vcombine.high %v870_v46, %v877_v14  ;;  %v628_v23 = vadd.f32 %v3914_v33, %v614_v1 }
 0x113   : > { %v893_v25 = vrot.slane %v879_v20, %v3924_v52  ;;  %v781_v27 = vcombine.high %v632_v21, %v3557_v16  ;;  %v788_v7 = vrot.slane %v632_v21, %v3918_v43 }
 0x114   : > { %v3273_v61 = vpop.eup %3272  ;;  %v1055_v10 = vrot.slane %v1048_v60, %v3918_v43  ;;  %v1063_v9 = vrot.slane %v3006_v22, %v3918_v43  ;;  %v766_v28 = vcombine.high %v628_v23, %v3557_v16  ;;  %v773_v30 = vrot.slane %v628_v23, %v3918_v43 }
 0x115   : > { %v3275_v31 = vpop.eup %3274  ;;  %v603_v34 = vmul.f32 %v3273_v61, %v579_v12  ;;  %v1064_v35 = vcombine.low %v886_v6, %v893_v25  ;;  %v3007_v0 = vcombine.high %v886_v6, %v893_v25  ;;  %v795_v11 = vrot.slane %v781_v27, %v3918_v43 }
 0x116   : > { %v599_v19 = vmul.f32 %v3275_v31, %v575_v17  ;;  %v1080_v32 = vcombine.low %v1055_v10, %v1063_v9  ;;  %v780_v36 = vrot.slane %v766_v28, %v3918_v43  ;;  %v796_v37 = vcombine.low %v773_v30, %v788_v7 }
 0x117   : > { %v617_v38 = vmul.f32 %v3905_v29, %v603_v34  ;;  %v1071_v39 = vrot.slane %v1064_v35, %v3918_v43  ;;  %v1079_v2 = vrot.slane %v3007_v0, %v3918_v43  ;;  %v797_v40 = vcombine.high %v773_v30, %v788_v7 }
 0x118   : > { %v3277_v41 = vpop.eup %3276  ;;  %v613_v42 = vmul.f32 %v3905_v29, %v599_v19  ;;  %v1087_v44 = vrot.slane %v1080_v32, %v3924_v52  ;;  %v804_v45 = vrot.slane %v796_v37, %v3924_v52  ;;  %v812_v48 = vcombine.low %v780_v36, %v795_v11 }
 0x119   : > { %v3279_v49 = vpop.eup %3278  ;;  %v602_v50 = vmul.f32 %v3277_v41, %v578_v18  ;;  %v1088_v51 = vcombine.low %v1071_v39, %v1079_v2  ;;  %v811_v53 = vrot.slane %v797_v40, %v3924_v52  ;;  %v813_v54 = vcombine.high %v780_v36, %v795_v11 }
 0x11a   : > { %v598_v55 = vmul.f32 %v3279_v49, %v574_v24  ;;  %v820_v56 = vrot.slane %v812_v48, %v3924_v52  ;;  %v627_v57 = vadd.f32 %v3914_v33, %v613_v42  ;;  %v631_v58 = vadd.f32 %v3914_v33, %v617_v38 }
 0x11b   : > { %v616_v59 = vmul.f32 %v3905_v29, %v602_v50  ;;  %v1095_v62 = vrot.slane %v1088_v51, %v3924_v52  ;;  %v827_v63 = vrot.slane %v813_v54, %v3924_v52  ;;  %v998_v4 = vcombine.low %v804_v45, %v811_v53 }
 0x11c   : > { %v612_v5 = vmul.f32 %v3905_v29, %v598_v55  ;;  %v3004_v3 = vcombine.high %v804_v45, %v811_v53  ;;  %v700_v47 = vcombine.high %v627_v57, %v3557_v16  ;;  %v707_v8 = vrot.slane %v627_v57, %v3918_v43 }
 0x11d   : > { %v1097_v12 = vcombine.high %v1087_v44, %v1095_v62  ;;  %v1096_v13 = vcombine.low %v1087_v44, %v1095_v62  ;;  %v1005_v1 = vrot.slane %v998_v4, %v3918_v43  ;;  %v1014_v46 = vcombine.low %v820_v56, %v827_v63 }
 0x11e   : > { %v1013_v14 = vrot.slane %v3004_v3, %v3918_v43  ;;  %v3005_v15 = vcombine.high %v820_v56, %v827_v63  ;;  %v714_v17 = vrot.slane %v700_v47, %v3918_v43  ;;  %v715_v18 = vcombine.high %v631_v58, %v3557_v16 }
 0x11f   : > { %1203 = vmatprep.subr.mxu0 %v1097_v12  ;;  %v1021_v29 = vrot.slane %v1014_v46, %v3918_v43  ;;  %v722_v20 = vrot.slane %v631_v58, %v3918_v43  ;;  %v626_v21 = vadd.f32 %v3914_v33, %v612_v5  ;;  %v630_v6 = vadd.f32 %v3914_v33, %v616_v59 }
 0x120   : > { %1204 = vmatpush1.msra.mxu0 %v1096_v13  ;;  %v1029_v60 = vrot.slane %v3005_v15, %v3918_v43  ;;  %v1030_v22 = vcombine.low %v1005_v1, %v1013_v14  ;;  %v729_v23 = vrot.slane %v715_v18, %v3918_v43 }
 0x121   : > { %v730_v24 = vcombine.low %v707_v8, %v722_v20  ;;  %v731_v25 = vcombine.high %v707_v8, %v722_v20  ;;  %v634_v27 = vcombine.high %v626_v21, %v3557_v16  ;;  %v641_v7 = vrot.slane %v626_v21, %v3918_v43  ;;  %v1098_v21 = vld [vmem:[%s4740_s3] sm:$0xff] }
 0x122   : > { %v1037_v61 = vrot.slane %v1030_v22, %v3924_v52  ;;  %v1038_v10 = vcombine.low %v1021_v29, %v1029_v60  ;;  %v746_v9 = vcombine.low %v714_v17, %v729_v23  ;;  %v747_v28 = vcombine.high %v714_v17, %v729_v23  ;;  %v1100_v60 = vld [vmem:[%s4740_s3 + $0x10] sm:$0xff]  ;;  %v1101_v22 = vld [vmem:[%s4740_s3 + $0x18] sm:$0xff]  ;;  %v1102_v23 = vld [vmem:[%s4740_s3 + $0x20] sm:$0xff] }
 0x123   : > { %v738_v30 = vrot.slane %v730_v24, %v3924_v52  ;;  %v745_v33 = vrot.slane %v731_v25, %v3924_v52  ;;  %v648_v31 = vrot.slane %v634_v27, %v3918_v43  ;;  %v649_v34 = vcombine.high %v630_v6, %v3557_v16  ;;  %v1103_v24 = vld [vmem:[%s4740_s3 + $0x28] sm:$0xff]  ;;  %v1104_v25 = vld [vmem:[%s4740_s3 + $0x30] sm:$0xff]  ;;  %v1105_v27 = vld [vmem:[%s4740_s3 + $0x38] sm:$0xff] }
 0x124   : > { %v1045_v35 = vrot.slane %v1038_v10, %v3924_v52  ;;  %v754_v0 = vrot.slane %v746_v9, %v3924_v52  ;;  %v761_v11 = vrot.slane %v747_v28, %v3924_v52  ;;  %v656_v19 = vrot.slane %v630_v6, %v3918_v43  ;;  %v1099_v6 = vld [vmem:[%s4740_s3 + $0x8] sm:$0xff] }
 0x125   : > { %v948_v32 = vcombine.low %v738_v30, %v745_v33  ;;  %v3002_v36 = vcombine.high %v738_v30, %v745_v33  ;;  %v663_v37 = vrot.slane %v649_v34, %v3918_v43 }
 0x126   : > { %v1047_v38 = vcombine.high %v1037_v61, %v1045_v35  ;;  %v1046_v39 = vcombine.low %v1037_v61, %v1045_v35  ;;  %v964_v2 = vcombine.low %v754_v0, %v761_v11  ;;  %v3003_v40 = vcombine.high %v754_v0, %v761_v11 }
 0x127   : > { %v955_v41 = vrot.slane %v948_v32, %v3918_v43  ;;  %v963_v42 = vrot.slane %v3002_v36, %v3918_v43  ;;  %v664_v44 = vcombine.low %v641_v7, %v656_v19  ;;  %v665_v45 = vcombine.high %v641_v7, %v656_v19  ;;  %v1147_v7 = vpop.permute.xlu1 %1146 }
 0x128   : > { %1205 = vmatprep.subr.mxu0 %v1047_v38  ;;  %v971_v48 = vrot.slane %v964_v2, %v3918_v43  ;;  %v979_v49 = vrot.slane %v3003_v40, %v3918_v43  ;;  %v680_v50 = vcombine.low %v648_v31, %v663_v37  ;;  %v681_v51 = vcombine.high %v648_v31, %v663_v37 }
 0x129   : > { %1206 = vmatpush1.msra.mxu0 %v1046_v39  ;;  %v980_v53 = vcombine.low %v955_v41, %v963_v42  ;;  %v672_v54 = vrot.slane %v664_v44, %v3924_v52  ;;  %v679_v55 = vrot.slane %v665_v45, %v3924_v52 }
 0x12a   : > { %v988_v56 = vcombine.low %v971_v48, %v979_v49  ;;  %v688_v57 = vrot.slane %v680_v50, %v3924_v52  ;;  %v695_v58 = vrot.slane %v681_v51, %v3924_v52  ;;  %v1152_v48 = vpop.permute.xlu0 %1151 }
 0x12b   : > { %v898_v59 = vcombine.low %v672_v54, %v679_v55  ;;  %v3000_v62 = vcombine.high %v672_v54, %v679_v55  ;;  %v987_v63 = vrot.slane %v980_v53, %v3924_v52  ;;  %v1142_v28 = vpop.permute.xlu1 %1141 }
 0x12c   : > { %v995_v4 = vrot.slane %v988_v56, %v3924_v52  ;;  %v914_v5 = vcombine.low %v688_v57, %v695_v58  ;;  %v3001_v3 = vcombine.high %v688_v57, %v695_v58 }
 0x12d   : > { %v905_v47 = vrot.slane %v898_v59, %v3918_v43  ;;  %v913_v8 = vrot.slane %v3000_v62, %v3918_v43 }
 0x12e   : > { %v997_v12 = vcombine.high %v987_v63, %v995_v4  ;;  %v996_v13 = vcombine.low %v987_v63, %v995_v4  ;;  %v921_v1 = vrot.slane %v914_v5, %v3918_v43  ;;  %v929_v46 = vrot.slane %v3001_v3, %v3918_v43 }
 0x12f   : > { %v930_v14 = vcombine.low %v905_v47, %v913_v8  ;;  %v1137_v34 = vpop.permute.xlu1 %1136 }
 0x130   : > { %1207 = vmatprep.subr.mxu0 %v997_v12  ;;  %v938_v15 = vcombine.low %v921_v1, %v929_v46 }
 0x131   : > { %1208 = vmatpush1.msra.mxu0 %v996_v13  ;;  %v937_v17 = vrot.slane %v930_v14, %v3924_v52 }
 0x132   : > { %v945_v18 = vrot.slane %v938_v15, %v3924_v52 }
 0x133   : > { %v1132_v19 = vpop.permute.xlu1 %1131 }
 0x134   : > { %v947_v29 = vcombine.high %v937_v17, %v945_v18  ;;  %v946_v20 = vcombine.low %v937_v17, %v945_v18 }
 0x136   : > { %1209 = vmatprep.subr.mxu0 %v947_v29 }
 0x137   : > { %1210 = vmatpush1.msra.mxu0 %v946_v20  ;;  %v1127_v38 = vpop.permute.xlu1 %1126 }
 0x138   : > { %3008 = vmatmul.mubr.msk.f32.vlgmr.msra.gmra.mxu0 %vm1154_vm0, %v1098_v21 }
 0x139   : > { %1249 = vmatprep.mubr.f32.mxu0 %v3557_v16 }
 0x13b   : > { %v1122_v50 = vpop.permute.xlu1 %1121 }
 0x13c   : > { %3009 = vmatmul.mubr.msk.f32.gmra.mxu0 %vm1154_vm0, %v1099_v6 }
 0x13d   : > { %1255 = vmatprep.mubr.f32.mxu0 %v3557_v16 }
 0x13f   : > { %v1117_v13 = vpop.permute.xlu1 %1116 }
 0x140   : > { %3010 = vmatmul.mubr.msk.f32.gmra.mxu0 %vm1154_vm0, %v1100_v60 }
 0x141   : > { %1261 = vmatprep.mubr.f32.mxu0 %v3557_v16 }
 0x144   : > { %3011 = vmatmul.mubr.msk.f32.gmra.mxu0 %vm1154_vm0, %v1101_v22 }
 0x145   : > { %1267 = vmatprep.mubr.f32.mxu0 %v3557_v16 }
 0x148   : > { %3012 = vmatmul.mubr.msk.f32.gmra.mxu0 %vm1154_vm0, %v1102_v23 }
 0x149   : > { %1273 = vmatprep.mubr.f32.mxu0 %v3557_v16 }
 0x14c   : > { %3013 = vmatmul.mubr.msk.f32.gmra.mxu0 %vm1154_vm0, %v1103_v24 }
 0x14d   : > { %1279 = vmatprep.mubr.f32.mxu0 %v3557_v16 }
 0x150   : > { %3014 = vmatmul.mubr.msk.f32.gmra.mxu0 %vm1154_vm0, %v1104_v25 }
 0x151   : > { %1285 = vmatprep.mubr.f32.mxu0 %v3557_v16 }
 0x154   : > { %3015 = vmatmul.mubr.msk.f32.gmra.mxu0 %vm1154_vm0, %v1105_v27 }
 0x155   : > { %2258 = vmatprep.mubr.f32.mxu0 %v3557_v16 }
 0x1f8   : > { %v1245_v61 = vpop.f32.mrf.mxu0 }
 0x1f9   : > { %v4089_v29 = vadd.f32 %v1245_v61, %v1117_v13 }
 0x1fa   : > { %v1247_v10 = vpop.f32.mrf.mxu0 }
 0x1fb   : > { %v4086_v17 = vadd.f32 %v1247_v10, %v1117_v13  ;;  %v1308_v22 = vmul.f32 0.70710677, %v4089_v29 }
 0x1fc   : > { %v1251_v9 = vpop.f32.mrf.mxu0 }
 0x1fd   : > { %v4083_v14 = vadd.f32 %v1251_v9, %v1122_v50  ;;  %v1309_v60 = vmul.f32 0.70710677, %v4086_v17 }
 0x1fe   : > { %v1253_v30 = vpop.f32.mrf.mxu0 }
 0x1ff   : > { %v4080_v1 = vadd.f32 %v1253_v30, %v1122_v50  ;;  %v1310_v6 = vmul.f32 0.70710677, %v4083_v14 }
 0x200   : > { %v1257_v33 = vpop.f32.mrf.mxu0 }
 0x201   : > { %v4077_v8 = vadd.f32 %v1257_v33, %v1127_v38  ;;  %v1311_v21 = vmul.f32 0.70710677, %v4080_v1 }
 0x202   : > { %v1259_v31 = vpop.f32.mrf.mxu0 }
 0x203   : > { %v4074_v5 = vadd.f32 %v1259_v31, %v1127_v38  ;;  %v1312_v20 = vmul.f32 0.70710677, %v4077_v8 }
 0x204   : > { %v1263_v35 = vpop.f32.mrf.mxu0 }
 0x205   : > { %v4071_v63 = vadd.f32 %v1263_v35, %v1132_v19  ;;  %v1313_v18 = vmul.f32 0.70710677, %v4074_v5 }
 0x206   : > { %v1265_v0 = vpop.f32.mrf.mxu0 }
 0x207   : > { %v4069_v58 = vadd.f32 %v1265_v0, %v1132_v19  ;;  %v1314_v15 = vmul.f32 0.70710677, %v4071_v63 }
 0x208   : > { %v1269_v11 = vpop.f32.mrf.mxu0 }
 0x209   : > { %v4066_v55 = vadd.f32 %v1269_v11, %v1137_v34  ;;  %v1315_v46 = vmul.f32 0.70710677, %v4069_v58 }
 0x20a   : > { %v1271_v32 = vpop.f32.mrf.mxu0 }
 0x20b   : > { %v4063_v51 = vadd.f32 %v1271_v32, %v1137_v34  ;;  %v1316_v12 = vmul.f32 0.70710677, %v4066_v55 }
 0x20c   : > { %v1275_v36 = vpop.f32.mrf.mxu0 }
 0x20d   : > { %v4061_v45 = vadd.f32 %v1275_v36, %v1142_v28  ;;  %v1317_v3 = vmul.f32 0.70710677, %v4063_v51 }
 0x20e   : > { %v1277_v37 = vpop.f32.mrf.mxu0 }
 0x20f   : > { %v4054_v39 = vadd.f32 %v1277_v37, %v1142_v28  ;;  %v1318_v4 = vmul.f32 0.70710677, %v4061_v45  ;;  %v1302_v50 = vmul.f32 0.5, %v4061_v45 }
 0x210   : > { %v1281_v2 = vpop.f32.mrf.mxu0 }
 0x211   : > { %v4056_v40 = vadd.f32 %v1281_v2, %v1147_v7  ;;  %v1319_v42 = vmul.f32 0.70710677, %v4054_v39 }
 0x212   : > { %v1283_v41 = vpop.f32.mrf.mxu0 }
 0x213   : > { %v4059_v44 = vadd.f32 %v1283_v41, %v1147_v7  ;;  %v1320_v56 = vmul.f32 0.70710677, %v4056_v40  ;;  %3280 = verf.f32 %v1319_v42  ;;  %v1304_v36 = vmul.f32 0.5, %v4056_v40 }
 0x214   : > { %v1287_v49 = vpop.f32.mrf.mxu0  ;;  %v1303_v41 = vmul.f32 0.5, %v4054_v39 }
 0x215   : > { %v1321_v53 = vmul.f32 0.70710677, %v4059_v44  ;;  %v1288_v54 = vadd.f32 %v1287_v49, %v1152_v48  ;;  %v1305_v0 = vmul.f32 0.5, %v4059_v44 }
 0x216   : > { %v1289_v57 = vpop.f32.mrf.mxu0 }
 0x217   : > { %v1322_v59 = vmul.f32 0.70710677, %v1288_v54  ;;  %v1290_v62 = vadd.f32 %v1289_v57, %v1152_v48  ;;  %3282 = verf.f32 %v1321_v53  ;;  %v1306_v31 = vmul.f32 0.5, %v1288_v54 }
 0x219   : > { %3284 = verf.f32 %v1322_v59  ;;  %v1323_v47 = vmul.f32 0.70710677, %v1290_v62  ;;  %v1307_v9 = vmul.f32 0.5, %v1290_v62  ;;  %v1300_v62 = vmul.f32 0.5, %v4066_v55 }
 0x21a   : > { %3286 = verf.f32 %v1320_v56  ;;  %v1301_v56 = vmul.f32 0.5, %v4063_v51 }
 0x21b   : > { %3288 = verf.f32 %v1323_v47  ;;  %v1299_v47 = vmul.f32 0.5, %v4069_v58 }
 0x21c   : > { %3290 = verf.f32 %v1318_v4 }
 0x21d   : > { %3292 = verf.f32 %v1317_v3 }
 0x21e   : > { %3294 = verf.f32 %v1316_v12 }
 0x21f   : > { %3296 = verf.f32 %v1315_v46  ;;  %v1298_v46 = vmul.f32 0.5, %v4071_v63  ;;  %v1294_v63 = vmul.f32 0.5, %v4083_v14  ;;  %v1373_v14 = vld [vmem:[%s4742_s5 + $0x8] sm:$0xff] }
 0x220   : > { %3298 = verf.f32 %v1314_v15  ;;  %v3281_v23 = vpop.eup %3280 }
 0x221   : > { %3300 = verf.f32 %v1313_v18  ;;  %v1351_v19 = vadd.f32 1.0, %v3281_v23 }
 0x222   : > { %3302 = verf.f32 %v1312_v20  ;;  %v1297_v20 = vmul.f32 0.5, %v4074_v5  ;;  %v1293_v5 = vmul.f32 0.5, %v4086_v17  ;;  %v1374_v17 = vld [vmem:[%s4742_s5 + $0x10] sm:$0xff] }
 0x223   : > { %3304 = verf.f32 %v1311_v21  ;;  %v1367_v57 = vmul.f32 %v1351_v19, %v1303_v41  ;;  %v1383_v19 = vpop.permute.xlu1 %1382  ;;  %v1388_v41 = vpop.permute.xlu0 %1387 }
 0x224   : > { %3306 = verf.f32 %v1310_v6  ;;  %v3283_v24 = vpop.eup %3282  ;;  %v1296_v6 = vmul.f32 0.5, %v4077_v8 }
 0x225   : > { %3308 = verf.f32 %v1309_v60  ;;  %v1353_v30 = vadd.f32 1.0, %v3283_v24 }
 0x226   : > { %v3285_v25 = vpop.eup %3284  ;;  %3310 = verf.f32 %v1308_v22  ;;  %v1295_v22 = vmul.f32 0.5, %v4080_v1 }
 0x227   : > { %v3287_v27 = vpop.eup %3286  ;;  %v1354_v61 = vadd.f32 1.0, %v3285_v25  ;;  %v1369_v42 = vmul.f32 %v1353_v30, %v1305_v0  ;;  %v2171_v30 = vld [vmem:[#allocation5 + $0x1f8] sm:$0xff]  ;;  %v2164_v0 = vld [vmem:[#allocation5 + $0x1c0] sm:$0xff] }
 0x228   : > { %v3289_v7 = vpop.eup %3288  ;;  %v1352_v34 = vadd.f32 1.0, %v3287_v27 }
 0x229   : > { %v3291_v10 = vpop.eup %3290  ;;  %v1355_v28 = vadd.f32 1.0, %v3289_v7  ;;  %v1370_v37 = vmul.f32 %v1354_v61, %v1306_v31  ;;  %v1292_v61 = vmul.f32 0.5, %v4089_v29  ;;  %v1375_v29 = vld [vmem:[%s4742_s5 + $0x18] sm:$0xff]  ;;  %v2170_v31 = vld [vmem:[#allocation5 + $0x1f0] sm:$0xff] }
 0x22a   : > { %v3293_v33 = vpop.eup %3292  ;;  %v1350_v38 = vadd.f32 1.0, %v3291_v10  ;;  %v1368_v53 = vmul.f32 %v1352_v34, %v1304_v36  ;;  %v2165_v34 = vld [vmem:[#allocation5 + $0x1c8] sm:$0xff] }
 0x22b   : > { %v3295_v35 = vpop.eup %3294  ;;  %v1371_v11 = vmul.f32 %v1355_v28, %v1307_v9  ;;  %v1349_v48 = vadd.f32 1.0, %v3293_v33  ;;  %v1372_v9 = vld [vmem:[%s4742_s5] sm:$0xff]  ;;  %v2169_v28 = vld [vmem:[#allocation5 + $0x1e8] sm:$0xff] }
 0x22c   : > { %v3297_v32 = vpop.eup %3296  ;;  %v1348_v54 = vadd.f32 1.0, %v3295_v35  ;;  %v1366_v39 = vmul.f32 %v1350_v38, %v1302_v50  ;;  %v2168_v33 = vld [vmem:[#allocation5 + $0x1e0] sm:$0xff]  ;;  %2194 = vmatprep.subr.mxu0 %v2169_v28  ;;  %v2167_v35 = vld [vmem:[#allocation5 + $0x1d8] sm:$0xff] }
 0x22d   : > { %v3299_v2 = vpop.eup %3298  ;;  %1429 = vmatprep.subr.mxu1 %v1371_v11  ;;  %v1347_v40 = vadd.f32 1.0, %v3297_v32  ;;  %v1365_v45 = vmul.f32 %v1349_v48, %v1301_v56  ;;  %2195 = vmatpush1.msra.mxu0 %v2168_v33  ;;  %v2166_v11 = vld [vmem:[#allocation5 + $0x1d0] sm:$0xff] }
 0x22e   : > { %v3301_v49 = vpop.eup %3300  ;;  %1430 = vmatpush1.msra.mxu1 %v1370_v37  ;;  %v1346_v4 = vadd.f32 1.0, %v3299_v2  ;;  %v1364_v51 = vmul.f32 %v1348_v54, %v1300_v62  ;;  %2196 = vmatprep.subr.mxu0 %v2165_v34 }
 0x22f   : > { %v3303_v44 = vpop.eup %3302  ;;  %1431 = vmatprep.subr.mxu1 %v1369_v42  ;;  %v1345_v12 = vadd.f32 1.0, %v3301_v49  ;;  %v1363_v55 = vmul.f32 %v1347_v40, %v1299_v47  ;;  %2197 = vmatpush1.msra.mxu0 %v2164_v0 }
 0x230   : > { %v3305_v59 = vpop.eup %3304  ;;  %1432 = vmatpush1.msra.mxu1 %v1368_v53  ;;  %v1344_v15 = vadd.f32 1.0, %v3303_v44  ;;  %v1362_v60 = vmul.f32 %v1346_v4, %v1298_v46 }
 0x231   : > { %v3307_v3 = vpop.eup %3306  ;;  %1433 = vmatprep.subr.mxu1 %v1367_v57  ;;  %v1343_v21 = vadd.f32 1.0, %v3305_v59  ;;  %v1361_v23 = vmul.f32 %v1345_v12, %v1297_v20 }
 0x232   : > { %v3309_v13 = vpop.eup %3308  ;;  %1434 = vmatpush1.msra.mxu1 %v1366_v39  ;;  %v1342_v58 = vadd.f32 1.0, %v3307_v3  ;;  %v1360_v25 = vmul.f32 %v1344_v15, %v1296_v6  ;;  %v1393_v3 = vpop.permute.xlu1 %1392 }
 0x233   : > { %v3311_v18 = vpop.eup %3310  ;;  %1435 = vmatprep.subr.mxu1 %v1365_v45  ;;  %v1341_v24 = vadd.f32 1.0, %v3309_v13  ;;  %v1359_v7 = vmul.f32 %v1343_v21, %v1295_v22 }
 0x234   : > { %1436 = vmatpush1.msra.mxu1 %v1364_v51  ;;  %v1340_v27 = vadd.f32 1.0, %v3311_v18  ;;  %v1358_v8 = vmul.f32 %v1342_v58, %v1294_v63 }
 0x235   : > { %1437 = vmatprep.subr.mxu1 %v1363_v55  ;;  %v1357_v10 = vmul.f32 %v1341_v24, %v1293_v5 }
 0x236   : > { %1438 = vmatpush1.msra.mxu1 %v1362_v60  ;;  %v1356_v1 = vmul.f32 %v1340_v27, %v1292_v61 }
 0x237   : > { %1439 = vmatprep.subr.mxu1 %v1361_v23 }
 0x238   : > { %1440 = vmatpush1.msra.mxu1 %v1360_v25 }
 0x239   : > { %1441 = vmatprep.subr.mxu1 %v1359_v7 }
 0x23a   : > { %1442 = vmatpush1.msra.mxu1 %v1358_v8 }
 0x23b   : > { %1443 = vmatprep.subr.mxu1 %v1357_v10 }
 0x23c   : > { %1444 = vmatpush1.msra.mxu1 %v1356_v1 }
 0x23d   : > { %3016 = vmatmul.mubr.msk.f32.vlgmr.msra.gmra.mxu1 %vm1400_vm1, %v1372_v9  ;;  %2307 = vmatprep.subr.mxu1 %v2171_v30  ;;  %v1398_v30 = vpop.permute.xlu0 %1397 }
 0x23e   : > { %1483 = vmatprep.mubr.f32.mxu1 %v3557_v16  ;;  %2308 = vmatpush1.msra.mxu1 %v2170_v31 }
 0x23f   : > { %2309 = vmatprep.subr.mxu1 %v2167_v35 }
 0x240   : > { %2310 = vmatpush1.msra.mxu1 %v2166_v11 }
 0x241   : > { %3017 = vmatmul.mubr.msk.f32.gmra.mxu1 %vm1400_vm1, %v1373_v14 }
 0x242   : > { %1489 = vmatprep.mubr.f32.mxu1 %v3557_v16 }
 0x245   : > { %3018 = vmatmul.mubr.msk.f32.gmra.mxu1 %vm1400_vm1, %v1374_v17 }
 0x246   : > { %1495 = vmatprep.mubr.f32.mxu1 %v3557_v16 }
 0x249   : > { %3019 = vmatmul.mubr.msk.f32.gmra.mxu1 %vm1400_vm1, %v1375_v29 }
 0x24a   : > { %2371 = vmatprep.mubr.f32.mxu1 %v3557_v16 }
 0x2fd   : > { %v1479_v32 = vpop.f32.mrf.mxu1 }
 0x2fe   : > { %v1480_v36 = vadd.f32 %v1479_v32, %v1383_v19 }
 0x2ff   : > { %v1481_v37 = vpop.f32.mrf.mxu1 }
 0x300   : > { %v1502_v38 = vcombine.high %v1480_v36, %v3557_v16  ;;  %v1482_v2 = vadd.f32 %v1481_v37, %v1383_v19  ;;  %v1509_v48 = vrot.slane %v1480_v36, %v3918_v43 }
 0x301   : > { %v1485_v42 = vpop.f32.mrf.mxu1 }
 0x302   : > { %v1517_v49 = vcombine.high %v1482_v2, %v3557_v16  ;;  %v1524_v50 = vrot.slane %v1482_v2, %v3918_v43  ;;  %v1486_v53 = vadd.f32 %v1485_v42, %v1388_v41  ;;  %v1516_v54 = vrot.slane %v1502_v38, %v3918_v43 }
 0x303   : > { %v1487_v44 = vpop.f32.mrf.mxu1 }
 0x304   : > { %v1531_v56 = vrot.slane %v1517_v49, %v3918_v43  ;;  %v1532_v57 = vcombine.low %v1509_v48, %v1524_v50  ;;  %v1533_v40 = vcombine.high %v1509_v48, %v1524_v50  ;;  %v1568_v59 = vcombine.high %v1486_v53, %v3557_v16 }
 0x305   : > { %v1575_v62 = vrot.slane %v1486_v53, %v3918_v43  ;;  %v1488_v39 = vadd.f32 %v1487_v44, %v1388_v41  ;;  %v1491_v4 = vpop.f32.mrf.mxu1 }
 0x306   : > { %v1540_v47 = vrot.slane %v1532_v57, %v3924_v52  ;;  %v1547_v45 = vrot.slane %v1533_v40, %v3924_v52  ;;  %v1548_v12 = vcombine.low %v1516_v54, %v1531_v56  ;;  %v1549_v13 = vcombine.high %v1516_v54, %v1531_v56 }
 0x307   : > { %v1582_v46 = vrot.slane %v1568_v59, %v3918_v43  ;;  %v1583_v51 = vcombine.high %v1488_v39, %v3557_v16  ;;  %v1590_v15 = vrot.slane %v1488_v39, %v3918_v43  ;;  %v1492_v18 = vadd.f32 %v1491_v4, %v1393_v3  ;;  %v1493_v20 = vpop.f32.mrf.mxu1 }
 0x308   : > { %v1556_v55 = vrot.slane %v1548_v12, %v3924_v52  ;;  %v1563_v21 = vrot.slane %v1549_v13, %v3924_v52  ;;  %v1766_v6 = vcombine.low %v1540_v47, %v1547_v45  ;;  %v3020_v60 = vcombine.high %v1540_v47, %v1547_v45 }
 0x309   : > { %v1597_v58 = vrot.slane %v1583_v51, %v3918_v43  ;;  %v1598_v22 = vcombine.low %v1575_v62, %v1590_v15  ;;  %v1599_v23 = vcombine.high %v1575_v62, %v1590_v15  ;;  %v1634_v24 = vcombine.high %v1492_v18, %v3557_v16  ;;  %v1497_v63 = vpop.f32.mrf.mxu1 }
 0x30a   : > { %v1773_v25 = vrot.slane %v1766_v6, %v3918_v43  ;;  %v1781_v27 = vrot.slane %v3020_v60, %v3918_v43  ;;  %v1782_v5 = vcombine.low %v1556_v55, %v1563_v21  ;;  %v3021_v7 = vcombine.high %v1556_v55, %v1563_v21 }
 0x30b   : > { %v1606_v61 = vrot.slane %v1598_v22, %v3924_v52  ;;  %v1613_v8 = vrot.slane %v1599_v23, %v3924_v52  ;;  %v1614_v10 = vcombine.low %v1582_v46, %v1597_v58  ;;  %v1615_v1 = vcombine.high %v1582_v46, %v1597_v58  ;;  %v1499_v9 = vpop.f32.mrf.mxu1 }
 0x30c   : > { %v1789_v14 = vrot.slane %v1782_v5, %v3918_v43  ;;  %v1797_v17 = vrot.slane %v3021_v7, %v3918_v43  ;;  %v1798_v29 = vcombine.low %v1773_v25, %v1781_v27  ;;  %v1641_v28 = vrot.slane %v1492_v18, %v3918_v43 }
 0x30d   : > { %v1622_v33 = vrot.slane %v1614_v10, %v3924_v52  ;;  %v1629_v31 = vrot.slane %v1615_v1, %v3924_v52  ;;  %v1816_v34 = vcombine.low %v1606_v61, %v1613_v8  ;;  %v3022_v35 = vcombine.high %v1606_v61, %v1613_v8 }
 0x30e   : > { %v1648_v0 = vrot.slane %v1634_v24, %v3918_v43  ;;  %v1494_v11 = vadd.f32 %v1493_v20, %v1393_v3  ;;  %v1498_v19 = vadd.f32 %v1497_v63, %v1398_v30  ;;  %v1500_v32 = vadd.f32 %v1499_v9, %v1398_v30 }
 0x30f   : > { %v1823_v36 = vrot.slane %v1816_v34, %v3918_v43  ;;  %v1831_v37 = vrot.slane %v3022_v35, %v3918_v43  ;;  %v1832_v38 = vcombine.low %v1622_v33, %v1629_v31  ;;  %v3023_v2 = vcombine.high %v1622_v33, %v1629_v31 }
 0x310   : > { %v1649_v41 = vcombine.high %v1494_v11, %v3557_v16  ;;  %v1656_v42 = vrot.slane %v1494_v11, %v3918_v43  ;;  %v1700_v48 = vcombine.high %v1498_v19, %v3557_v16  ;;  %v1707_v49 = vrot.slane %v1498_v19, %v3918_v43  ;;  %v3392_v11 = vld [vmem:[%s3772_s11] sm:$0xff] }
 0x311   : > { %v1839_v50 = vrot.slane %v1832_v38, %v3918_v43  ;;  %v1847_v53 = vrot.slane %v3023_v2, %v3918_v43  ;;  %v1848_v54 = vcombine.low %v1823_v36, %v1831_v37  ;;  %v1715_v44 = vcombine.high %v1500_v32, %v3557_v16 }
 0x312   : > { %v1663_v56 = vrot.slane %v1649_v41, %v3918_v43  ;;  %v1664_v57 = vcombine.low %v1641_v28, %v1656_v42  ;;  %v1665_v40 = vcombine.high %v1641_v28, %v1656_v42  ;;  %v1714_v59 = vrot.slane %v1700_v48, %v3918_v43 }
 0x313   : > { %v1722_v62 = vrot.slane %v1500_v32, %v3918_v43  ;;  %v1729_v39 = vrot.slane %v1715_v44, %v3918_v43  ;;  %v4167_v4 = vrot.slane %v1798_v29, %v3924_v52  ;;  %v1806_v3 = vcombine.low %v1789_v14, %v1797_v17 }
 0x314   : > { %v1672_v47 = vrot.slane %v1664_v57, %v3924_v52  ;;  %v1679_v45 = vrot.slane %v1665_v40, %v3924_v52  ;;  %v1680_v12 = vcombine.low %v1648_v0, %v1663_v56  ;;  %v1681_v13 = vcombine.high %v1648_v0, %v1663_v56  ;;  %v3395_v57 = vld [vmem:[%s3772_s11 + $0x18] sm:$0xff] }
 0x315   : > { %v1730_v46 = vcombine.low %v1707_v49, %v1722_v62  ;;  %v1731_v51 = vcombine.high %v1707_v49, %v1722_v62  ;;  %v1746_v15 = vcombine.low %v1714_v59, %v1729_v39  ;;  %v1747_v18 = vcombine.high %v1714_v59, %v1729_v39  ;;  %v3393_v49 = vld [vmem:[%s3772_s11 + $0x8] sm:$0xff] }
 0x316   : > { %v1688_v20 = vrot.slane %v1680_v12, %v3924_v52  ;;  %v1695_v55 = vrot.slane %v1681_v13, %v3924_v52  ;;  %v1866_v21 = vcombine.low %v1672_v47, %v1679_v45  ;;  %v3024_v6 = vcombine.high %v1672_v47, %v1679_v45  ;;  %v2161_v39 = vld [vmem:[#allocation5 + $0x1a8] sm:$0xff]  ;;  %v2160_v47 = vld [vmem:[#allocation5 + $0x1a0] sm:$0xff]  ;;  %v2162_v45 = vld [vmem:[#allocation5 + $0x1b0] sm:$0xff] }
 0x317   : > { %v1738_v60 = vrot.slane %v1730_v46, %v3924_v52  ;;  %v1745_v58 = vrot.slane %v1731_v51, %v3924_v52  ;;  %v1754_v22 = vrot.slane %v1746_v15, %v3924_v52  ;;  %v1761_v23 = vrot.slane %v1747_v18, %v3924_v52  ;;  %2198 = vmatprep.subr.mxu0 %v2161_v39  ;;  %v3396_v12 = vld [vmem:[%s3772_s11 + $0x20] sm:$0xff]  ;;  %v2159_v51 = vld [vmem:[#allocation5 + $0x198] sm:$0xff]  ;;  %v2158_v18 = vld [vmem:[#allocation5 + $0x190] sm:$0xff] }
 0x318   : > { %v1873_v24 = vrot.slane %v1866_v21, %v3918_v43  ;;  %v1881_v63 = vrot.slane %v3024_v6, %v3918_v43  ;;  %v1882_v25 = vcombine.low %v1688_v20, %v1695_v55  ;;  %v3025_v27 = vcombine.high %v1688_v20, %v1695_v55  ;;  %2199 = vmatpush1.msra.mxu0 %v2160_v47  ;;  %v2156_v15 = vld [vmem:[#allocation5 + $0x180] sm:$0xff]  ;;  %v2153_v20 = vld [vmem:[#allocation5 + $0x168] sm:$0xff]  ;;  %v2155_v55 = vld [vmem:[#allocation5 + $0x178] sm:$0xff] }
 0x319   : > { %v1916_v5 = vcombine.low %v1738_v60, %v1745_v58  ;;  %v3026_v7 = vcombine.high %v1738_v60, %v1745_v58  ;;  %v1932_v61 = vcombine.low %v1754_v22, %v1761_v23  ;;  %v3027_v8 = vcombine.high %v1754_v22, %v1761_v23  ;;  %v2152_v21 = vld [vmem:[#allocation5 + $0x160] sm:$0xff]  ;;  %v2154_v6 = vld [vmem:[#allocation5 + $0x170] sm:$0xff]  ;;  %v3397_v58 = vld [vmem:[%s3772_s11 + $0x28] sm:$0xff] }
 0x31a   : > { %v1889_v10 = vrot.slane %v1882_v25, %v3918_v43  ;;  %v1897_v1 = vrot.slane %v3025_v27, %v3918_v43  ;;  %v1898_v9 = vcombine.low %v1873_v24, %v1881_v63  ;;  %v1813_v14 = vrot.slane %v1806_v3, %v3924_v52  ;;  %v2163_v3 = vld [vmem:[#allocation5 + $0x1b8] sm:$0xff]  ;;  %v2149_v24 = vld [vmem:[#allocation5 + $0x148] sm:$0xff]  ;;  %v2148_v25 = vld [vmem:[#allocation5 + $0x140] sm:$0xff] }
 0x31b   : > { %v1923_v17 = vrot.slane %v1916_v5, %v3918_v43  ;;  %v1931_v29 = vrot.slane %v3026_v7, %v3918_v43  ;;  %v1939_v28 = vrot.slane %v1932_v61, %v3918_v43  ;;  %v1947_v30 = vrot.slane %v3027_v8, %v3918_v43  ;;  %2311 = vmatprep.subr.mxu1 %v2163_v3  ;;  %v2151_v63 = vld [vmem:[#allocation5 + $0x158] sm:$0xff]  ;;  %v2150_v27 = vld [vmem:[#allocation5 + $0x150] sm:$0xff]  ;;  %v2145_v5 = vld [vmem:[#allocation5 + $0x128] sm:$0xff] }
 0x31c   : > { %v1814_v33 = vcombine.low %v4167_v4, %v1813_v14  ;;  %v1856_v31 = vcombine.low %v1839_v50, %v1847_v53  ;;  %v1906_v35 = vcombine.low %v1889_v10, %v1897_v1  ;;  %v1855_v32 = vrot.slane %v1848_v54, %v3924_v52  ;;  %v3394_v54 = vld [vmem:[%s3772_s11 + $0x10] sm:$0xff]  ;;  %2312 = vmatpush1.msra.mxu1 %v2162_v45  ;;  %v2147_v7 = vld [vmem:[#allocation5 + $0x138] sm:$0xff]  ;;  %v2117_v3 = vld [vmem:[#allocation5 + $0x48] sm:$0xff] }
 0x31d   : > { %v1948_v34 = vcombine.low %v1923_v17, %v1931_v29  ;;  %v1956_v0 = vcombine.low %v1939_v28, %v1947_v30  ;;  %v4193_v37 = vrot.slane %v1898_v9, %v3924_v52  ;;  %v1815_v59 = vcombine.high %v4167_v4, %v1813_v14  ;;  %v2157_v4 = vld [vmem:[#allocation5 + $0x188] sm:$0xff]  ;;  %2313 = vmatprep.subr.mxu1 %v2159_v51  ;;  %v3398_v8 = vld [vmem:[%s3772_s11 + $0x30] sm:$0xff]  ;;  %v2144_v9 = vld [vmem:[#allocation5 + $0x120] sm:$0xff] }
 0x31e   : > { %v4188_v19 = vadd.f32 %v3392_v11, %v1814_v33  ;;  %v1863_v36 = vrot.slane %v1856_v31, %v3924_v52  ;;  %v4196_v43 = vrot.slane %v1906_v35, %v3924_v52  ;;  %2200 = vmatprep.subr.mxu0 %v2157_v4  ;;  %2314 = vmatpush1.msra.mxu1 %v2158_v18  ;;  %v2146_v14 = vld [vmem:[#allocation5 + $0x130] sm:$0xff]  ;;  %v2141_v17 = vld [vmem:[#allocation5 + $0x108] sm:$0xff]  ;;  %v2143_v29 = vld [vmem:[#allocation5 + $0x118] sm:$0xff] }
 0x31f   : > { %v4199_v38 = vrot.slane %v1956_v0, %v3924_v52  ;;  %v4205_v42 = vrot.slane %v1948_v34, %v3924_v52  ;;  %v4230_v13 = vadd.f32 %v3396_v12, %v1815_v59  ;;  %2201 = vmatpush1.msra.mxu0 %v2156_v15  ;;  %2315 = vmatprep.subr.mxu1 %v2155_v55  ;;  %v2140_v28 = vld [vmem:[#allocation5 + $0x100] sm:$0xff]  ;;  %v2142_v30 = vld [vmem:[#allocation5 + $0x110] sm:$0xff]  ;;  %v3399_v31 = vld [vmem:[%s3772_s11 + $0x38] sm:$0xff]  ;;  %s2878_s11 = scalar_lea.sflag [#allocation4], %s3766_s30 }
 0x320   : > { %4810 = vst [vmem:[#allocation17_spill] sm:$0xff] %v4188_v19  ;;  %1976 = vadd.xlane.f32.xlu1 %v4188_v19  ;;  %v2000_v2 = vmul.f32 %v4188_v19, %v4188_v19  ;;  %v1864_v41 = vcombine.low %v1855_v32, %v1863_v36  ;;  %v1914_v48 = vcombine.low %v4193_v37, %v4196_v43  ;;  %v2137_v35 = vld [vmem:[#allocation5 + $0xe8] sm:$0xff]  ;;  %v2139_v0 = vld [vmem:[#allocation5 + $0xf8] sm:$0xff]  ;;  %v2136_v11 = vld [vmem:[#allocation5 + $0xe0] sm:$0xff] }
 0x321   : > { %v1964_v53 = vcombine.low %v4205_v42, %v4199_v38  ;;  %4814 = vst [vmem:[#allocation21_spill] sm:$0xff] %v4230_v13  ;;  %v1865_v46 = vcombine.high %v1855_v32, %v1863_v36  ;;  %v2004_v60 = vmul.f32 %v4230_v13, %v4230_v13  ;;  %v1915_v23 = vcombine.high %v4193_v37, %v4196_v43  ;;  %v2138_v32 = vld [vmem:[#allocation5 + $0xf0] sm:$0xff]  ;;  %v2133_v36 = vld [vmem:[#allocation5 + $0xc8] sm:$0xff]  ;;  %v2135_v37 = vld [vmem:[#allocation5 + $0xd8] sm:$0xff] }
 0x322   : > { %2008 = vadd.xlane.f32.xlu0 %v2000_v2  ;;  %v4210_v50 = vadd.f32 %v3393_v49, %v1864_v41  ;;  %v4215_v44 = vadd.f32 %v3394_v54, %v1914_v48  ;;  %2202 = vmatprep.subr.mxu0 %v2153_v20  ;;  %v1965_v1 = vcombine.high %v4205_v42, %v4199_v38  ;;  %v2132_v38 = vld [vmem:[#allocation5 + $0xc0] sm:$0xff]  ;;  %v2134_v2 = vld [vmem:[#allocation5 + $0xd0] sm:$0xff]  ;;  %v2129_v41 = vld [vmem:[#allocation5 + $0xa8] sm:$0xff] }
 0x323   : > { %v4223_v40 = vadd.f32 %v3395_v57, %v1964_v53  ;;  %v4236_v22 = vadd.f32 %v3397_v58, %v1865_v46  ;;  %2203 = vmatpush1.msra.mxu0 %v2152_v21  ;;  %2316 = vmatpush1.msra.mxu1 %v2154_v6  ;;  %v4244_v10 = vadd.f32 %v3398_v8, %v1915_v23  ;;  %v2131_v42 = vld [vmem:[#allocation5 + $0xb8] sm:$0xff]  ;;  %v2128_v48 = vld [vmem:[#allocation5 + $0xa0] sm:$0xff]  ;;  %v2130_v49 = vld [vmem:[#allocation5 + $0xb0] sm:$0xff] }
 0x324   : > { %4811 = vst [vmem:[#allocation18_spill] sm:$0xff] %v4210_v50  ;;  %4812 = vst [vmem:[#allocation19_spill] sm:$0xff] %v4215_v44  ;;  %v2001_v56 = vmul.f32 %v4210_v50, %v4210_v50  ;;  %v2002_v52 = vmul.f32 %v4215_v44, %v4215_v44  ;;  %2204 = vmatprep.subr.mxu0 %v2149_v24  ;;  %2317 = vmatprep.subr.mxu1 %v2151_v63  ;;  %v2125_v53 = vld [vmem:[#allocation5 + $0x88] sm:$0xff]  ;;  %v2127_v54 = vld [vmem:[#allocation5 + $0x98] sm:$0xff] }
 0x325   : > { %4813 = vst [vmem:[#allocation20_spill] sm:$0xff] %v4223_v40  ;;  %v2003_v62 = vmul.f32 %v4223_v40, %v4223_v40  ;;  %4815 = vst [vmem:[#allocation22_spill] sm:$0xff] %v4236_v22  ;;  %v2005_v61 = vmul.f32 %v4236_v22, %v4236_v22  ;;  %2205 = vmatpush1.msra.mxu0 %v2148_v25  ;;  %2318 = vmatpush1.msra.mxu1 %v2150_v27  ;;  %v2121_v57 = vld [vmem:[#allocation5 + $0x68] sm:$0xff]  ;;  %v2123_v59 = vld [vmem:[#allocation5 + $0x78] sm:$0xff] }
 0x326   : > { %1978 = vadd.xlane.f32.xlu0 %v4210_v50  ;;  %2010 = vadd.xlane.f32.xlu1 %v2001_v56  ;;  %4816 = vst [vmem:[#allocation23_spill] sm:$0xff] %v4244_v10  ;;  %v2006_v33 = vmul.f32 %v4244_v10, %v4244_v10  ;;  %v4252_v34 = vadd.f32 %v3399_v31, %v1965_v1  ;;  %v2124_v56 = vld [vmem:[#allocation5 + $0x80] sm:$0xff]  ;;  %v2122_v39 = vld [vmem:[#allocation5 + $0x70] sm:$0xff]  ;;  %v2119_v47 = vld [vmem:[#allocation5 + $0x58] sm:$0xff] }
 0x327   : > { %2206 = vmatprep.subr.mxu0 %v2145_v5  ;;  %2319 = vmatprep.subr.mxu1 %v2147_v7  ;;  %v2116_v45 = vld [vmem:[#allocation5 + $0x40] sm:$0xff]  ;;  %v2118_v12 = vld [vmem:[#allocation5 + $0x50] sm:$0xff]  ;;  %v2113_v46 = vld [vmem:[#allocation5 + $0x28] sm:$0xff] }
 0x328   : > { %2207 = vmatpush1.msra.mxu0 %v2144_v9  ;;  %2320 = vmatpush1.msra.mxu1 %v2146_v14  ;;  %4817 = vst [vmem:[#allocation24_spill] sm:$0xff] %v4252_v34  ;;  %v2007_v43 = vmul.f32 %v4252_v34, %v4252_v34  ;;  %v2115_v4 = vld [vmem:[#allocation5 + $0x38] sm:$0xff]  ;;  %v2112_v51 = vld [vmem:[#allocation5 + $0x20] sm:$0xff]  ;;  %v2114_v15 = vld [vmem:[#allocation5 + $0x30] sm:$0xff] }
 0x329   : > { %2208 = vmatprep.subr.mxu0 %v2141_v17  ;;  %2321 = vmatprep.subr.mxu1 %v2143_v29  ;;  %v2109_v18 = vld [vmem:[#allocation5 + $0x8] sm:$0xff]  ;;  %v2111_v20 = vld [vmem:[#allocation5 + $0x18] sm:$0xff]  ;;  %v2108_v55 = vld [vmem:[#allocation5] sm:$0xff] }
 0x32a   : > { %1980 = vadd.xlane.f32.xlu0 %v4215_v44  ;;  %2012 = vadd.xlane.f32.xlu1 %v2002_v52  ;;  %v2126_v52 = vld [vmem:[#allocation5 + $0x90] sm:$0xff]  ;;  %v2611_v6 = vld [vmem:[#allocation7 + $0xf8] sm:$0xff] }
 0x32b   : > { %2209 = vmatpush1.msra.mxu0 %v2140_v28  ;;  %2322 = vmatpush1.msra.mxu1 %v2142_v30  ;;  %v2110_v21 = vld [vmem:[#allocation5 + $0x10] sm:$0xff] }
 0x32c   : > { %2210 = vmatprep.subr.mxu0 %v2137_v35  ;;  %2323 = vmatprep.subr.mxu1 %v2139_v0 }
 0x32d   : > { %2211 = vmatpush1.msra.mxu0 %v2136_v11  ;;  %2324 = vmatpush1.msra.mxu1 %v2138_v32 }
 0x32e   : > { %1982 = vadd.xlane.f32.xlu0 %v4223_v40  ;;  %2014 = vadd.xlane.f32.xlu1 %v2003_v62  ;;  %v2120_v62 = vld [vmem:[#allocation5 + $0x60] sm:$0xff] }
 0x32f   : > { %2212 = vmatprep.subr.mxu0 %v2133_v36  ;;  %2325 = vmatprep.subr.mxu1 %v2135_v37 }
 0x330   : > { %2213 = vmatpush1.msra.mxu0 %v2132_v38  ;;  %2326 = vmatpush1.msra.mxu1 %v2134_v2 }
 0x331   : > { %2214 = vmatprep.subr.mxu0 %v2129_v41  ;;  %2327 = vmatprep.subr.mxu1 %v2131_v42 }
 0x332   : > { %1984 = vadd.xlane.f32.xlu0 %v4230_v13  ;;  %2016 = vadd.xlane.f32.xlu1 %v2004_v60 }
 0x333   : > { %2215 = vmatpush1.msra.mxu0 %v2128_v48  ;;  %2328 = vmatpush1.msra.mxu1 %v2130_v49 }
 0x334   : > { %2216 = vmatprep.subr.mxu0 %v2125_v53  ;;  %2329 = vmatprep.subr.mxu1 %v2127_v54 }
 0x335   : > { %2217 = vmatpush1.msra.mxu0 %v2124_v56  ;;  %2330 = vmatpush1.msra.mxu1 %v2126_v52 }
 0x336   : > { %1986 = vadd.xlane.f32.xlu0 %v4236_v22  ;;  %2018 = vadd.xlane.f32.xlu1 %v2005_v61 }
 0x337   : > { %2218 = vmatprep.subr.mxu0 %v2121_v57  ;;  %2331 = vmatprep.subr.mxu1 %v2123_v59 }
 0x338   : > { %2219 = vmatpush1.msra.mxu0 %v2120_v62  ;;  %2332 = vmatpush1.msra.mxu1 %v2122_v39  ;;  %v4276_v62 = vld [vmem:[%s4744_s7] ss:$0 sm:$0xff] }
 0x339   : > { %2220 = vmatprep.subr.mxu0 %v2117_v3  ;;  %2333 = vmatprep.subr.mxu1 %v2119_v47 }
 0x33a   : > { %1988 = vadd.xlane.f32.xlu0 %v4244_v10  ;;  %2020 = vadd.xlane.f32.xlu1 %v2006_v33 }
 0x33b   : > { %2221 = vmatpush1.msra.mxu0 %v2116_v45  ;;  %2334 = vmatpush1.msra.mxu1 %v2118_v12  ;;  %v4283_v12 = vld [vmem:[%s4745_s8] ss:$0 sm:$0xff] }
 0x33c   : > { %2222 = vmatprep.subr.mxu0 %v2113_v46  ;;  %2335 = vmatprep.subr.mxu1 %v2115_v4 }
 0x33d   : > { %2223 = vmatpush1.msra.mxu0 %v2112_v51  ;;  %2336 = vmatpush1.msra.mxu1 %v2114_v15 }
 0x33e   : > { %1990 = vadd.xlane.f32.xlu0 %v4252_v34  ;;  %2022 = vadd.xlane.f32.xlu1 %v2007_v43 }
 0x33f   : > { %2224 = vmatprep.subr.mxu0 %v2109_v18  ;;  %2337 = vmatprep.subr.mxu1 %v2111_v20 }
 0x340   : > { %2225 = vmatpush1.msra.mxu0 %v2108_v55  ;;  %2338 = vmatpush1.msra.mxu1 %v2110_v21 }
 0x341   : > { %3041 = vmatprep.subr.mxu0 %v2611_v6 }
 0x3a9   : > { %v1977_v60 = vpop.xlane.xlu1 %1976 }
 0x3aa   : > { %v1992_v58 = vmul.f32 0.0078125, %v1977_v60 }
 0x3ab   : > { %v2009_v23 = vpop.xlane.xlu0 %2008 }
 0x3ac   : > { %v2032_v24 = vmul.f32 %v1992_v58, %v1992_v58  ;;  %v2024_v63 = vmul.f32 0.0078125, %v2009_v23  ;;  %v2048_v54 = vsub.f32 %v4188_v19, %v1992_v58 }
 0x3ae   : > { %v2040_v25 = vsub.f32 %v2024_v63, %v2032_v24  ;;  %v2595_v24 = vld [vmem:[#allocation7 + $0x78] sm:$0xff] }
 0x3af   : > { %v2011_v27 = vpop.xlane.xlu1 %2010  ;;  %v1979_v5 = vpop.xlane.xlu0 %1978 }
 0x3b0   : > { %v2056_v7 = vadd.f32 1e-05, %v2040_v25  ;;  %v1993_v61 = vmul.f32 0.0078125, %v1979_v5  ;;  %v2025_v8 = vmul.f32 0.0078125, %v2011_v27  ;;  %v2610_v27 = vld [vmem:[#allocation7 + $0xf0] sm:$0xff] }
 0x3b2   : > { %3312 = vrsqrt.f32 %v2056_v7  ;;  %v2033_v1 = vmul.f32 %v1993_v61, %v1993_v61  ;;  %v2049_v15 = vsub.f32 %v4210_v50, %v1993_v61 }
 0x3b3   : > { %v2013_v9 = vpop.xlane.xlu1 %2012  ;;  %v1981_v14 = vpop.xlane.xlu0 %1980 }
 0x3b4   : > { %v2041_v17 = vsub.f32 %v2025_v8, %v2033_v1  ;;  %v4258_v29 = vmul.f32 0.0078125, %v1981_v14  ;;  %v2026_v30 = vmul.f32 0.0078125, %v2013_v9  ;;  %v2594_v8 = vld [vmem:[#allocation7 + $0x70] sm:$0xff]  ;;  %v2609_v14 = vld [vmem:[#allocation7 + $0xe8] sm:$0xff] }
 0x3b6   : > { %v2057_v28 = vadd.f32 1e-05, %v2041_v17  ;;  %v2034_v33 = vmul.f32 %v4258_v29, %v4258_v29  ;;  %v2050_v5 = vsub.f32 %v4215_v44, %v4258_v29 }
 0x3b7   : > { %v2015_v31 = vpop.xlane.xlu1 %2014  ;;  %v1983_v35 = vpop.xlane.xlu0 %1982 }
 0x3b8   : > { %3314 = vrsqrt.f32 %v2057_v28  ;;  %v2042_v0 = vsub.f32 %v2026_v30, %v2034_v33  ;;  %v4262_v11 = vmul.f32 0.0078125, %v1983_v35  ;;  %v2027_v36 = vmul.f32 0.0078125, %v2015_v31 }
 0x3ba   : > { %v2058_v32 = vadd.f32 1e-05, %v2042_v0  ;;  %v2035_v37 = vmul.f32 %v4262_v11, %v4262_v11  ;;  %v2051_v31 = vsub.f32 %v4223_v40, %v4262_v11 }
 0x3bb   : > { %v2017_v43 = vpop.xlane.xlu1 %2016  ;;  %v1985_v38 = vpop.xlane.xlu0 %1984 }
 0x3bc   : > { %3316 = vrsqrt.f32 %v2058_v32  ;;  %v2043_v2 = vsub.f32 %v2027_v36, %v2035_v37  ;;  %v4266_v41 = vmul.f32 0.0078125, %v1985_v38  ;;  %v2028_v48 = vmul.f32 0.0078125, %v2017_v43  ;;  %v2593_v32 = vld [vmem:[#allocation7 + $0x68] sm:$0xff] }
 0x3be   : > { %v2059_v42 = vadd.f32 1e-05, %v2043_v2  ;;  %v2036_v49 = vmul.f32 %v4266_v41, %v4266_v41  ;;  %v2052_v11 = vsub.f32 %v4230_v13, %v4266_v41 }
 0x3bf   : > { %v3313_v53 = vpop.eup %3312  ;;  %v2019_v56 = vpop.xlane.xlu1 %2018 }
 0x3c0   : > { %v1987_v52 = vpop.xlane.xlu0 %1986  ;;  %3318 = vrsqrt.f32 %v2059_v42  ;;  %v2044_v57 = vsub.f32 %v2028_v48, %v2036_v49  ;;  %v2072_v39 = vmul.f32 %v3313_v53, %v2048_v54  ;;  %v2029_v47 = vmul.f32 0.0078125, %v2019_v56 }
 0x3c1   : > { %v4271_v59 = vmul.f32 0.0078125, %v1987_v52 }
 0x3c2   : > { %v2060_v3 = vadd.f32 1e-05, %v2044_v57  ;;  %v2086_v51 = vmul.f32 %v4276_v62, %v2072_v39 }
 0x3c3   : > { %v2037_v45 = vmul.f32 %v4271_v59, %v4271_v59  ;;  %v2021_v46 = vpop.xlane.xlu1 %2020  ;;  %v2053_v53 = vsub.f32 %v4236_v22, %v4271_v59 }
 0x3c4   : > { %v1989_v4 = vpop.xlane.xlu0 %1988  ;;  %3320 = vrsqrt.f32 %v2060_v3  ;;  %v2100_v21 = vadd.f32 %v4283_v12, %v2086_v51  ;;  %v2030_v58 = vmul.f32 0.0078125, %v2021_v46 }
 0x3c5   : > { %v2045_v18 = vsub.f32 %v2029_v47, %v2037_v45  ;;  %v4287_v20 = vmul.f32 0.0078125, %v1989_v4  ;;  %v3315_v55 = vpop.eup %3314 }
 0x3c6   : > { %v2073_v6 = vmul.f32 %v3315_v55, %v2049_v15  ;;  %2259 = vmatmul.mubr.f32.vlgmr.msra.gmra.mxu0 %v2100_v21  ;;  %2372 = vmatmul.mubr.f32.vlgmr.msra.gmra.mxu1 %v2100_v21  ;;  %v2608_v55 = vld [vmem:[#allocation7 + $0xe0] sm:$0xff]  ;;  %v4336_v21 = vld [vmem:[#allocation7 + $0x1f8] sm:$0xff] }
 0x3c7   : > { %v2061_v60 = vadd.f32 1e-05, %v2045_v18  ;;  %v2038_v23 = vmul.f32 %v4287_v20, %v4287_v20  ;;  %v2023_v63 = vpop.xlane.xlu1 %2022  ;;  %2264 = vmatprep.mubr.f32.mxu0 %v3557_v16  ;;  %2377 = vmatprep.mubr.f32.mxu1 %v3557_v16  ;;  %v2054_v57 = vsub.f32 %v4244_v10, %v4287_v20 }
 0x3c8   : > { %v1991_v25 = vpop.xlane.xlu0 %1990  ;;  %v2087_v9 = vmul.f32 %v4276_v62, %v2073_v6  ;;  %3042 = vmatpush3.msra.mxu0 %v2595_v24  ;;  %v2031_v30 = vmul.f32 0.0078125, %v2023_v63  ;;  %3153 = vmatprep.subr.mxu1 %v4336_v21  ;;  %v2592_v6 = vld [vmem:[#allocation7 + $0x60] sm:$0xff]  ;;  %v4348_v24 = vld [vmem:[#allocation7 + $0x1e8] sm:$0xff]  ;;  %v2590_v63 = vld [vmem:[#allocation7 + $0x50] sm:$0xff] }
 0x3c9   : > { %3322 = vrsqrt.f32 %v2061_v60  ;;  %v2046_v7 = vsub.f32 %v2030_v58, %v2038_v23  ;;  %v4294_v61 = vmul.f32 0.0078125, %v1991_v25  ;;  %v3317_v1 = vpop.eup %3316  ;;  %3043 = vmatprep.subr.mxu0 %v2610_v27  ;;  %v4339_v60 = vld [vmem:[#allocation7 + $0x178] sm:$0xff]  ;;  %v4342_v58 = vld [vmem:[#allocation7 + $0x1f0] sm:$0xff]  ;;  %v4351_v25 = vld [vmem:[#allocation7 + $0x168] sm:$0xff] }
 0x3ca   : > { %v2074_v17 = vmul.f32 %v3317_v1, %v2050_v5  ;;  %v2101_v33 = vadd.f32 %v4283_v12, %v2087_v9  ;;  %3044 = vmatpush3.msra.mxu0 %v2594_v8  ;;  %3169 = vmatpush3.msra.mxu1 %v4339_v60  ;;  %v2606_v23 = vld [vmem:[#allocation7 + $0xd0] sm:$0xff]  ;;  %v2605_v27 = vld [vmem:[#allocation7 + $0xc8] sm:$0xff]  ;;  %v4354_v5 = vld [vmem:[#allocation7 + $0x1e0] sm:$0xff] }
 0x3cb   : > { %v2062_v28 = vadd.f32 1e-05, %v2046_v7  ;;  %v2039_v29 = vmul.f32 %v4294_v61, %v4294_v61  ;;  %3045 = vmatprep.subr.mxu0 %v2609_v14  ;;  %v2055_v45 = vsub.f32 %v4252_v34, %v4294_v61  ;;  %3154 = vmatprep.subr.mxu1 %v4342_v58  ;;  %v2589_v7 = vld [vmem:[#allocation7 + $0x48] sm:$0xff]  ;;  %v4357_v61 = vld [vmem:[#allocation7 + $0x160] sm:$0xff]  ;;  %v4360_v1 = vld [vmem:[#allocation7 + $0x1d8] sm:$0xff] }
 0x3cc   : > { %v2088_v0 = vmul.f32 %v4276_v62, %v2074_v17  ;;  %2265 = vmatmul.mubr.f32.gmra.mxu0 %v2101_v33  ;;  %2378 = vmatmul.mubr.f32.gmra.mxu1 %v2101_v33  ;;  %v2604_v8 = vld [vmem:[#allocation7 + $0xc0] sm:$0xff]  ;;  %v4363_v14 = vld [vmem:[#allocation7 + $0x158] sm:$0xff]  ;;  %v2602_v33 = vld [vmem:[#allocation7 + $0xb0] sm:$0xff] }
 0x3cd   : > { %3324 = vrsqrt.f32 %v2062_v28  ;;  %v2047_v35 = vsub.f32 %v2031_v30, %v2039_v29  ;;  %v3319_v36 = vpop.eup %3318  ;;  %2270 = vmatprep.mubr.f32.mxu0 %v3557_v16  ;;  %2383 = vmatprep.mubr.f32.mxu1 %v3557_v16  ;;  %v2588_v9 = vld [vmem:[#allocation7 + $0x40] sm:$0xff]  ;;  %v2603_v17 = vld [vmem:[#allocation7 + $0xb8] sm:$0xff]  ;;  %v4366_v28 = vld [vmem:[#allocation7 + $0x1d0] sm:$0xff] }
 0x3ce   : > { %v2075_v37 = vmul.f32 %v3319_v36, %v2051_v31  ;;  %v2102_v38 = vadd.f32 %v4283_v12, %v2088_v0  ;;  %3046 = vmatpush3.msra.mxu0 %v2593_v32  ;;  %v2587_v30 = vld [vmem:[#allocation7 + $0x38] sm:$0xff]  ;;  %v4369_v29 = vld [vmem:[#allocation7 + $0x150] sm:$0xff]  ;;  %v4372_v31 = vld [vmem:[#allocation7 + $0x1c8] sm:$0xff] }
 0x3cf   : > { %v2063_v43 = vadd.f32 1e-05, %v2047_v35  ;;  %3047 = vmatprep.subr.mxu0 %v2608_v55  ;;  %v2586_v35 = vld [vmem:[#allocation7 + $0x30] sm:$0xff]  ;;  %v4375_v0 = vld [vmem:[#allocation7 + $0x148] sm:$0xff]  ;;  %v4378_v36 = vld [vmem:[#allocation7 + $0x1c0] sm:$0xff] }
 0x3d0   : > { %v2089_v2 = vmul.f32 %v4276_v62, %v2075_v37  ;;  %2271 = vmatmul.mubr.f32.gmra.mxu0 %v2102_v38  ;;  %2384 = vmatmul.mubr.f32.gmra.mxu1 %v2102_v38  ;;  %v2601_v32 = vld [vmem:[#allocation7 + $0xa8] sm:$0xff]  ;;  %v2600_v38 = vld [vmem:[#allocation7 + $0xa0] sm:$0xff] }
 0x3d1   : > { %3326 = vrsqrt.f32 %v2063_v43  ;;  %v3321_v42 = vpop.eup %3320  ;;  %2276 = vmatprep.mubr.f32.mxu0 %v3557_v16  ;;  %2389 = vmatprep.mubr.f32.mxu1 %v3557_v16  ;;  %v2585_v37 = vld [vmem:[#allocation7 + $0x28] sm:$0xff]  ;;  %v4381_v43 = vld [vmem:[#allocation7 + $0x140] sm:$0xff] }
 0x3d2   : > { %v2076_v48 = vmul.f32 %v3321_v42, %v2052_v11  ;;  %v2103_v49 = vadd.f32 %v4283_v12, %v2089_v2  ;;  %3048 = vmatpush3.msra.mxu0 %v2592_v6  ;;  %v4384_v11 = vld [vmem:[#allocation7 + $0x1b8] sm:$0xff]  ;;  %v2584_v2 = vld [vmem:[#allocation7 + $0x20] sm:$0xff]  ;;  %v4424_v55 = vld [vmem:[#allocation7 + $0x108] sm:$0xff] }
 0x3d3   : > { %v4387_v42 = vld [vmem:[#allocation7 + $0x138] sm:$0xff]  ;;  %4829 = vst [vmem:[#allocation36_spill] sm:$0xff] %v4424_v55  ;;  %v4427_v6 = vld [vmem:[#allocation7 + $0x180] sm:$0xff] }
 0x3d4   : > { %v2090_v54 = vmul.f32 %v4276_v62, %v2076_v48  ;;  %2277 = vmatmul.mubr.f32.gmra.mxu0 %v2103_v49  ;;  %2390 = vmatmul.mubr.f32.gmra.mxu1 %v2103_v49  ;;  %v2599_v48 = vld [vmem:[#allocation7 + $0x98] sm:$0xff]  ;;  %v4390_v49 = vld [vmem:[#allocation7 + $0x1b0] sm:$0xff]  ;;  %4830 = vst [vmem:[#allocation37_spill] sm:$0xff] %v4427_v6 }
 0x3d5   : > { %2282 = vmatprep.mubr.f32.mxu0 %v3557_v16  ;;  %2395 = vmatprep.mubr.f32.mxu1 %v3557_v16  ;;  %4818 = vst [vmem:[#allocation25_spill] sm:$0xff] %v4390_v49 }
 0x3d6   : > { %v3323_v56 = vpop.eup %3322  ;;  %v2104_v52 = vadd.f32 %v4283_v12, %v2090_v54  ;;  %v4393_v54 = vld [vmem:[#allocation7 + $0x130] sm:$0xff] }
 0x3d7   : > { %v2077_v41 = vmul.f32 %v3323_v56, %v2053_v53  ;;  %v2583_v53 = vld [vmem:[#allocation7 + $0x18] sm:$0xff]  ;;  %4819 = vst [vmem:[#allocation26_spill] sm:$0xff] %v4393_v54  ;;  %v2598_v56 = vld [vmem:[#allocation7 + $0x90] sm:$0xff] }
 0x3d8   : > { %2283 = vmatmul.mubr.f32.gmra.mxu0 %v2104_v52  ;;  %2396 = vmatmul.mubr.f32.gmra.mxu1 %v2104_v52  ;;  %v2582_v52 = vld [vmem:[#allocation7 + $0x10] sm:$0xff] }
 0x3d9   : > { %v2091_v39 = vmul.f32 %v4276_v62, %v2077_v41  ;;  %2288 = vmatprep.mubr.f32.mxu0 %v3557_v16  ;;  %2401 = vmatprep.mubr.f32.mxu1 %v3557_v16  ;;  %v4396_v41 = vld [vmem:[#allocation7 + $0x1a8] sm:$0xff] }
 0x3da   : > { %v3325_v3 = vpop.eup %3324  ;;  %4820 = vst [vmem:[#allocation27_spill] sm:$0xff] %v4396_v41 }
 0x3db   : > { %v2078_v59 = vmul.f32 %v3325_v3, %v2054_v57  ;;  %v2105_v47 = vadd.f32 %v4283_v12, %v2091_v39  ;;  %v4399_v57 = vld [vmem:[#allocation7 + $0x128] sm:$0xff]  ;;  %v4402_v3 = vld [vmem:[#allocation7 + $0x1a0] sm:$0xff] }
 0x3dc   : > { %4821 = vst [vmem:[#allocation28_spill] sm:$0xff] %v4399_v57  ;;  %v2597_v39 = vld [vmem:[#allocation7 + $0x88] sm:$0xff]  ;;  %4822 = vst [vmem:[#allocation29_spill] sm:$0xff] %v4402_v3 }
 0x3dd   : > { %v2092_v46 = vmul.f32 %v4276_v62, %v2078_v59  ;;  %2289 = vmatmul.mubr.f32.gmra.mxu0 %v2105_v47  ;;  %2402 = vmatmul.mubr.f32.gmra.mxu1 %v2105_v47  ;;  %v2581_v59 = vld [vmem:[#allocation7 + $0x8] sm:$0xff]  ;;  %v4405_v47 = vld [vmem:[#allocation7 + $0x120] sm:$0xff] }
 0x3de   : > { %v3327_v4 = vpop.eup %3326  ;;  %2294 = vmatprep.mubr.f32.mxu0 %v3557_v16  ;;  %2407 = vmatprep.mubr.f32.mxu1 %v3557_v16  ;;  %4823 = vst [vmem:[#allocation30_spill] sm:$0xff] %v4405_v47 }
 0x3df   : > { %v2079_v51 = vmul.f32 %v3327_v4, %v2055_v45  ;;  %v2106_v15 = vadd.f32 %v4283_v12, %v2092_v46  ;;  %v2596_v45 = vld [vmem:[#allocation7 + $0x80] sm:$0xff]  ;;  %v4408_v46 = vld [vmem:[#allocation7 + $0x198] sm:$0xff] }
 0x3e0   : > { %4824 = vst [vmem:[#allocation31_spill] sm:$0xff] %v4408_v46  ;;  %v2580_v4 = vld [vmem:[#allocation7] sm:$0xff] }
 0x3e1   : > { %v2093_v18 = vmul.f32 %v4276_v62, %v2079_v51  ;;  %2295 = vmatmul.mubr.f32.gmra.mxu0 %v2106_v15  ;;  %2408 = vmatmul.mubr.f32.gmra.mxu1 %v2106_v15  ;;  %v2607_v62 = vld [vmem:[#allocation7 + $0xd8] sm:$0xff]  ;;  %v4415_v15 = vld [vmem:[#allocation7 + $0x190] sm:$0xff] }
 0x3e2   : > { %2300 = vmatprep.mubr.f32.mxu0 %v3557_v16  ;;  %2413 = vmatprep.mubr.f32.mxu1 %v3557_v16  ;;  %v2591_v16 = vld [vmem:[#allocation7 + $0x58] sm:$0xff]  ;;  %4826 = vst [vmem:[#allocation33_spill] sm:$0xff] %v4415_v15 }
 0x3e3   : > { %v2107_v20 = vadd.f32 %v4283_v12, %v2093_v18  ;;  %3049 = vmatprep.subr.mxu0 %v2607_v62  ;;  %v4345_v12 = vld [vmem:[#allocation7 + $0x170] sm:$0xff]  ;;  %v4411_v51 = vld [vmem:[#allocation7 + $0x118] sm:$0xff]  ;;  %v2176_v62 = vsub.s32 0, %v3898_v26 }
 0x3e4   : > { %3050 = vmatpush3.msra.mxu0 %v2591_v16  ;;  %3170 = vmatpush3.msra.mxu1 %v4345_v12  ;;  %4825 = vst [vmem:[#allocation32_spill] sm:$0xff] %v4411_v51  ;;  %v4418_v18 = vld [vmem:[#allocation7 + $0x110] sm:$0xff]  ;;  %v2172_v16 = vld [vmem:[%s4747_s10] sm:$0xf] }
 0x3e5   : > { %2301 = vmatmul.mubr.f32.gmra.mxu0 %v2107_v20  ;;  %2414 = vmatmul.mubr.f32.gmra.mxu1 %v2107_v20  ;;  %4827 = vst [vmem:[#allocation34_spill] sm:$0xff] %v4418_v18  ;;  %v4421_v20 = vld [vmem:[#allocation7 + $0x188] sm:$0xff] }
 0x3e6   : > { %3051 = vmatprep.subr.mxu0 %v2606_v23  ;;  %3155 = vmatprep.subr.mxu1 %v4348_v24  ;;  %4828 = vst [vmem:[#allocation35_spill] sm:$0xff] %v4421_v20  ;;  %v2180_v23 = vsub.s32 1, %v3898_v26 }
 0x3e7   : > { %3052 = vmatpush3.msra.mxu0 %v2590_v63  ;;  %3171 = vmatpush3.msra.mxu1 %v4351_v25  ;;  %v4438_v63 = vrot.slane %v2172_v16, %v2176_v62 }
 0x3e8   : > { %3053 = vmatprep.subr.mxu0 %v2605_v27  ;;  %3156 = vmatprep.subr.mxu1 %v4354_v5  ;;  %v2184_v27 = vsub.s32 2, %v3898_v26 }
 0x3e9   : > { %3054 = vmatpush3.msra.mxu0 %v2589_v7  ;;  %3172 = vmatpush3.msra.mxu1 %v4357_v61 }
 0x3ea   : > { %3055 = vmatprep.subr.mxu0 %v2604_v8  ;;  %3157 = vmatprep.subr.mxu1 %v4360_v1 }
 0x3eb   : > { %3056 = vmatpush3.msra.mxu0 %v2588_v9  ;;  %3173 = vmatpush3.msra.mxu1 %v4363_v14  ;;  %v4441_v9 = vrot.slane %v2172_v16, %v2180_v23 }
 0x3ec   : > { %3057 = vmatprep.subr.mxu0 %v2603_v17  ;;  %3158 = vmatprep.subr.mxu1 %v4366_v28 }
 0x3ed   : > { %3058 = vmatpush3.msra.mxu0 %v2587_v30  ;;  %3174 = vmatpush3.msra.mxu1 %v4369_v29 }
 0x3ee   : > { %3059 = vmatprep.subr.mxu0 %v2602_v33  ;;  %3159 = vmatprep.subr.mxu1 %v4372_v31  ;;  %v4444_v33 = vrot.slane %v2172_v16, %v2184_v27 }
 0x3ef   : > { %3060 = vmatpush3.msra.mxu0 %v2586_v35  ;;  %3175 = vmatpush3.msra.mxu1 %v4375_v0 }
 0x3f0   : > { %3061 = vmatprep.subr.mxu0 %v2601_v32  ;;  %3160 = vmatprep.subr.mxu1 %v4378_v36 }
 0x3f1   : > { %3062 = vmatpush3.msra.mxu0 %v2585_v37  ;;  %3176 = vmatpush3.msra.mxu1 %v4381_v43 }
 0x3f2   : > { %3063 = vmatprep.subr.mxu0 %v2600_v38  ;;  %3161 = vmatprep.subr.mxu1 %v4384_v11  ;;  %v2188_v38 = vsub.s32 3, %v3898_v26 }
 0x3f3   : > { %3064 = vmatpush3.msra.mxu0 %v2584_v2  ;;  %3177 = vmatpush3.msra.mxu1 %v4387_v42 }
 0x3f4   : > { %3065 = vmatprep.subr.mxu0 %v2599_v48  ;;  %3162 = vmatprep.subr.mxu1 %v4390_v49 }
 0x3f5   : > { %3066 = vmatpush3.msra.mxu0 %v2583_v53  ;;  %3178 = vmatpush3.msra.mxu1 %v4393_v54 }
 0x3f6   : > { %3067 = vmatprep.subr.mxu0 %v2598_v56  ;;  %3163 = vmatprep.subr.mxu1 %v4396_v41 }
 0x3f7   : > { %3068 = vmatpush3.msra.mxu0 %v2582_v52  ;;  %3179 = vmatpush3.msra.mxu1 %v4399_v57 }
 0x3f8   : > { %3069 = vmatprep.subr.mxu0 %v2597_v39  ;;  %3164 = vmatprep.subr.mxu1 %v4402_v3 }
 0x3f9   : > { %3070 = vmatpush3.msra.mxu0 %v2581_v59  ;;  %3180 = vmatpush3.msra.mxu1 %v4405_v47 }
 0x3fa   : > { %3071 = vmatprep.subr.mxu0 %v2596_v45  ;;  %3165 = vmatprep.subr.mxu1 %v4408_v46  ;;  %v4454_v45 = vrot.slane %v2172_v16, %v2188_v38 }
 0x3fb   : > { %3072 = vmatpush3.msra.mxu0 %v2580_v4  ;;  %3181 = vmatpush3.msra.mxu1 %v4411_v51 }
 0x3fc   : > { %3097 = vmatprep.subr.mxu0 %v4336_v21  ;;  %3166 = vmatprep.subr.mxu1 %v4415_v15  ;;  %v4430_v21 = vld [vmem:[#allocation7 + $0x100] sm:$0xff] }
 0x3fd   : > { %3182 = vmatpush3.msra.mxu1 %v4418_v18  ;;  %4831 = vst [vmem:[#allocation38_spill] sm:$0xff] %v4430_v21 }
 0x3fe   : > { %3167 = vmatprep.subr.mxu1 %v4421_v20 }
 0x3ff   : > { %3183 = vmatpush3.msra.mxu1 %v4424_v55 }
 0x400   : > { %3168 = vmatprep.subr.mxu1 %v4427_v6 }
 0x401   : > { %3184 = vmatpush3.msra.mxu1 %v4430_v21 }
 0x486   : > { %v2260_v7 = vpop.f32.mrf.mxu0  ;;  %v2373_v8 = vpop.f32.mrf.mxu1 }
 0x487   : > { %v2261_v17 = vadd.f32 %v2260_v7, %v4438_v63  ;;  %v4449_v56 = vadd.f32 %v2373_v8, %v4444_v33 }
 0x488   : > { %v2262_v30 = vpop.f32.mrf.mxu0  ;;  %v2375_v37 = vpop.f32.mrf.mxu1 }
 0x489   : > { %v2452_v35 = vmul.f32 0.70710677, %v2261_v17  ;;  %v2263_v32 = vadd.f32 %v2262_v30, %v4441_v9  ;;  %4832 = vst [vmem:[#allocation39_spill] sm:$0xff] %v4449_v56  ;;  %v2454_v27 = vmul.f32 0.70710677, %v4449_v56  ;;  %v4478_v13 = vadd.f32 %v2375_v37, %v4454_v45 }
 0x48b   : > { %v2453_v2 = vmul.f32 0.70710677, %v2263_v32  ;;  %3328 = verf.f32 %v2452_v35  ;;  %4833 = vst [vmem:[#allocation40_spill] sm:$0xff] %v4478_v13  ;;  %v2421_v50 = vmul.f32 0.5, %v2263_v32  ;;  %v4494_v55 = vmul.f32 0.70710677, %v4478_v13 }
 0x48c   : > { %v2266_v48 = vpop.f32.mrf.mxu0  ;;  %v2379_v53 = vpop.f32.mrf.mxu1 }
 0x48d   : > { %v4452_v52 = vadd.f32 %v2379_v53, %v4444_v33  ;;  %3330 = verf.f32 %v2453_v2  ;;  %v2267_v4 = vadd.f32 %v2266_v48, %v4438_v63 }
 0x48e   : > { %v2268_v39 = vpop.f32.mrf.mxu0  ;;  %v2381_v59 = vpop.f32.mrf.mxu1  ;;  %3332 = verf.f32 %v2454_v27 }
 0x48f   : > { %v2269_v62 = vadd.f32 %v2268_v39, %v4441_v9  ;;  %v2382_v7 = vadd.f32 %v2381_v59, %v4454_v45  ;;  %v2458_v8 = vmul.f32 0.70710677, %v4452_v52  ;;  %v2456_v2 = vmul.f32 0.70710677, %v2267_v4 }
 0x490   : > { %v2272_v26 = vpop.f32.mrf.mxu0  ;;  %v2385_v23 = vpop.f32.mrf.mxu1 }
 0x491   : > { %v4462_v30 = vadd.f32 %v2272_v26, %v4438_v63  ;;  %v4465_v16 = vadd.f32 %v2385_v23, %v4444_v33  ;;  %v2457_v38 = vmul.f32 0.70710677, %v2269_v62  ;;  %v2459_v34 = vmul.f32 0.70710677, %v2382_v7 }
 0x492   : > { %v2274_v35 = vpop.f32.mrf.mxu0  ;;  %v2387_v53 = vpop.f32.mrf.mxu1  ;;  %3334 = verf.f32 %v2458_v8  ;;  %v4516_v15 = vmul.f32 0.5, %v2269_v62  ;;  %v4518_v13 = vmul.f32 0.5, %v2382_v7 }
 0x493   : > { %v4468_v48 = vadd.f32 %v2274_v35, %v4441_v9  ;;  %v4471_v59 = vadd.f32 %v2387_v53, %v4454_v45  ;;  %v2460_v26 = vmul.f32 0.70710677, %v4462_v30  ;;  %3336 = verf.f32 %v2456_v2 }
 0x494   : > { %v2278_v39 = vpop.f32.mrf.mxu0  ;;  %v2391_v19 = vpop.f32.mrf.mxu1  ;;  %v2462_v35 = vmul.f32 0.70710677, %v4465_v16  ;;  %3338 = verf.f32 %v2457_v38  ;;  %v2420_v2 = vmul.f32 0.5, %v2261_v17  ;;  %v4527_v7 = vmul.f32 0.5, %v4462_v30 }
 0x495   : > { %v4475_v10 = vadd.f32 %v2278_v39, %v4438_v63  ;;  %v2461_v27 = vmul.f32 0.70710677, %v4468_v48  ;;  %v4483_v53 = vadd.f32 %v2391_v19, %v4444_v33  ;;  %3340 = verf.f32 %v2459_v34 }
 0x496   : > { %v2280_v22 = vpop.f32.mrf.mxu0  ;;  %v2393_v23 = vpop.f32.mrf.mxu1  ;;  %v2463_v44 = vmul.f32 0.70710677, %v4471_v59  ;;  %3342 = verf.f32 %v2460_v26  ;;  %v4545_v41 = vmul.f32 0.5, %v4468_v48 }
 0x497   : > { %v4486_v8 = vadd.f32 %v2280_v22, %v4441_v9  ;;  %v4490_v37 = vadd.f32 %v2393_v23, %v4454_v45  ;;  %v2464_v38 = vmul.f32 0.70710677, %v4475_v10  ;;  %v4496_v22 = vmul.f32 0.5, %v2267_v4 }
 0x498   : > { %v2284_v40 = vpop.f32.mrf.mxu0  ;;  %v2397_v39 = vpop.f32.mrf.mxu1  ;;  %3344 = verf.f32 %v2462_v35  ;;  %v2466_v23 = vmul.f32 0.70710677, %v4483_v53 }
 0x499   : > { %v3329_v19 = vpop.eup %3328  ;;  %v2465_v34 = vmul.f32 0.70710677, %v4486_v8  ;;  %3346 = verf.f32 %v2461_v27  ;;  %v2467_v17 = vmul.f32 0.70710677, %v4490_v37  ;;  %v4502_v32 = vadd.f32 %v2284_v40, %v4438_v63 }
 0x49a   : > { %v2286_v21 = vpop.f32.mrf.mxu0  ;;  %v2399_v6 = vpop.f32.mrf.mxu1  ;;  %3348 = verf.f32 %v2463_v44  ;;  %v4505_v18 = vadd.f32 %v2397_v39, %v4444_v33  ;;  %v4514_v27 = vmul.f32 0.5, %v4452_v52  ;;  %v2516_v44 = vadd.f32 1.0, %v3329_v19 }
 0x49b   : > { %v3331_v20 = vpop.eup %3330  ;;  %v4508_v4 = vadd.f32 %v2286_v21, %v4441_v9  ;;  %v4511_v35 = vadd.f32 %v2399_v6, %v4454_v45  ;;  %3350 = verf.f32 %v2464_v38  ;;  %v2468_v21 = vmul.f32 0.70710677, %v4502_v32 }
 0x49c   : > { %3352 = verf.f32 %v2465_v34  ;;  %v2517_v46 = vadd.f32 1.0, %v3331_v20  ;;  %v2470_v38 = vmul.f32 0.70710677, %v4505_v18  ;;  %v4533_v20 = vpop.eup %3332  ;;  %v4536_v34 = vmul.f32 0.5, %v4465_v16 }
 0x49d   : > { %v2290_v26 = vpop.f32.mrf.mxu0  ;;  %v2403_v56 = vpop.f32.mrf.mxu1  ;;  %v2469_v39 = vmul.f32 0.70710677, %v4508_v4  ;;  %3354 = verf.f32 %v2467_v17  ;;  %v2471_v6 = vmul.f32 0.70710677, %v4511_v35  ;;  %4834 = vst [vmem:[#allocation41_spill] sm:$0xff] %v4533_v20  ;;  %v2548_v57 = vmul.f32 %v2516_v44, %v2420_v2 }
 0x49e   : > { %v4524_v52 = vadd.f32 %v2290_v26, %v4438_v63  ;;  %3356 = verf.f32 %v2466_v23  ;;  %v4531_v19 = vadd.f32 %v2403_v56, %v4444_v33  ;;  %v2549_v56 = vmul.f32 %v2517_v46, %v2421_v50 }
 0x49f   : > { %v2292_v40 = vpop.f32.mrf.mxu0  ;;  %v2405_v51 = vpop.f32.mrf.mxu1  ;;  %3358 = verf.f32 %v2469_v39 }
 0x4a0   : > { %v4539_v17 = vadd.f32 %v2292_v40, %v4441_v9  ;;  %v4542_v26 = vadd.f32 %v2405_v51, %v4454_v45  ;;  %v3335_v23 = vpop.eup %3334  ;;  %3360 = verf.f32 %v2471_v6  ;;  %v2472_v16 = vmul.f32 0.70710677, %v4524_v52  ;;  %2715 = vmatprep.mubr.f32.mxu0 %v2549_v56 }
 0x4a1   : > { %v2296_v62 = vpop.f32.mrf.mxu0  ;;  %v2409_v47 = vpop.f32.mrf.mxu1  ;;  %3362 = verf.f32 %v2468_v21  ;;  %v2474_v49 = vmul.f32 0.70710677, %v4531_v19  ;;  %v2522_v44 = vadd.f32 1.0, %v3335_v23  ;;  %v4558_v21 = vmul.f32 0.5, %v4471_v59  ;;  %2716 = vmatmul.mubr.f32.vlgmr.msra.gmra.mxu0 %v2548_v57 }
 0x4a2   : > { %v3337_v20 = vpop.eup %3336  ;;  %v2473_v39 = vmul.f32 0.70710677, %v4539_v17  ;;  %v4550_v40 = vadd.f32 %v2296_v62, %v4438_v63  ;;  %3364 = verf.f32 %v2470_v38  ;;  %v2475_v2 = vmul.f32 0.70710677, %v4542_v26  ;;  %3098 = vmatpush3.msra.mxu0 %v4339_v60 }
 0x4a3   : > { %v2298_v30 = vpop.f32.mrf.mxu0  ;;  %v2411_v3 = vpop.f32.mrf.mxu1  ;;  %v4555_v48 = vadd.f32 %v2409_v47, %v4444_v33  ;;  %v4564_v38 = vmul.f32 0.5, %v4475_v10  ;;  %3099 = vmatprep.subr.mxu0 %v4342_v58 }
 0x4a4   : > { %4835 = vst [vmem:[#allocation42_spill] sm:$0xff] %v4550_v40  ;;  %v3339_v54 = vpop.eup %3338  ;;  %3366 = verf.f32 %v2473_v39  ;;  %v4561_v6 = vadd.f32 %v2298_v30, %v4441_v9  ;;  %v4567_v56 = vadd.f32 %v2411_v3, %v4454_v45  ;;  %v2476_v57 = vmul.f32 0.70710677, %v4550_v40  ;;  %3100 = vmatpush3.msra.mxu0 %v4345_v12 }
 0x4a5   : > { %v2302_v51 = vpop.f32.mrf.mxu0  ;;  %4836 = vst [vmem:[#allocation43_spill] sm:$0xff] %v4555_v48  ;;  %v2415_v50 = vpop.f32.mrf.mxu1  ;;  %3368 = verf.f32 %v2475_v2  ;;  %v2521_v23 = vadd.f32 1.0, %v3339_v54  ;;  %v2478_v3 = vmul.f32 0.70710677, %v4555_v48  ;;  %v2433_v40 = vmul.f32 0.5, %v4486_v8  ;;  %3101 = vmatprep.subr.mxu0 %v4348_v24 }
 0x4a6   : > { %v3341_v46 = vpop.eup %3340  ;;  %v4571_v47 = vadd.f32 %v2302_v51, %v4438_v63  ;;  %3370 = verf.f32 %v2472_v16  ;;  %v2477_v30 = vmul.f32 0.70710677, %v4561_v6  ;;  %v2479_v2 = vmul.f32 0.70710677, %v4567_v56  ;;  %3102 = vmatpush3.msra.mxu0 %v4351_v25 }
 0x4a7   : > { %v3343_v62 = vpop.eup %3342  ;;  %v2304_v10 = vpop.f32.mrf.mxu0  ;;  %3372 = verf.f32 %v2474_v49  ;;  %v4579_v60 = vadd.f32 %v2415_v50, %v4444_v33  ;;  %v2554_v51 = vmul.f32 %v2522_v44, %v4514_v27  ;;  %v2553_v54 = vmul.f32 %v2521_v23, %v4516_v15  ;;  %3103 = vmatprep.subr.mxu0 %v4354_v5 }
 0x4a8   : > { %v3345_v59 = vpop.eup %3344  ;;  %v2417_v63 = vpop.f32.mrf.mxu1  ;;  %3374 = verf.f32 %v2477_v30  ;;  %v2480_v58 = vmul.f32 0.70710677, %v4571_v47  ;;  %v2523_v48 = vadd.f32 1.0, %v3341_v46  ;;  %v4588_v33 = vadd.f32 %v2304_v10, %v4441_v9  ;;  %3104 = vmatpush3.msra.mxu0 %v4357_v61 }
 0x4a9   : > { %v3347_v39 = vpop.eup %3346  ;;  %3376 = verf.f32 %v2479_v2  ;;  %v4592_v27 = vadd.f32 %v2417_v63, %v4454_v45  ;;  %v2520_v8 = vadd.f32 1.0, %v3337_v20  ;;  %v2482_v44 = vmul.f32 0.70710677, %v4579_v60  ;;  %2720 = vmatprep.mubr.f32.mxu0 %v2553_v54  ;;  %3105 = vmatprep.subr.mxu0 %v4360_v1 }
 0x4aa   : > { %v3349_v16 = vpop.eup %3348  ;;  %3378 = verf.f32 %v2476_v57  ;;  %v2525_v50 = vadd.f32 1.0, %v3347_v39  ;;  %v2555_v15 = vmul.f32 %v2523_v48, %v4518_v13  ;;  %v2481_v9 = vmul.f32 0.70710677, %v4588_v33  ;;  %3106 = vmatpush3.msra.mxu0 %v4363_v14 }
 0x4ab   : > { %v3351_v49 = vpop.eup %3350  ;;  %3380 = verf.f32 %v2478_v3  ;;  %v2483_v45 = vmul.f32 0.70710677, %v4592_v27  ;;  %v2552_v20 = vmul.f32 %v2520_v8, %v4496_v22  ;;  %v2527_v57 = vadd.f32 1.0, %v3349_v16  ;;  %3107 = vmatprep.subr.mxu0 %v4366_v28 }
 0x4ac   : > { %v3353_v12 = vpop.eup %3352  ;;  %3382 = verf.f32 %v2480_v58  ;;  %v2557_v5 = vmul.f32 %v2525_v50, %v4545_v41  ;;  %2825 = vmatprep.mubr.f32.mxu1 %v2555_v15  ;;  %v2524_v30 = vadd.f32 1.0, %v3343_v62  ;;  %v2526_v13 = vadd.f32 1.0, %v3345_v59  ;;  %3108 = vmatpush3.msra.mxu0 %v4369_v29 }
 0x4ad   : > { %v3355_v24 = vpop.eup %3354  ;;  %3384 = verf.f32 %v2481_v9  ;;  %v2435_v61 = vmul.f32 0.5, %v4490_v37  ;;  %2721 = vmatmul.mubr.f32.gmra.mxu0 %v2552_v20  ;;  %2826 = vmatmul.mubr.f32.vlgmr.msra.gmra.mxu1 %v2554_v51  ;;  %v2529_v23 = vadd.f32 1.0, %v3353_v12  ;;  %v2559_v1 = vmul.f32 %v2527_v57, %v4558_v21 }
 0x4ae   : > { %v3357_v25 = vpop.eup %3356  ;;  %3386 = verf.f32 %v2483_v45  ;;  %v2531_v22 = vadd.f32 1.0, %v3355_v24  ;;  %2725 = vmatprep.mubr.f32.mxu0 %v2557_v5  ;;  %v2556_v41 = vmul.f32 %v2524_v30, %v4527_v7  ;;  %v2528_v62 = vadd.f32 1.0, %v3351_v49  ;;  %3109 = vmatprep.subr.mxu0 %v4372_v31  ;;  %v4837_v30 = vld [vmem:[#allocation25_spill] sm:$0xff] }
 0x4af   : > { %v3359_v46 = vpop.eup %3358  ;;  %v2530_v39 = vadd.f32 1.0, %v3357_v25  ;;  %v2558_v59 = vmul.f32 %v2526_v13, %v4536_v34  ;;  %v2561_v37 = vmul.f32 %v2529_v23, %v2433_v40  ;;  %v2434_v16 = vmul.f32 0.5, %v4483_v53  ;;  %2830 = vmatprep.mubr.f32.mxu1 %v2559_v1  ;;  %3110 = vmatpush3.msra.mxu0 %v4375_v0  ;;  %v4840_v1 = vld [vmem:[#allocation42_spill] sm:$0xff] }
 0x4b0   : > { %v3361_v48 = vpop.eup %3360  ;;  %v2563_v3 = vmul.f32 %v2531_v22, %v2435_v61  ;;  %v2533_v2 = vadd.f32 1.0, %v3359_v46  ;;  %v2437_v51 = vmul.f32 0.5, %v4508_v4  ;;  %3388 = verf.f32 %v2482_v44  ;;  %3111 = vmatprep.subr.mxu0 %v4378_v36  ;;  %v4838_v61 = vld [vmem:[#allocation26_spill] sm:$0xff]  ;;  %v4839_v22 = vld [vmem:[#allocation27_spill] sm:$0xff] }
 0x4b1   : > { %v3363_v10 = vpop.eup %3362  ;;  %v2535_v28 = vadd.f32 1.0, %v3361_v48  ;;  %3390 = verf.f32 %v4494_v55  ;;  %v2439_v34 = vmul.f32 0.5, %v4511_v35  ;;  %2726 = vmatmul.mubr.f32.gmra.mxu0 %v2556_v41  ;;  %2831 = vmatmul.mubr.f32.gmra.mxu1 %v2558_v59  ;;  %v2560_v40 = vmul.f32 %v2528_v62, %v4564_v38 }
 0x4b2   : > { %v3365_v14 = vpop.eup %3364  ;;  %2730 = vmatprep.mubr.f32.mxu0 %v2561_v37  ;;  %2835 = vmatprep.mubr.f32.mxu1 %v2563_v3  ;;  %v2562_v53 = vmul.f32 %v2530_v39, %v2434_v16  ;;  %v2565_v21 = vmul.f32 %v2533_v2, %v2437_v51  ;;  %v2532_v49 = vadd.f32 1.0, %v3363_v10  ;;  %v2441_v35 = vmul.f32 0.5, %v4539_v17  ;;  %v4842_v3 = vld [vmem:[#allocation28_spill] sm:$0xff]  ;;  %v4843_v2 = vld [vmem:[#allocation29_spill] sm:$0xff] }
 0x4b3   : > { %v3367_v63 = vpop.eup %3366  ;;  %v2567_v31 = vmul.f32 %v2535_v28, %v2439_v34  ;;  %v2534_v54 = vadd.f32 1.0, %v3365_v14  ;;  %v2436_v50 = vmul.f32 0.5, %v4502_v32  ;;  %v2438_v38 = vmul.f32 0.5, %v4505_v18  ;;  %3112 = vmatpush3.msra.mxu0 %v4381_v43  ;;  %v4841_v14 = vld [vmem:[#allocation43_spill] sm:$0xff]  ;;  %v4844_v28 = vld [vmem:[#allocation30_spill] sm:$0xff] }
 0x4b4   : > { %v3369_v7 = vpop.eup %3368  ;;  %v2537_v4 = vadd.f32 1.0, %v3367_v63  ;;  %v2443_v24 = vmul.f32 0.5, %v4542_v26  ;;  %3113 = vmatprep.subr.mxu0 %v4384_v11  ;;  %v2440_v26 = vmul.f32 0.5, %v4524_v52  ;;  %v2445_v5 = vmul.f32 0.5, %v4561_v6 }
 0x4b5   : > { %v3371_v29 = vpop.eup %3370  ;;  %v2539_v12 = vadd.f32 1.0, %v3369_v7  ;;  %2731 = vmatmul.mubr.f32.gmra.mxu0 %v2560_v40  ;;  %2836 = vmatmul.mubr.f32.gmra.mxu1 %v2562_v53  ;;  %v2564_v36 = vmul.f32 %v2532_v49, %v2436_v50  ;;  %v2566_v32 = vmul.f32 %v2534_v54, %v2438_v38  ;;  %v2442_v46 = vmul.f32 0.5, %v4531_v19  ;;  %v4845_v40 = vld [vmem:[#allocation31_spill] sm:$0xff]  ;;  %v4849_v54 = vld [vmem:[#allocation33_spill] sm:$0xff]  ;;  %v4853_v38 = vld [vmem:[#allocation36_spill] sm:$0xff] }
 0x4b6   : > { %v3373_v58 = vpop.eup %3372  ;;  %2735 = vmatprep.mubr.f32.mxu0 %v2565_v21  ;;  %v2569_v0 = vmul.f32 %v2537_v4, %v2441_v35  ;;  %v2536_v15 = vadd.f32 1.0, %v3371_v29  ;;  %2840 = vmatprep.mubr.f32.mxu1 %v2567_v31  ;;  %v2447_v57 = vmul.f32 0.5, %v4567_v56  ;;  %v2444_v41 = vmul.f32 0.5, %v4840_v1  ;;  %v4846_v21 = vld [vmem:[#allocation32_spill] sm:$0xff]  ;;  %v4847_v4 = vld [vmem:[#allocation41_spill] sm:$0xff]  ;;  %v4851_v35 = vld [vmem:[#allocation39_spill] sm:$0xff] }
 0x4b7   : > { %v3375_v55 = vpop.eup %3374  ;;  %v2538_v9 = vadd.f32 1.0, %v3373_v58  ;;  %v2571_v45 = vmul.f32 %v2539_v12, %v2443_v24  ;;  %3114 = vmatpush3.msra.mxu0 %v4387_v42  ;;  %v2449_v62 = vmul.f32 0.5, %v4588_v33  ;;  %v2446_v59 = vmul.f32 0.5, %v4841_v14  ;;  %v4848_v31 = vld [vmem:[#allocation40_spill] sm:$0xff]  ;;  %v4852_v50 = vld [vmem:[#allocation35_spill] sm:$0xff] }
 0x4b8   : > { %v3377_v8 = vpop.eup %3376  ;;  %v2541_v25 = vadd.f32 1.0, %v3375_v55  ;;  %3115 = vmatprep.subr.mxu0 %v4837_v30  ;;  %v2568_v13 = vmul.f32 %v2536_v15, %v2440_v26  ;;  %v2451_v37 = vmul.f32 0.5, %v4592_v27  ;;  %v2448_v29 = vmul.f32 0.5, %v4571_v47  ;;  %v4850_v55 = vld [vmem:[#allocation34_spill] sm:$0xff] }
 0x4b9   : > { %v3379_v44 = vpop.eup %3378  ;;  %v2543_v18 = vadd.f32 1.0, %v3377_v8  ;;  %2736 = vmatmul.mubr.f32.gmra.mxu0 %v2564_v36  ;;  %2841 = vmatmul.mubr.f32.gmra.mxu1 %v2566_v32  ;;  %v2570_v52 = vmul.f32 %v2538_v9, %v2442_v46  ;;  %v2450_v53 = vmul.f32 0.5, %v4579_v60  ;;  %v2518_v58 = vadd.f32 1.0, %v4847_v4 }
 0x4ba   : > { %v3381_v17 = vpop.eup %3380  ;;  %2740 = vmatprep.mubr.f32.mxu0 %v2569_v0  ;;  %v2573_v48 = vmul.f32 %v2541_v25, %v2445_v5  ;;  %3116 = vmatpush3.msra.mxu0 %v4838_v61  ;;  %v2540_v23 = vadd.f32 1.0, %v3379_v44  ;;  %v2423_v49 = vmul.f32 0.5, %v4848_v31  ;;  %v2422_v8 = vmul.f32 0.5, %v4851_v35  ;;  %v4854_v44 = vld [vmem:[#allocation37_spill] sm:$0xff]  ;;  %v4855_v0 = vld [vmem:[#allocation38_spill] sm:$0xff] }
 0x4bb   : > { %v3383_v20 = vpop.eup %3382  ;;  %2845 = vmatprep.mubr.f32.mxu1 %v2571_v45  ;;  %v2575_v6 = vmul.f32 %v2543_v18, %v2447_v57  ;;  %3117 = vmatprep.subr.mxu0 %v4839_v22  ;;  %v2542_v19 = vadd.f32 1.0, %v3381_v17  ;;  %v4657_v18 = vld [vmem:[%s4749_s12] ss:$0 sm:$0xff]  ;;  %v4856_v61 = vld [vmem:[#allocation18_spill] sm:$0xff] }
 0x4bc   : > { %v3385_v43 = vpop.eup %3384  ;;  %3118 = vmatpush3.msra.mxu0 %v4842_v3  ;;  %v2572_v63 = vmul.f32 %v2540_v23, %v2444_v41  ;;  %v2544_v51 = vadd.f32 1.0, %v3383_v20  ;;  %v2550_v24 = vmul.f32 %v2518_v58, %v2422_v8  ;;  %v4857_v41 = vld [vmem:[#allocation19_spill] sm:$0xff]  ;;  %v4860_v8 = vld [vmem:[#allocation22_spill] sm:$0xff] }
 0x4bd   : > { %v3387_v11 = vpop.eup %3386  ;;  %v2545_v42 = vadd.f32 1.0, %v3385_v43  ;;  %2741 = vmatmul.mubr.f32.gmra.mxu0 %v2568_v13  ;;  %2846 = vmatmul.mubr.f32.gmra.mxu1 %v2570_v52  ;;  %v2574_v7 = vmul.f32 %v2542_v19, %v2446_v59 }
 0x4be   : > { %v2547_v10 = vadd.f32 1.0, %v3387_v11  ;;  %v3389_v56 = vpop.eup %3388  ;;  %2745 = vmatprep.mubr.f32.mxu0 %v2573_v48  ;;  %3119 = vmatprep.subr.mxu0 %v4843_v2  ;;  %v2576_v12 = vmul.f32 %v2544_v51, %v2448_v29  ;;  %v4858_v51 = vld [vmem:[#allocation20_spill] sm:$0xff] }
 0x4bf   : > { %v3391_v39 = vpop.eup %3390  ;;  %2850 = vmatprep.mubr.f32.mxu1 %v2575_v6  ;;  %v2577_v16 = vmul.f32 %v2545_v42, %v2449_v62  ;;  %3120 = vmatpush3.msra.mxu0 %v4844_v28  ;;  %v2546_v34 = vadd.f32 1.0, %v3389_v56 }
 0x4c0   : > { %v2579_v33 = vmul.f32 %v2547_v10, %v2451_v37  ;;  %3121 = vmatprep.subr.mxu0 %v4845_v40  ;;  %v2519_v27 = vadd.f32 1.0, %v3391_v39 }
 0x4c1   : > { %2746 = vmatmul.mubr.f32.gmra.mxu0 %v2572_v63  ;;  %2851 = vmatmul.mubr.f32.gmra.mxu1 %v2574_v7  ;;  %v2578_v47 = vmul.f32 %v2546_v34, %v2450_v53 }
 0x4c2   : > { %3122 = vmatpush3.msra.mxu0 %v4846_v21  ;;  %2750 = vmatprep.mubr.f32.mxu0 %v2577_v16  ;;  %v2551_v60 = vmul.f32 %v2519_v27, %v2423_v49  ;;  %v4859_v21 = vld [vmem:[#allocation21_spill] sm:$0xff] }
 0x4c3   : > { %3123 = vmatprep.subr.mxu0 %v4849_v54  ;;  %2855 = vmatprep.mubr.f32.mxu1 %v2579_v33 }
 0x4c4   : > { %3124 = vmatpush3.msra.mxu0 %v4850_v55 }
 0x4c5   : > { %3125 = vmatprep.subr.mxu0 %v4852_v50  ;;  %2751 = vmatmul.mubr.f32.gmra.mxu0 %v2576_v12 }
 0x4c6   : > { %3126 = vmatpush3.msra.mxu0 %v4853_v38  ;;  %2856 = vmatmul.mubr.f32.gmra.mxu1 %v2578_v47 }
 0x4c7   : > { %3127 = vmatprep.subr.mxu0 %v4854_v44  ;;  %2820 = vmatprep.mubr.f32.mxu0 %v2551_v60 }
 0x4c8   : > { %3128 = vmatpush3.msra.mxu0 %v4855_v0 }
 0x4c9   : > { %2821 = vmatmul.mubr.f32.vlgmr.msra.gmra.mxu0 %v2550_v24 }
 0x561   : > { %v4652_v15 = vpop.f32.mrf.mxu0 }
 0x563   : > { %v3074_v9 = vpop.f32.mrf.mxu0 }
 0x564   : > { %v3075_v0 = vadd.f32 %v3074_v9, %v4652_v15  ;;  %v4862_v9 = vld [vmem:[#allocation24_spill] sm:$0xff] }
 0x56d   : > { %v3076_v25 = vpop.f32.mrf.mxu0  ;;  %v3132_v17 = vpop.f32.mrf.mxu1 }
 0x56f   : > { %v3077_v36 = vpop.f32.mrf.mxu0  ;;  %v3133_v32 = vpop.f32.mrf.mxu1 }
 0x570   : > { %v3078_v45 = vadd.f32 %v3077_v36, %v3076_v25  ;;  %v3134_v43 = vadd.f32 %v3133_v32, %v3132_v17 }
 0x571   : > { %v3079_v20 = vpop.f32.mrf.mxu0  ;;  %v3135_v26 = vpop.f32.mrf.mxu1 }
 0x572   : > { %v2723_v5 = vadd.f32 %v3078_v45, %v4657_v18  ;;  %v4861_v45 = vld [vmem:[#allocation23_spill] sm:$0xff] }
 0x573   : > { %v3080_v46 = vpop.f32.mrf.mxu0  ;;  %v3136_v57 = vpop.f32.mrf.mxu1 }
 0x574   : > { %v2828_v11 = vadd.f32 %v3134_v43, %v2723_v5  ;;  %v3081_v30 = vadd.f32 %v3080_v46, %v3079_v20  ;;  %v3137_v23 = vadd.f32 %v3136_v57, %v3135_v26  ;;  %v2718_v46 = vadd.f32 %v3075_v0, %v4657_v18 }
 0x575   : > { %v3082_v13 = vpop.f32.mrf.mxu0  ;;  %v3138_v48 = vpop.f32.mrf.mxu1 }
 0x576   : > { %v2862_v52 = vadd.f32 %v2828_v11, %v4856_v61  ;;  %v2728_v6 = vadd.f32 %v3081_v30, %v4657_v18 }
 0x577   : > { %v3083_v42 = vpop.f32.mrf.mxu0  ;;  %v3139_v22 = vpop.f32.mrf.mxu1 }
 0x578   : > { %2870 = vst [vmem:[%s4664_s23 + $0x8] sm:$0xff] %v2862_v52  ;;  %v2833_v19 = vadd.f32 %v3137_v23, %v2728_v6  ;;  %v3084_v10 = vadd.f32 %v3083_v42, %v3082_v13  ;;  %v3140_v14 = vadd.f32 %v3139_v22, %v3138_v48 }
 0x579   : > { %v3085_v56 = vpop.f32.mrf.mxu0  ;;  %v3141_v1 = vpop.f32.mrf.mxu1 }
 0x57a   : > { %v2863_v62 = vadd.f32 %v2833_v19, %v4857_v41  ;;  %v2733_v39 = vadd.f32 %v3084_v10, %v4657_v18 }
 0x57b   : > { %v3086_v59 = vpop.f32.mrf.mxu0  ;;  %v3142_v37 = vpop.f32.mrf.mxu1 }
 0x57c   : > { %2871 = vst [vmem:[%s4664_s23 + $0x10] sm:$0xff] %v2863_v62  ;;  %v2838_v3 = vadd.f32 %v3140_v14, %v2733_v39  ;;  %v3087_v2 = vadd.f32 %v3086_v59, %v3085_v56  ;;  %v3143_v33 = vadd.f32 %v3142_v37, %v3141_v1 }
 0x57d   : > { %v3088_v63 = vpop.f32.mrf.mxu0  ;;  %v3144_v16 = vpop.f32.mrf.mxu1 }
 0x57e   : > { %v2864_v28 = vadd.f32 %v2838_v3, %v4858_v51  ;;  %v2738_v7 = vadd.f32 %v3087_v2, %v4657_v18 }
 0x57f   : > { %v3089_v34 = vpop.f32.mrf.mxu0  ;;  %v3145_v29 = vpop.f32.mrf.mxu1 }
 0x580   : > { %2872 = vst [vmem:[%s4664_s23 + $0x18] sm:$0xff] %v2864_v28  ;;  %v2843_v40 = vadd.f32 %v3143_v33, %v2738_v7  ;;  %v3090_v27 = vadd.f32 %v3089_v34, %v3088_v63  ;;  %v3146_v31 = vadd.f32 %v3145_v29, %v3144_v16 }
 0x581   : > { %v3091_v53 = vpop.f32.mrf.mxu0  ;;  %v3147_v49 = vpop.f32.mrf.mxu1 }
 0x582   : > { %v2865_v4 = vadd.f32 %v2843_v40, %v4859_v21  ;;  %v2743_v58 = vadd.f32 %v3090_v27, %v4657_v18 }
 0x583   : > { %v3092_v54 = vpop.f32.mrf.mxu0  ;;  %v3148_v47 = vpop.f32.mrf.mxu1 }
 0x584   : > { %2873 = vst [vmem:[%s4664_s23 + $0x20] sm:$0xff] %v2865_v4  ;;  %v2848_v12 = vadd.f32 %v3146_v31, %v2743_v58  ;;  %v3093_v55 = vadd.f32 %v3092_v54, %v3091_v53  ;;  %v3149_v38 = vadd.f32 %v3148_v47, %v3147_v49 }
 0x585   : > { %v3094_v35 = vpop.f32.mrf.mxu0 }
 0x586   : > { %v2866_v50 = vadd.f32 %v2848_v12, %v4860_v8  ;;  %v2748_v60 = vadd.f32 %v3093_v55, %v4657_v18  ;;  %v3150_v24 = vpop.f32.mrf.mxu1 }
 0x587   : > { %v3095_v44 = vpop.f32.mrf.mxu0 }
 0x588   : > { %2874 = vst [vmem:[%s4664_s23 + $0x28] sm:$0xff] %v2866_v50  ;;  %v2853_v25 = vadd.f32 %v3149_v38, %v2748_v60  ;;  %v3096_v17 = vadd.f32 %v3095_v44, %v3094_v35  ;;  %v3151_v36 = vpop.f32.mrf.mxu1 }
 0x589   : > { %v3129_v32 = vpop.f32.mrf.mxu0  ;;  %v3152_v5 = vadd.f32 %v3151_v36, %v3150_v24 }
 0x58a   : > { %v2867_v20 = vadd.f32 %v2853_v25, %v4861_v45  ;;  %v2753_v26 = vadd.f32 %v3096_v17, %v4657_v18  ;;  %v4863_v18 = vld [vmem:[#allocation17_spill] sm:$0xff] }
 0x58b   : > { %v3130_v43 = vpop.f32.mrf.mxu0 }
 0x58c   : > { %2875 = vst [vmem:[%s4664_s23 + $0x30] sm:$0xff] %v2867_v20  ;;  %v2858_v57 = vadd.f32 %v3152_v5, %v2753_v26  ;;  %v3131_v15 = vadd.f32 %v3130_v43, %v3129_v32 }
 0x58e   : > { %v2868_v11 = vadd.f32 %v2858_v57, %v4862_v9  ;;  %v2823_v30 = vadd.f32 %v3131_v15, %v2718_v46 }
 0x590   : > { %2876 = vst [vmem:[%s4664_s23 + $0x38] sm:$0xff] %v2868_v11  ;;  %v2861_v13 = vadd.f32 %v2823_v30, %v4863_v18 }
 0x592   : > { %2869 = vst [vmem:[%s4664_s23] sm:$0xff] %v2861_v13 }
 0x593   : > { %3493 = shalt.err (!%p3490_p9)
}
 0x594   : > { %s3494_s15 = scalar_lea.hbm %s4690_s18, 1024  ;;  %s3498_s21 = scalar_lea.hbm %s4750_s13, 4096 }
 0x595   : > { %p3495_p12 = scmp.ne.s32.totalorder %s4690_s18, %s3494_s15  ;;  %p3499_p4 = scmp.lt.s32.totalorder %s4690_s18, %s4750_s13 }
 0x596   : > { %p3500_p8 = scmp.lt.s32.totalorder %s3498_s21, %s3494_s15 }
 0x597   : > { %p3496_p3 = pnand %p3495_p12, %p4864_p0 }
 0x598   : > { %p3501_p7 = por %p3500_p8, %p3499_p4 }
 0x599   : > { %p3497_p13 = pneg %p3496_p3 }
 0x59b   : > { %p3502_p10 = pnand %p3501_p7, %p3497_p13 }
 0x59d   : > { %3505 = shalt.err (!%p3502_p10)
}
 0x59e   : > { %s3562_s14 = smov 128   ;;  %s3563_s16 = smov 8  }
 0x59f   : > { %3195 = dma.vmem_to_hbm [thread:$0]  (%p4864_p0), %s4692_s9, 1024, %s4690_s18, %s2878_s11, %s3562_s14, %s3562_s14, %s3563_s16  }
 0x5a0 PF: > { %s4865_s29 = sld [smem:[#allocation12_spill]]  ;;  %p3217_p1 = scmp.ge.s32.totalorder %s3548_s28, 2 }
 0x5a1   : > { %s4866_s20 = sld [smem:[#allocation14_spill]] }
 0x5a6   : > { %s2907_s24 = sand.u32 1, %s4865_s29  }
 0x5a7   : > { %p4867_p2 = scmp.ne.s32.totalorder %s4866_s20, 0  ;;  %s2908_s17 = scalar_lea.sflag [#allocation4], %s2907_s24 }
 0x5a9   : > { %p3209_p6 = pnand %p3217_p1, %p4867_p2 }
 0x5ab   : > { %p3210_p11 = pneg %p3209_p6 }
 0x5ad   : > { %3531 = dma.done.wait (%p3210_p11), %s2908_s17, 1024  }
 0x5ae   : > { %3533 = vsyncadd (%p3210_p11), %s2908_s17, 4294966272  ;;  %s4868_s28 = sld [smem:[#allocation15_spill]]  ;;  %s4871_s25 = smov %s3540_s26 }
 0x5af   : > { %s4869_s15 = sld [smem:[#allocation13_spill]] }
 0x5b0   : > { %s4870_s27 = sld [smem:[#allocation16_spill]] }
 0x5b4   : > { %p27_p5 = scmp.ge.s32.totalorder %s4868_s28, 6  }
 0x5b5   : > { %s4872_s26 = smov %s4869_s15 }
 0x5b6   :  { %29 = sbr.rel (!%p27_p5) target bundleno = 9 (0x9), region = 125 }
 0x5bb   :  { %2913 = vsyncpa [#allocation3], 1 }
 0x5bc   :  { %2915 = vsyncpa [#allocation3 + $0x1], 1 }
 0x5bd   :  { %2916 = vsyncpa [#allocation6], 1 }
 0x5be   :  { %2917 = vsyncpa [#allocation4], 1 }
 0x5bf   :  { %2919 = vsyncpa [#allocation4 + $0x1], 1 }

// kernel: tpu_custom_call.1
= control target key start
LH: loop header
LB: loop body
LE: loop exit
PB: predicated region body
PF: predicated region fallthrough
CT: control target
= control target key end

     0   :  { %s4737_s0 = inlined_call_operand.hbm [shape: f32[8,32,128], index: 0, kind: input, shape index: {}]   ;;  %s4738_s1 = inlined_call_operand.vmem [shape: f32[1,128], index: 1, kind: input, shape index: {}]   ;;  %s4739_s2 = inlined_call_operand.vmem [shape: f32[1,128], index: 2, kind: input, shape index: {}]   ;;  %s4740_s3 = inlined_call_operand.vmem [shape: f32[64,32], index: 3, kind: input, shape index: {}]   ;;  %s4741_s4 = inlined_call_operand.vmem [shape: f32[64,1], index: 4, kind: input, shape index: {}]   ;;  %s4742_s5 = inlined_call_operand.vmem [shape: f32[32,64], index: 5, kind: input, shape index: {}]   ;;  %s4743_s6 = inlined_call_operand.vmem [shape: f32[32,1], index: 6, kind: input, shape index: {}]   ;;  %s4744_s7 = inlined_call_operand.vmem [shape: f32[1,128], index: 7, kind: input, shape index: {}]   ;;  %s4745_s8 = inlined_call_operand.vmem [shape: f32[1,128], index: 8, kind: input, shape index: {}]   ;;  %s4746_s9 = inlined_call_operand.hbm [shape: f32[128,512], index: 9, kind: input, shape index: {}]   ;;  %s4747_s10 = inlined_call_operand.vmem [shape: f32[1,512], index: 10, kind: input, shape index: {}]   ;;  %s4748_s11 = inlined_call_operand.hbm [shape: f32[512,128], index: 11, kind: input, shape index: {}]   ;;  %s4749_s12 = inlined_call_operand.vmem [shape: f32[1,128], index: 12, kind: input, shape index: {}]   ;;  %s4750_s13 = inlined_call_operand.hbm [shape: f32[8,32,128], index: 13, kind: output, shape index: {}]  }
   0x1   :  { %4788 = sst [smem:[#allocation44_spill]] %s4746_s9 }
   0x2   :  { %4789 = sst [smem:[#allocation45_spill]] %s4748_s11 }
   0x3   :  { %18 = vsyncpa [#allocation3], 0 }
   0x4   :  { %20 = vsyncpa [#allocation3 + $0x1], 0 }
   0x5   :  { %21 = vsyncpa [#allocation6], 0 }
   0x6   :  { %22 = vsyncpa [#allocation4], 0 }
   0x7   :  { %24 = vsyncpa [#allocation4 + $0x1], 0  ;;  %s3634_s25 = smov 0   ;;  %s3636_s26 = smov 0  }
   0x8   :  { %s3638_s27 = smov 0   ;;  %s3640_s28 = smov 0  }
   0x9 LB: > { %4790 = sst [smem:[#allocation12_spill]] %s3536_s25  ;;  %s3655_s29 = sadd.s32 4294967295, %s3548_s28   ;;  %s3548_s28 = sphi %s3640_s28, %s4868_s28   ;;  %s3544_s27 = sphi %s3638_s27, %s4870_s27   ;;  %s3540_s26 = sphi %s3636_s26, %s4872_s26   ;;  %s3536_s25 = sphi %s3634_s25, %s4871_s25  }
   0xa   : > { %4791 = sst [smem:[#allocation13_spill]] %s3544_s27  ;;  %s2984_s30 = sadd.s32 4294967294, %s3548_s28  }
   0xb   : > { %p50_p0 = scmp.ne.s32.totalorder %s3540_s26, %s3536_s25  ;;  %p4751_p1 = scmp.eq.s32.totalorder %s3655_s29, 0 }
   0xc   : > { %p332_p3 = scmp.eq.s32.totalorder %s2984_s30, 3  ;;  %p2985_p5 = scmp.ge.s32.totalorder %s3548_s28, 1 }
   0xd   : > { %p3664_p4 = por %p4751_p1, %p50_p0  ;;  %p339_p7 = scmp.lt.s32.totalorder %s3548_s28, 5 }
   0xe   : > { %p3669_p6 = por %p332_p3, %p50_p0  ;;  %s3550_s17 = smov [#allocation5]  }
   0xf   : > { %s4792_s14 = scalar_select %p3664_p4, 1, 0 }
  0x10   : > { %s4793_s15 = scalar_select %p3669_p6, 1, 0 }
  0x11   : > { %p3674_p8 = pnand %p2985_p5, %p339_p7  ;;  %s375_s18 = sshll.u32 %s3550_s17, 4  ;;  %s376_s18 = int_to_ptr.vmem [resolvable:$true] %s375_s18 }
  0x12   : > { %4794 = sst [smem:[#allocation14_spill]] %s4793_s15  ;;  %s3551_s20 = smov [#allocation7]  }
  0x13   : > { %s4795_s16 = scalar_select %p3674_p8, 1, 0 }
  0x14   : > { %p3197_p9 = pneg %p3674_p8  ;;  %s391_s21 = sshll.u32 %s3551_s20, 4  ;;  %s392_s21 = int_to_ptr.vmem [resolvable:$true] %s391_s21 }
  0x15   : > { %s3411_s22 = scalar_lea.vmem %s376_s18, 8192  ;;  %p3419_p3 = scmp.lt.s32.totalorder %s376_s18, %s376_s18 }
  0x16   : > { %p3682_p10 = pnand %p3197_p9, %p4751_p1  ;;  %p3412_p12 = scmp.ne.s32.totalorder %s376_s18, %s3411_s22 }
  0x17   : > { %p3420_p5 = scmp.lt.s32.totalorder %s3411_s22, %s3411_s22 }
  0x18   : > { %p3402_p11 = pneg %p3682_p10 }
  0x19   : > { %p3421_p7 = por %p3420_p5, %p3419_p3 }
  0x1a   : > { %p3414_p13 = pnand %p3412_p12, %p3402_p11 }
  0x1c   : > { %p3415_p0 = pneg %p3414_p13 }
  0x1e   : > { %p3422_p9 = pnand %p3421_p7, %p3415_p0 }
  0x20   : > { %3425 = shalt.err (!%p3422_p9)
}
  0x21   : > { %s3552_s23 = smov 512   ;;  %s3553_s24 = smov 32  }
  0x22   : > { %s4797_s9 = sld [smem:[#allocation44_spill]]  ;;  %s3437_s20 = scalar_lea.vmem %s392_s21, 8192 }
  0x23   : > { %p3438_p1 = scmp.ne.s32.totalorder %s392_s21, %s3437_s20  ;;  %p3445_p2 = scmp.lt.s32.totalorder %s392_s21, %s392_s21 }
  0x24   : > { %p3446_p6 = scmp.lt.s32.totalorder %s3437_s20, %s3437_s20 }
  0x25   : > { %p3440_p12 = pnand %p3438_p1, %p3402_p11 }
  0x26   : > { %p3447_p3 = por %p3446_p6, %p3445_p2 }
  0x27   : > { %p3441_p13 = pneg %p3440_p12 }
  0x28   : > { %3200 = dma.hbm_to_vmem [thread:$0]  (!%p3682_p10), %s4797_s9, 8192, %s376_s18, [#allocation6], %s3552_s23, %s3552_s23, %s3553_s24  }
  0x29   : > { %p3448_p0 = pnand %p3447_p3, %p3441_p13 }
  0x2b   : > { %3451 = shalt.err (!%p3448_p0)
}
  0x2c   : > { %s4753_s22 = smov 128   ;;  %s4754_s18 = smov 8  }
  0x2d   : > { %s4798_s11 = sld [smem:[#allocation45_spill]]  ;;  %s3708_s30 = sadd.s32 1, %s3548_s28  }
  0x2e   : > { %4799 = sst [smem:[#allocation15_spill]] %s3708_s30  ;;  %s34_s17 = ssub.s32 %s3548_s28, %s3708_s30 }
  0x2f   : > { %p35_p1 = scmp.eq.s32.totalorder %s34_s17, 0  ;;  %s37_s20 = sadd.s32 1, %s3544_s27 }
  0x30   : > { %p44_p2 = scmp.ne.s32.totalorder %s3544_s27, %s3540_s26  ;;  %p45_p6 = scmp.eq.s32.totalorder %s3548_s28, 0 }
  0x31   : > { %s3717_s9 = scalar_select %p35_p1, %s3544_s27, %s37_s20  }
  0x32   : > { %p46_p11 = por %p45_p6, %p44_p2  ;;  %p4801_p5 = scmp.eq.s32.totalorder %s3655_s29, 3 }
  0x33   : > { %3203 = dma.hbm_to_vmem [thread:$0]  (!%p3682_p10), %s4798_s11, 8192, %s392_s21, [#allocation6], %s4753_s22, %s4753_s22, %s4754_s18  }
  0x34   : > { %4800 = sst [smem:[#allocation16_spill]] %s3717_s9  ;;  %p3721_p7 = por %p4801_p5, %p44_p2 }
  0x35   : > { %p3214_p9 = scmp.lt.s32.totalorder %s3548_s28, 4  ;;  %s408_s15 = sand.u32 1, %s3544_s27  }
  0x36   : > { %s4802_s19 = scalar_select %p3721_p7, 1, 0 }
  0x37   : > { %s2989_s23 = sshll.u32 %s408_s15, 6  ;;  %s3038_s21 = sshll.u32 %s3548_s28, 10 }
  0x38   : > { %s3731_s18 = scalar_lea.hbm %s4737_s0, %s3038_s21  ;;  %s412_s17 = scalar_lea.vmem [#allocation2], %s2989_s23 }
  0x39   : > { %s420_s20 = sshll.u32 %s412_s17, 4  ;;  %p3735_p10 = pnand %p3214_p9, %p46_p11  ;;  %s3733_s20 = int_to_ptr.vmem [resolvable:$true] %s420_s20 }
  0x3a   : > { %s3739_s9 = scalar_lea.sflag [#allocation3], %s408_s15  ;;  %s3452_s27 = scalar_lea.hbm %s3731_s18, 1024 }
  0x3b   : > { %p3453_p12 = scmp.ne.s32.totalorder %s3731_s18, %s3452_s27  ;;  %p3454_p13 = pneg %p3735_p10 }
  0x3c   : > { %s3457_s23 = scalar_lea.hbm %s4737_s0, 4096  ;;  %p3458_p1 = scmp.lt.s32.totalorder %s3731_s18, %s4737_s0 }
  0x3d   : > { %p3455_p3 = pnand %p3454_p13, %p3453_p12  ;;  %p3459_p2 = scmp.lt.s32.totalorder %s3457_s23, %s3452_s27 }
  0x3f   : > { %p3456_p0 = pneg %p3455_p3  ;;  %p3460_p6 = por %p3459_p2, %p3458_p1 }
  0x41   : > { %p3461_p11 = pnand %p3460_p6, %p3456_p0 }
  0x43   : > { %3464 = shalt.err (!%p3461_p11)
}
  0x44   : > { %s3465_s15 = scalar_lea.vmem %s3733_s20, 1024  ;;  %s3556_s30 = smov [#allocation2]  }
  0x45   : > { %p3466_p5 = scmp.ne.s32.totalorder %s3733_s20, %s3465_s15  ;;  %s3470_s25 = sshll.u32 %s3556_s30, 4  ;;  %s3471_s25 = int_to_ptr.vmem [resolvable:$false] %s3470_s25 }
  0x46   : > { %s3472_s22 = scalar_lea.vmem %s3471_s25, 2048  ;;  %p3473_p3 = scmp.lt.s32.totalorder %s3733_s20, %s3471_s25 }
  0x47   : > { %p3468_p9 = pnand %p3466_p5, %p3454_p13  ;;  %p3474_p7 = scmp.lt.s32.totalorder %s3472_s22, %s3465_s15 }
  0x49   : > { %p3469_p12 = pneg %p3468_p9  ;;  %p3475_p4 = por %p3474_p7, %p3473_p3 }
  0x4b   : > { %p3476_p8 = pnand %p3475_p4, %p3469_p12 }
  0x4d   : > { %3479 = shalt.err (!%p3476_p8)
}
  0x4e   : > { %s4804_s27 = smov 8   ;;  %s4805_s21 = smov 128  }
  0x4f   : > { %3207 = dma.hbm_to_vmem [thread:$0]  (!%p3735_p10), %s3731_s18, 1024, %s3733_s20, %s3739_s9, %s4805_s21, %s4805_s21, %s4804_s27  }
  0x50   : > { %p4806_p13 = scmp.ne.s32.totalorder %s4795_s16, 0 }
  0x52   : > { %432 = sbr.rel (%p4806_p13) target bundleno = 1440 (0x5a0), region = 72 }
  0x57   : > { %s3766_s30 = sand.u32 1, %s3540_s26   ;;  %p4807_p4 = scmp.ne.s32.totalorder %s4792_s14, 0 }
  0x58   : > { %s2994_s25 = sshll.u32 %s3766_s30, 6  ;;  %s435_s23 = scalar_lea.sflag [#allocation3], %s3766_s30 }
  0x59   : > { %s3772_s11 = scalar_lea.vmem [#allocation2], %s2994_s25 }
  0x5a   : > { %3523 = dma.done.wait (%p4807_p4), %s435_s23, 1024  }
  0x5b   : > { %3525 = vsyncadd (%p4807_p4), %s435_s23, 4294966272  ;;  %p4808_p8 = scmp.eq.s32.totalorder %s3655_s29, 0 }
  0x5d   : > { %3527 = dma.done.wait (%p4808_p8), [#allocation6], 16384   ;;  %p4809_p7 = pmov %p4808_p8 }
  0x5e   : > { %v3783_v0 = vld [vmem:[%s3772_s11 + $0x18] sm:$0xff]  ;;  %v3786_v1 = vld [vmem:[%s3772_s11 + $0x10] sm:$0xff]  ;;  %v3803_v6 = vld [vmem:[%s3772_s11 + $0x28] sm:$0xff]  ;;  %v3557_v16 = vmov 0.0   ;;  %v3558_v18 = vmov 0   ;;  %vm1154_vm0 = vcmask 261120  }
  0x5f   : > { %3529 = vsyncadd (%p4809_p7), [#allocation6], 4294950912  ;;  %507 = vadd.xlane.f32.xlu0 %v3783_v0  ;;  %505 = vadd.xlane.f32.xlu1 %v3786_v1  ;;  %v3791_v2 = vld [vmem:[%s3772_s11 + $0x38] sm:$0xff]  ;;  %v3794_v3 = vld [vmem:[%s3772_s11 + $0x30] sm:$0xff]  ;;  %v529_v4 = vmul.f32 %v3783_v0, %v3783_v0  ;;  %v528_v9 = vmul.f32 %v3786_v1, %v3786_v1  ;;  %v531_v12 = vmul.f32 %v3803_v6, %v3803_v6  ;;  %vm1400_vm1 = vcmask 523264   ;;  %s4664_s23 = scalar_lea.vmem [#allocation8], %s2994_s25 }
  0x60   : > { %v533_v5 = vmul.f32 %v3791_v2, %v3791_v2  ;;  %v3806_v7 = vld [vmem:[%s3772_s11 + $0x8] sm:$0xff]  ;;  %v532_v8 = vmul.f32 %v3794_v3, %v3794_v3  ;;  %v3815_v10 = vld [vmem:[%s3772_s11 + $0x20] sm:$0xff]  ;;  %1243 = vmatprep.mubr.f32.mxu0 %v3557_v16  ;;  %1477 = vmatprep.mubr.f32.mxu1 %v3557_v16  ;;  %v1112_v17 = vld [vmem:[%s4741_s4 + $0x30] sm:$0xff]  ;;  %s3040_s25 = sshll.u32 %s3655_s29, 10  ;;  %s2892_s9 = sshll.u32 %s4664_s23, 4  ;;  %s4692_s9 = int_to_ptr.vmem [resolvable:$true] %s2892_s9 }
  0x61   : > { %v3818_v11 = vld [vmem:[%s3772_s11] sm:$0xff]  ;;  %v527_v13 = vmul.f32 %v3806_v7, %v3806_v7  ;;  %v530_v14 = vmul.f32 %v3815_v10, %v3815_v10  ;;  %3263 = vset.pattern.permute.xlu1 %v3558_v18  ;;  %3262 = vset.pattern.permute.xlu0 %v3558_v18  ;;  %v1111_v19 = vld [vmem:[%s4741_s4 + $0x28] sm:$0xff]  ;;  %v1113_v20 = vld [vmem:[%s4741_s4 + $0x38] sm:$0xff]  ;;  %s4690_s18 = scalar_lea.hbm %s4750_s13, %s3040_s25  ;;  %s3480_s29 = scalar_lea.vmem %s4692_s9, 1024 }
  0x62   : > { %v526_v15 = vmul.f32 %v3818_v11, %v3818_v11  ;;  %v1377_v21 = vld [vmem:[%s4743_s6 + $0x8] sm:$0xff]  ;;  %v1110_v22 = vld [vmem:[%s4741_s4 + $0x20] sm:$0xff]  ;;  %v1379_v23 = vld [vmem:[%s4743_s6 + $0x18] sm:$0xff]  ;;  %p3481_p10 = scmp.ne.s32.totalorder %s4692_s9, %s3480_s29  ;;  %p4864_p0 = scmp.ne.s32.totalorder %s4802_s19, 0 }
  0x63   : > { %515 = vadd.xlane.f32.xlu0 %v3791_v2  ;;  %513 = vadd.xlane.f32.xlu1 %v3794_v3  ;;  %v1109_v24 = vld [vmem:[%s4741_s4 + $0x18] sm:$0xff]  ;;  %v1108_v25 = vld [vmem:[%s4741_s4 + $0x10] sm:$0xff]  ;;  %v1107_v26 = vld [vmem:[%s4741_s4 + $0x8] sm:$0xff]  ;;  %s3561_s20 = smov [#allocation8]  }
  0x64   : > { %v1106_v29 = vld [vmem:[%s4741_s4] sm:$0xff]  ;;  %v1378_v43 = vld [vmem:[%s4743_s6 + $0x10] sm:$0xff]  ;;  %p3482_p1 = pnand %p3481_p10, %p4864_p0  ;;  %s3484_s24 = sshll.u32 %s3561_s20, 4  ;;  %s3485_s24 = int_to_ptr.vmem [resolvable:$false] %s3484_s24 }
  0x65   : > { %v1376_v34 = vld [vmem:[%s4743_s6] sm:$0xff]  ;;  %s3486_s17 = scalar_lea.vmem %s3485_s24, 2048  ;;  %p3487_p6 = scmp.lt.s32.totalorder %s4692_s9, %s3485_s24 }
  0x66   : > { %p3483_p2 = pneg %p3482_p1  ;;  %p3488_p11 = scmp.lt.s32.totalorder %s3486_s17, %s3480_s29 }
  0x67   : > { %540 = vadd.xlane.f32.xlu0 %v529_v4  ;;  %548 = vadd.xlane.f32.xlu1 %v533_v5  ;;  %v3559_v4 = vmov 1983009808  }
  0x68   : > { %v636_v5 = vunpack.c.l.s4 %v3559_v4  ;;  %p3489_p5 = por %p3488_p11, %p3487_p6 }
  0x6a   : > { %p3490_p9 = pnand %p3489_p5, %p3483_p2 }
  0x6b   : > { %511 = vadd.xlane.f32.xlu1 %v3803_v6  ;;  %503 = vadd.xlane.f32.xlu0 %v3806_v7 }
  0x6f   : > { %546 = vadd.xlane.f32.xlu1 %v532_v8  ;;  %538 = vadd.xlane.f32.xlu0 %v528_v9  ;;  %v638_v8 = vlaneseq }
  0x73   : > { %509 = vadd.xlane.f32.xlu1 %v3815_v10  ;;  %501 = vadd.xlane.f32.xlu0 %v3818_v11 }
  0x77   : > { %544 = vadd.xlane.f32.xlu1 %v531_v12  ;;  %536 = vadd.xlane.f32.xlu0 %v527_v13 }
  0x7b   : > { %542 = vadd.xlane.f32.xlu1 %v530_v14  ;;  %534 = vadd.xlane.f32.xlu0 %v526_v15 }
  0x8c   : > { %1146 = vperm.xlu1 %3263, %v1112_v17  }
  0x90   : > { %1141 = vperm.xlu1 %3263, %v1111_v19  }
  0x91   : > { %1151 = vperm.xlu0 %3262, %v1113_v20   ;;  %v637_v20 = vunpack.c.0.s8 %v636_v5 }
  0x94   : > { %1136 = vperm.xlu1 %3263, %v1110_v22  }
  0x95   : > { %1387 = vperm.xlu0 %3262, %v1377_v21   ;;  %v3560_v21 = vmov 1934713408  }
  0x96   : > { %v667_v22 = vunpack.c.l.s4 %v3560_v21 }
  0x98   : > { %1131 = vperm.xlu1 %3263, %v1109_v24  }
  0x99   : > { %1397 = vperm.xlu0 %3262, %v1379_v23  }
  0x9c   : > { %1126 = vperm.xlu1 %3263, %v1108_v25  }
  0xa0   : > { %1121 = vperm.xlu1 %3263, %v1107_v26   ;;  %v3898_v26 = vshrl.u32 %v638_v8, 7 }
  0xa4   : > { %1116 = vperm.xlu1 %3263, %v1106_v29   ;;  %v3905_v29 = vld [vmem:[%s4738_s1] ss:$0 sm:$0xff] }
  0xa8   : > { %1382 = vperm.xlu1 %3263, %v1376_v34  }
  0xac   : > { %1392 = vperm.xlu1 %3263, %v1378_v43   ;;  %v3918_v43 = vsub.s32 %v637_v20, %v3898_v26 }
  0xe8   : > { %v508_v27 = vpop.xlane.xlu0 %507  ;;  %v506_v28 = vpop.xlane.xlu1 %505 }
  0xe9   : > { %v3862_v32 = vmul.f32 0.0078125, %v508_v27  ;;  %v3876_v46 = vmul.f32 0.0078125, %v506_v28 }
  0xeb   : > { %v561_v37 = vmul.f32 %v3862_v32, %v3862_v32  ;;  %v560_v52 = vmul.f32 %v3876_v46, %v3876_v46  ;;  %v577_v23 = vsub.f32 %v3783_v0, %v3862_v32 }
  0xec   : > { %v516_v30 = vpop.xlane.xlu0 %515  ;;  %v514_v31 = vpop.xlane.xlu1 %513 }
  0xed   : > { %v3864_v33 = vmul.f32 0.0078125, %v516_v30  ;;  %v3878_v47 = vmul.f32 0.0078125, %v514_v31 }
  0xef   : > { %v565_v38 = vmul.f32 %v3864_v33, %v3864_v33  ;;  %v564_v53 = vmul.f32 %v3878_v47, %v3878_v47  ;;  %v581_v28 = vsub.f32 %v3791_v2, %v3864_v33  ;;  %v3914_v33 = vld [vmem:[%s4739_s2] ss:$0 sm:$0xff] }
  0xf0   : > { %v541_v35 = vpop.xlane.xlu0 %540  ;;  %v549_v36 = vpop.xlane.xlu1 %548 }
  0xf1   : > { %v553_v39 = vmul.f32 0.0078125, %v541_v35  ;;  %v557_v40 = vmul.f32 0.0078125, %v549_v36 }
  0xf3   : > { %v569_v41 = vsub.f32 %v553_v39, %v561_v37  ;;  %v573_v42 = vsub.f32 %v557_v40, %v565_v38  ;;  %v668_v40 = vunpack.c.0.s8 %v667_v22 }
  0xf4   : > { %v512_v44 = vpop.xlane.xlu1 %511  ;;  %v504_v45 = vpop.xlane.xlu0 %503 }
  0xf5   : > { %v585_v48 = vadd.f32 1e-05, %v569_v41  ;;  %v589_v49 = vadd.f32 1e-05, %v573_v42  ;;  %v3884_v60 = vmul.f32 0.0078125, %v512_v44  ;;  %v3886_v61 = vmul.f32 0.0078125, %v504_v45 }
  0xf7   : > { %3264 = vrsqrt.f32 %v585_v48  ;;  %v563_v14 = vmul.f32 %v3884_v60, %v3884_v60  ;;  %v559_v15 = vmul.f32 %v3886_v61, %v3886_v61 }
  0xf8   : > { %3266 = vrsqrt.f32 %v589_v49  ;;  %v547_v50 = vpop.xlane.xlu1 %546  ;;  %v539_v51 = vpop.xlane.xlu0 %538 }
  0xf9   : > { %v556_v54 = vmul.f32 0.0078125, %v547_v50  ;;  %v552_v55 = vmul.f32 0.0078125, %v539_v51 }
  0xfb   : > { %v572_v56 = vsub.f32 %v556_v54, %v564_v53  ;;  %v568_v57 = vsub.f32 %v552_v55, %v560_v52  ;;  %v3924_v52 = vsub.s32 %v668_v40, %v3898_v26  ;;  %v580_v53 = vsub.f32 %v3794_v3, %v3878_v47 }
  0xfc   : > { %v510_v58 = vpop.xlane.xlu1 %509  ;;  %v502_v59 = vpop.xlane.xlu0 %501 }
  0xfd   : > { %v588_v62 = vadd.f32 1e-05, %v572_v56  ;;  %v584_v63 = vadd.f32 1e-05, %v568_v57  ;;  %v3888_v9 = vmul.f32 0.0078125, %v510_v58  ;;  %v3894_v19 = vmul.f32 0.0078125, %v502_v59 }
  0xfe   : > { %v576_v57 = vsub.f32 %v3786_v1, %v3876_v46 }
  0xff   : > { %3268 = vrsqrt.f32 %v588_v62  ;;  %v562_v30 = vmul.f32 %v3888_v9, %v3888_v9  ;;  %v558_v39 = vmul.f32 %v3894_v19, %v3894_v19 }
 0x100   : > { %3270 = vrsqrt.f32 %v584_v63  ;;  %v545_v12 = vpop.xlane.xlu1 %544  ;;  %v537_v13 = vpop.xlane.xlu0 %536 }
 0x101   : > { %v555_v17 = vmul.f32 0.0078125, %v545_v12  ;;  %v551_v18 = vmul.f32 0.0078125, %v537_v13  ;;  %v579_v12 = vsub.f32 %v3803_v6, %v3884_v60 }
 0x103   : > { %v571_v24 = vsub.f32 %v555_v17, %v563_v14  ;;  %v567_v25 = vsub.f32 %v551_v18, %v559_v15  ;;  %v575_v17 = vsub.f32 %v3806_v7, %v3886_v61  ;;  %v578_v18 = vsub.f32 %v3815_v10, %v3888_v9 }
 0x104   : > { %v3265_v27 = vpop.eup %3264  ;;  %v543_v31 = vpop.xlane.xlu1 %542 }
 0x105   : > { %v535_v34 = vpop.xlane.xlu0 %534  ;;  %v3267_v35 = vpop.eup %3266  ;;  %v601_v0 = vmul.f32 %v3265_v27, %v577_v23  ;;  %v587_v32 = vadd.f32 1e-05, %v571_v24  ;;  %v583_v36 = vadd.f32 1e-05, %v567_v25  ;;  %v554_v37 = vmul.f32 0.0078125, %v543_v31 }
 0x106   : > { %v605_v38 = vmul.f32 %v3267_v35, %v581_v28  ;;  %v550_v2 = vmul.f32 0.0078125, %v535_v34  ;;  %v574_v24 = vsub.f32 %v3818_v11, %v3894_v19 }
 0x107   : > { %3272 = vrsqrt.f32 %v587_v32  ;;  %v570_v41 = vsub.f32 %v554_v37, %v562_v30  ;;  %v615_v42 = vmul.f32 %v3905_v29, %v601_v0 }
 0x108   : > { %3274 = vrsqrt.f32 %v583_v36  ;;  %v566_v44 = vsub.f32 %v550_v2, %v558_v39  ;;  %v619_v45 = vmul.f32 %v3905_v29, %v605_v38 }
 0x109   : > { %v586_v48 = vadd.f32 1e-05, %v570_v41  ;;  %v629_v49 = vadd.f32 %v3914_v33, %v615_v42 }
 0x10a   : > { %v582_v50 = vadd.f32 1e-05, %v566_v44  ;;  %v633_v51 = vadd.f32 %v3914_v33, %v619_v45 }
 0x10b   : > { %3276 = vrsqrt.f32 %v586_v48  ;;  %v832_v54 = vcombine.high %v629_v49, %v3557_v16  ;;  %v839_v55 = vrot.slane %v629_v49, %v3918_v43 }
 0x10c   : > { %v3269_v56 = vpop.eup %3268  ;;  %3278 = vrsqrt.f32 %v582_v50  ;;  %v847_v58 = vcombine.high %v633_v51, %v3557_v16  ;;  %v854_v59 = vrot.slane %v633_v51, %v3918_v43 }
 0x10d   : > { %v3271_v62 = vpop.eup %3270  ;;  %v604_v63 = vmul.f32 %v3269_v56, %v580_v53  ;;  %v846_v4 = vrot.slane %v832_v54, %v3918_v43 }
 0x10e   : > { %v600_v5 = vmul.f32 %v3271_v62, %v576_v57  ;;  %v861_v3 = vrot.slane %v847_v58, %v3918_v43  ;;  %v862_v47 = vcombine.low %v839_v55, %v854_v59  ;;  %v863_v8 = vcombine.high %v839_v55, %v854_v59 }
 0x10f   : > { %v618_v13 = vmul.f32 %v3905_v29, %v604_v63 }
 0x110   : > { %v614_v1 = vmul.f32 %v3905_v29, %v600_v5  ;;  %v870_v46 = vrot.slane %v862_v47, %v3924_v52  ;;  %v877_v14 = vrot.slane %v863_v8, %v3924_v52  ;;  %v878_v15 = vcombine.low %v846_v4, %v861_v3 }
 0x111   : > { %v879_v20 = vcombine.high %v846_v4, %v861_v3  ;;  %v632_v21 = vadd.f32 %v3914_v33, %v618_v13 }
 0x112   : > { %v886_v6 = vrot.slane %v878_v15, %v3924_v52  ;;  %v1048_v60 = vcombine.low %v870_v46, %v877_v14  ;;  %v3006_v22 = vcombine.high %v870_v46, %v877_v14  ;;  %v628_v23 = vadd.f32 %v3914_v33, %v614_v1 }
 0x113   : > { %v893_v25 = vrot.slane %v879_v20, %v3924_v52  ;;  %v781_v27 = vcombine.high %v632_v21, %v3557_v16  ;;  %v788_v7 = vrot.slane %v632_v21, %v3918_v43 }
 0x114   : > { %v3273_v61 = vpop.eup %3272  ;;  %v1055_v10 = vrot.slane %v1048_v60, %v3918_v43  ;;  %v1063_v9 = vrot.slane %v3006_v22, %v3918_v43  ;;  %v766_v28 = vcombine.high %v628_v23, %v3557_v16  ;;  %v773_v30 = vrot.slane %v628_v23, %v3918_v43 }
 0x115   : > { %v3275_v31 = vpop.eup %3274  ;;  %v603_v34 = vmul.f32 %v3273_v61, %v579_v12  ;;  %v1064_v35 = vcombine.low %v886_v6, %v893_v25  ;;  %v3007_v0 = vcombine.high %v886_v6, %v893_v25  ;;  %v795_v11 = vrot.slane %v781_v27, %v3918_v43 }
 0x116   : > { %v599_v19 = vmul.f32 %v3275_v31, %v575_v17  ;;  %v1080_v32 = vcombine.low %v1055_v10, %v1063_v9  ;;  %v780_v36 = vrot.slane %v766_v28, %v3918_v43  ;;  %v796_v37 = vcombine.low %v773_v30, %v788_v7 }
 0x117   : > { %v617_v38 = vmul.f32 %v3905_v29, %v603_v34  ;;  %v1071_v39 = vrot.slane %v1064_v35, %v3918_v43  ;;  %v1079_v2 = vrot.slane %v3007_v0, %v3918_v43  ;;  %v797_v40 = vcombine.high %v773_v30, %v788_v7 }
 0x118   : > { %v3277_v41 = vpop.eup %3276  ;;  %v613_v42 = vmul.f32 %v3905_v29, %v599_v19  ;;  %v1087_v44 = vrot.slane %v1080_v32, %v3924_v52  ;;  %v804_v45 = vrot.slane %v796_v37, %v3924_v52  ;;  %v812_v48 = vcombine.low %v780_v36, %v795_v11 }
 0x119   : > { %v3279_v49 = vpop.eup %3278  ;;  %v602_v50 = vmul.f32 %v3277_v41, %v578_v18  ;;  %v1088_v51 = vcombine.low %v1071_v39, %v1079_v2  ;;  %v811_v53 = vrot.slane %v797_v40, %v3924_v52  ;;  %v813_v54 = vcombine.high %v780_v36, %v795_v11 }
 0x11a   : > { %v598_v55 = vmul.f32 %v3279_v49, %v574_v24  ;;  %v820_v56 = vrot.slane %v812_v48, %v3924_v52  ;;  %v627_v57 = vadd.f32 %v3914_v33, %v613_v42  ;;  %v631_v58 = vadd.f32 %v3914_v33, %v617_v38 }
 0x11b   : > { %v616_v59 = vmul.f32 %v3905_v29, %v602_v50  ;;  %v1095_v62 = vrot.slane %v1088_v51, %v3924_v52  ;;  %v827_v63 = vrot.slane %v813_v54, %v3924_v52  ;;  %v998_v4 = vcombine.low %v804_v45, %v811_v53 }
 0x11c   : > { %v612_v5 = vmul.f32 %v3905_v29, %v598_v55  ;;  %v3004_v3 = vcombine.high %v804_v45, %v811_v53  ;;  %v700_v47 = vcombine.high %v627_v57, %v3557_v16  ;;  %v707_v8 = vrot.slane %v627_v57, %v3918_v43 }
 0x11d   : > { %v1097_v12 = vcombine.high %v1087_v44, %v1095_v62  ;;  %v1096_v13 = vcombine.low %v1087_v44, %v1095_v62  ;;  %v1005_v1 = vrot.slane %v998_v4, %v3918_v43  ;;  %v1014_v46 = vcombine.low %v820_v56, %v827_v63 }
 0x11e   : > { %v1013_v14 = vrot.slane %v3004_v3, %v3918_v43  ;;  %v3005_v15 = vcombine.high %v820_v56, %v827_v63  ;;  %v714_v17 = vrot.slane %v700_v47, %v3918_v43  ;;  %v715_v18 = vcombine.high %v631_v58, %v3557_v16 }
 0x11f   : > { %1203 = vmatprep.subr.mxu0 %v1097_v12  ;;  %v1021_v29 = vrot.slane %v1014_v46, %v3918_v43  ;;  %v722_v20 = vrot.slane %v631_v58, %v3918_v43  ;;  %v626_v21 = vadd.f32 %v3914_v33, %v612_v5  ;;  %v630_v6 = vadd.f32 %v3914_v33, %v616_v59 }
 0x120   : > { %1204 = vmatpush1.msra.mxu0 %v1096_v13  ;;  %v1029_v60 = vrot.slane %v3005_v15, %v3918_v43  ;;  %v1030_v22 = vcombine.low %v1005_v1, %v1013_v14  ;;  %v729_v23 = vrot.slane %v715_v18, %v3918_v43 }
 0x121   : > { %v730_v24 = vcombine.low %v707_v8, %v722_v20  ;;  %v731_v25 = vcombine.high %v707_v8, %v722_v20  ;;  %v634_v27 = vcombine.high %v626_v21, %v3557_v16  ;;  %v641_v7 = vrot.slane %v626_v21, %v3918_v43  ;;  %v1098_v21 = vld [vmem:[%s4740_s3] sm:$0xff] }
 0x122   : > { %v1037_v61 = vrot.slane %v1030_v22, %v3924_v52  ;;  %v1038_v10 = vcombine.low %v1021_v29, %v1029_v60  ;;  %v746_v9 = vcombine.low %v714_v17, %v729_v23  ;;  %v747_v28 = vcombine.high %v714_v17, %v729_v23  ;;  %v1100_v60 = vld [vmem:[%s4740_s3 + $0x10] sm:$0xff]  ;;  %v1101_v22 = vld [vmem:[%s4740_s3 + $0x18] sm:$0xff]  ;;  %v1102_v23 = vld [vmem:[%s4740_s3 + $0x20] sm:$0xff] }
 0x123   : > { %v738_v30 = vrot.slane %v730_v24, %v3924_v52  ;;  %v745_v33 = vrot.slane %v731_v25, %v3924_v52  ;;  %v648_v31 = vrot.slane %v634_v27, %v3918_v43  ;;  %v649_v34 = vcombine.high %v630_v6, %v3557_v16  ;;  %v1103_v24 = vld [vmem:[%s4740_s3 + $0x28] sm:$0xff]  ;;  %v1104_v25 = vld [vmem:[%s4740_s3 + $0x30] sm:$0xff]  ;;  %v1105_v27 = vld [vmem:[%s4740_s3 + $0x38] sm:$0xff] }
 0x124   : > { %v1045_v35 = vrot.slane %v1038_v10, %v3924_v52  ;;  %v754_v0 = vrot.slane %v746_v9, %v3924_v52  ;;  %v761_v11 = vrot.slane %v747_v28, %v3924_v52  ;;  %v656_v19 = vrot.slane %v630_v6, %v3918_v43  ;;  %v1099_v6 = vld [vmem:[%s4740_s3 + $0x8] sm:$0xff] }
 0x125   : > { %v948_v32 = vcombine.low %v738_v30, %v745_v33  ;;  %v3002_v36 = vcombine.high %v738_v30, %v745_v33  ;;  %v663_v37 = vrot.slane %v649_v34, %v3918_v43 }
 0x126   : > { %v1047_v38 = vcombine.high %v1037_v61, %v1045_v35  ;;  %v1046_v39 = vcombine.low %v1037_v61, %v1045_v35  ;;  %v964_v2 = vcombine.low %v754_v0, %v761_v11  ;;  %v3003_v40 = vcombine.high %v754_v0, %v761_v11 }
 0x127   : > { %v955_v41 = vrot.slane %v948_v32, %v3918_v43  ;;  %v963_v42 = vrot.slane %v3002_v36, %v3918_v43  ;;  %v664_v44 = vcombine.low %v641_v7, %v656_v19  ;;  %v665_v45 = vcombine.high %v641_v7, %v656_v19  ;;  %v1147_v7 = vpop.permute.xlu1 %1146 }
 0x128   : > { %1205 = vmatprep.subr.mxu0 %v1047_v38  ;;  %v971_v48 = vrot.slane %v964_v2, %v3918_v43  ;;  %v979_v49 = vrot.slane %v3003_v40, %v3918_v43  ;;  %v680_v50 = vcombine.low %v648_v31, %v663_v37  ;;  %v681_v51 = vcombine.high %v648_v31, %v663_v37 }
 0x129   : > { %1206 = vmatpush1.msra.mxu0 %v1046_v39  ;;  %v980_v53 = vcombine.low %v955_v41, %v963_v42  ;;  %v672_v54 = vrot.slane %v664_v44, %v3924_v52  ;;  %v679_v55 = vrot.slane %v665_v45, %v3924_v52 }
 0x12a   : > { %v988_v56 = vcombine.low %v971_v48, %v979_v49  ;;  %v688_v57 = vrot.slane %v680_v50, %v3924_v52  ;;  %v695_v58 = vrot.slane %v681_v51, %v3924_v52  ;;  %v1152_v48 = vpop.permute.xlu0 %1151 }
 0x12b   : > { %v898_v59 = vcombine.low %v672_v54, %v679_v55  ;;  %v3000_v62 = vcombine.high %v672_v54, %v679_v55  ;;  %v987_v63 = vrot.slane %v980_v53, %v3924_v52  ;;  %v1142_v28 = vpop.permute.xlu1 %1141 }
 0x12c   : > { %v995_v4 = vrot.slane %v988_v56, %v3924_v52  ;;  %v914_v5 = vcombine.low %v688_v57, %v695_v58  ;;  %v3001_v3 = vcombine.high %v688_v57, %v695_v58 }
 0x12d   : > { %v905_v47 = vrot.slane %v898_v59, %v3918_v43  ;;  %v913_v8 = vrot.slane %v3000_v62, %v3918_v43 }
 0x12e   : > { %v997_v12 = vcombine.high %v987_v63, %v995_v4  ;;  %v996_v13 = vcombine.low %v987_v63, %v995_v4  ;;  %v921_v1 = vrot.slane %v914_v5, %v3918_v43  ;;  %v929_v46 = vrot.slane %v3001_v3, %v3918_v43 }
 0x12f   : > { %v930_v14 = vcombine.low %v905_v47, %v913_v8  ;;  %v1137_v34 = vpop.permute.xlu1 %1136 }
 0x130   : > { %1207 = vmatprep.subr.mxu0 %v997_v12  ;;  %v938_v15 = vcombine.low %v921_v1, %v929_v46 }
 0x131   : > { %1208 = vmatpush1.msra.mxu0 %v996_v13  ;;  %v937_v17 = vrot.slane %v930_v14, %v3924_v52 }
 0x132   : > { %v945_v18 = vrot.slane %v938_v15, %v3924_v52 }
 0x133   : > { %v1132_v19 = vpop.permute.xlu1 %1131 }
 0x134   : > { %v947_v29 = vcombine.high %v937_v17, %v945_v18  ;;  %v946_v20 = vcombine.low %v937_v17, %v945_v18 }
 0x136   : > { %1209 = vmatprep.subr.mxu0 %v947_v29 }
 0x137   : > { %1210 = vmatpush1.msra.mxu0 %v946_v20  ;;  %v1127_v38 = vpop.permute.xlu1 %1126 }
 0x138   : > { %3008 = vmatmul.mubr.msk.f32.vlgmr.msra.gmra.mxu0 %vm1154_vm0, %v1098_v21 }
 0x139   : > { %1249 = vmatprep.mubr.f32.mxu0 %v3557_v16 }
 0x13b   : > { %v1122_v50 = vpop.permute.xlu1 %1121 }
 0x13c   : > { %3009 = vmatmul.mubr.msk.f32.gmra.mxu0 %vm1154_vm0, %v1099_v6 }
 0x13d   : > { %1255 = vmatprep.mubr.f32.mxu0 %v3557_v16 }
 0x13f   : > { %v1117_v13 = vpop.permute.xlu1 %1116 }
 0x140   : > { %3010 = vmatmul.mubr.msk.f32.gmra.mxu0 %vm1154_vm0, %v1100_v60 }
 0x141   : > { %1261 = vmatprep.mubr.f32.mxu0 %v3557_v16 }
 0x144   : > { %3011 = vmatmul.mubr.msk.f32.gmra.mxu0 %vm1154_vm0, %v1101_v22 }
 0x145   : > { %1267 = vmatprep.mubr.f32.mxu0 %v3557_v16 }
 0x148   : > { %3012 = vmatmul.mubr.msk.f32.gmra.mxu0 %vm1154_vm0, %v1102_v23 }
 0x149   : > { %1273 = vmatprep.mubr.f32.mxu0 %v3557_v16 }
 0x14c   : > { %3013 = vmatmul.mubr.msk.f32.gmra.mxu0 %vm1154_vm0, %v1103_v24 }
 0x14d   : > { %1279 = vmatprep.mubr.f32.mxu0 %v3557_v16 }
 0x150   : > { %3014 = vmatmul.mubr.msk.f32.gmra.mxu0 %vm1154_vm0, %v1104_v25 }
 0x151   : > { %1285 = vmatprep.mubr.f32.mxu0 %v3557_v16 }
 0x154   : > { %3015 = vmatmul.mubr.msk.f32.gmra.mxu0 %vm1154_vm0, %v1105_v27 }
 0x155   : > { %2258 = vmatprep.mubr.f32.mxu0 %v3557_v16 }
 0x1f8   : > { %v1245_v61 = vpop.f32.mrf.mxu0 }
 0x1f9   : > { %v4089_v29 = vadd.f32 %v1245_v61, %v1117_v13 }
 0x1fa   : > { %v1247_v10 = vpop.f32.mrf.mxu0 }
 0x1fb   : > { %v4086_v17 = vadd.f32 %v1247_v10, %v1117_v13  ;;  %v1308_v22 = vmul.f32 0.70710677, %v4089_v29 }
 0x1fc   : > { %v1251_v9 = vpop.f32.mrf.mxu0 }
 0x1fd   : > { %v4083_v14 = vadd.f32 %v1251_v9, %v1122_v50  ;;  %v1309_v60 = vmul.f32 0.70710677, %v4086_v17 }
 0x1fe   : > { %v1253_v30 = vpop.f32.mrf.mxu0 }
 0x1ff   : > { %v4080_v1 = vadd.f32 %v1253_v30, %v1122_v50  ;;  %v1310_v6 = vmul.f32 0.70710677, %v4083_v14 }
 0x200   : > { %v1257_v33 = vpop.f32.mrf.mxu0 }
 0x201   : > { %v4077_v8 = vadd.f32 %v1257_v33, %v1127_v38  ;;  %v1311_v21 = vmul.f32 0.70710677, %v4080_v1 }
 0x202   : > { %v1259_v31 = vpop.f32.mrf.mxu0 }
 0x203   : > { %v4074_v5 = vadd.f32 %v1259_v31, %v1127_v38  ;;  %v1312_v20 = vmul.f32 0.70710677, %v4077_v8 }
 0x204   : > { %v1263_v35 = vpop.f32.mrf.mxu0 }
 0x205   : > { %v4071_v63 = vadd.f32 %v1263_v35, %v1132_v19  ;;  %v1313_v18 = vmul.f32 0.70710677, %v4074_v5 }
 0x206   : > { %v1265_v0 = vpop.f32.mrf.mxu0 }
 0x207   : > { %v4069_v58 = vadd.f32 %v1265_v0, %v1132_v19  ;;  %v1314_v15 = vmul.f32 0.70710677, %v4071_v63 }
 0x208   : > { %v1269_v11 = vpop.f32.mrf.mxu0 }
 0x209   : > { %v4066_v55 = vadd.f32 %v1269_v11, %v1137_v34  ;;  %v1315_v46 = vmul.f32 0.70710677, %v4069_v58 }
 0x20a   : > { %v1271_v32 = vpop.f32.mrf.mxu0 }
 0x20b   : > { %v4063_v51 = vadd.f32 %v1271_v32, %v1137_v34  ;;  %v1316_v12 = vmul.f32 0.70710677, %v4066_v55 }
 0x20c   : > { %v1275_v36 = vpop.f32.mrf.mxu0 }
 0x20d   : > { %v4061_v45 = vadd.f32 %v1275_v36, %v1142_v28  ;;  %v1317_v3 = vmul.f32 0.70710677, %v4063_v51 }
 0x20e   : > { %v1277_v37 = vpop.f32.mrf.mxu0 }
 0x20f   : > { %v4054_v39 = vadd.f32 %v1277_v37, %v1142_v28  ;;  %v1318_v4 = vmul.f32 0.70710677, %v4061_v45  ;;  %v1302_v50 = vmul.f32 0.5, %v4061_v45 }
 0x210   : > { %v1281_v2 = vpop.f32.mrf.mxu0 }
 0x211   : > { %v4056_v40 = vadd.f32 %v1281_v2, %v1147_v7  ;;  %v1319_v42 = vmul.f32 0.70710677, %v4054_v39 }
 0x212   : > { %v1283_v41 = vpop.f32.mrf.mxu0 }
 0x213   : > { %v4059_v44 = vadd.f32 %v1283_v41, %v1147_v7  ;;  %v1320_v56 = vmul.f32 0.70710677, %v4056_v40  ;;  %3280 = verf.f32 %v1319_v42  ;;  %v1304_v36 = vmul.f32 0.5, %v4056_v40 }
 0x214   : > { %v1287_v49 = vpop.f32.mrf.mxu0  ;;  %v1303_v41 = vmul.f32 0.5, %v4054_v39 }
 0x215   : > { %v1321_v53 = vmul.f32 0.70710677, %v4059_v44  ;;  %v1288_v54 = vadd.f32 %v1287_v49, %v1152_v48  ;;  %v1305_v0 = vmul.f32 0.5, %v4059_v44 }
 0x216   : > { %v1289_v57 = vpop.f32.mrf.mxu0 }
 0x217   : > { %v1322_v59 = vmul.f32 0.70710677, %v1288_v54  ;;  %v1290_v62 = vadd.f32 %v1289_v57, %v1152_v48  ;;  %3282 = verf.f32 %v1321_v53  ;;  %v1306_v31 = vmul.f32 0.5, %v1288_v54 }
 0x219   : > { %3284 = verf.f32 %v1322_v59  ;;  %v1323_v47 = vmul.f32 0.70710677, %v1290_v62  ;;  %v1307_v9 = vmul.f32 0.5, %v1290_v62  ;;  %v1300_v62 = vmul.f32 0.5, %v4066_v55 }
 0x21a   : > { %3286 = verf.f32 %v1320_v56  ;;  %v1301_v56 = vmul.f32 0.5, %v4063_v51 }
 0x21b   : > { %3288 = verf.f32 %v1323_v47  ;;  %v1299_v47 = vmul.f32 0.5, %v4069_v58 }
 0x21c   : > { %3290 = verf.f32 %v1318_v4 }
 0x21d   : > { %3292 = verf.f32 %v1317_v3 }
 0x21e   : > { %3294 = verf.f32 %v1316_v12 }
 0x21f   : > { %3296 = verf.f32 %v1315_v46  ;;  %v1298_v46 = vmul.f32 0.5, %v4071_v63  ;;  %v1294_v63 = vmul.f32 0.5, %v4083_v14  ;;  %v1373_v14 = vld [vmem:[%s4742_s5 + $0x8] sm:$0xff] }
 0x220   : > { %3298 = verf.f32 %v1314_v15  ;;  %v3281_v23 = vpop.eup %3280 }
 0x221   : > { %3300 = verf.f32 %v1313_v18  ;;  %v1351_v19 = vadd.f32 1.0, %v3281_v23 }
 0x222   : > { %3302 = verf.f32 %v1312_v20  ;;  %v1297_v20 = vmul.f32 0.5, %v4074_v5  ;;  %v1293_v5 = vmul.f32 0.5, %v4086_v17  ;;  %v1374_v17 = vld [vmem:[%s4742_s5 + $0x10] sm:$0xff] }
 0x223   : > { %3304 = verf.f32 %v1311_v21  ;;  %v1367_v57 = vmul.f32 %v1351_v19, %v1303_v41  ;;  %v1383_v19 = vpop.permute.xlu1 %1382  ;;  %v1388_v41 = vpop.permute.xlu0 %1387 }
 0x224   : > { %3306 = verf.f32 %v1310_v6  ;;  %v3283_v24 = vpop.eup %3282  ;;  %v1296_v6 = vmul.f32 0.5, %v4077_v8 }
 0x225   : > { %3308 = verf.f32 %v1309_v60  ;;  %v1353_v30 = vadd.f32 1.0, %v3283_v24 }
 0x226   : > { %v3285_v25 = vpop.eup %3284  ;;  %3310 = verf.f32 %v1308_v22  ;;  %v1295_v22 = vmul.f32 0.5, %v4080_v1 }
 0x227   : > { %v3287_v27 = vpop.eup %3286  ;;  %v1354_v61 = vadd.f32 1.0, %v3285_v25  ;;  %v1369_v42 = vmul.f32 %v1353_v30, %v1305_v0  ;;  %v2171_v30 = vld [vmem:[#allocation5 + $0x1f8] sm:$0xff]  ;;  %v2164_v0 = vld [vmem:[#allocation5 + $0x1c0] sm:$0xff] }
 0x228   : > { %v3289_v7 = vpop.eup %3288  ;;  %v1352_v34 = vadd.f32 1.0, %v3287_v27 }
 0x229   : > { %v3291_v10 = vpop.eup %3290  ;;  %v1355_v28 = vadd.f32 1.0, %v3289_v7  ;;  %v1370_v37 = vmul.f32 %v1354_v61, %v1306_v31  ;;  %v1292_v61 = vmul.f32 0.5, %v4089_v29  ;;  %v1375_v29 = vld [vmem:[%s4742_s5 + $0x18] sm:$0xff]  ;;  %v2170_v31 = vld [vmem:[#allocation5 + $0x1f0] sm:$0xff] }
 0x22a   : > { %v3293_v33 = vpop.eup %3292  ;;  %v1350_v38 = vadd.f32 1.0, %v3291_v10  ;;  %v1368_v53 = vmul.f32 %v1352_v34, %v1304_v36  ;;  %v2165_v34 = vld [vmem:[#allocation5 + $0x1c8] sm:$0xff] }
 0x22b   : > { %v3295_v35 = vpop.eup %3294  ;;  %v1371_v11 = vmul.f32 %v1355_v28, %v1307_v9  ;;  %v1349_v48 = vadd.f32 1.0, %v3293_v33  ;;  %v1372_v9 = vld [vmem:[%s4742_s5] sm:$0xff]  ;;  %v2169_v28 = vld [vmem:[#allocation5 + $0x1e8] sm:$0xff] }
 0x22c   : > { %v3297_v32 = vpop.eup %3296  ;;  %v1348_v54 = vadd.f32 1.0, %v3295_v35  ;;  %v1366_v39 = vmul.f32 %v1350_v38, %v1302_v50  ;;  %v2168_v33 = vld [vmem:[#allocation5 + $0x1e0] sm:$0xff]  ;;  %2194 = vmatprep.subr.mxu0 %v2169_v28  ;;  %v2167_v35 = vld [vmem:[#allocation5 + $0x1d8] sm:$0xff] }
 0x22d   : > { %v3299_v2 = vpop.eup %3298  ;;  %1429 = vmatprep.subr.mxu1 %v1371_v11  ;;  %v1347_v40 = vadd.f32 1.0, %v3297_v32  ;;  %v1365_v45 = vmul.f32 %v1349_v48, %v1301_v56  ;;  %2195 = vmatpush1.msra.mxu0 %v2168_v33  ;;  %v2166_v11 = vld [vmem:[#allocation5 + $0x1d0] sm:$0xff] }
 0x22e   : > { %v3301_v49 = vpop.eup %3300  ;;  %1430 = vmatpush1.msra.mxu1 %v1370_v37  ;;  %v1346_v4 = vadd.f32 1.0, %v3299_v2  ;;  %v1364_v51 = vmul.f32 %v1348_v54, %v1300_v62  ;;  %2196 = vmatprep.subr.mxu0 %v2165_v34 }
 0x22f   : > { %v3303_v44 = vpop.eup %3302  ;;  %1431 = vmatprep.subr.mxu1 %v1369_v42  ;;  %v1345_v12 = vadd.f32 1.0, %v3301_v49  ;;  %v1363_v55 = vmul.f32 %v1347_v40, %v1299_v47  ;;  %2197 = vmatpush1.msra.mxu0 %v2164_v0 }
 0x230   : > { %v3305_v59 = vpop.eup %3304  ;;  %1432 = vmatpush1.msra.mxu1 %v1368_v53  ;;  %v1344_v15 = vadd.f32 1.0, %v3303_v44  ;;  %v1362_v60 = vmul.f32 %v1346_v4, %v1298_v46 }
 0x231   : > { %v3307_v3 = vpop.eup %3306  ;;  %1433 = vmatprep.subr.mxu1 %v1367_v57  ;;  %v1343_v21 = vadd.f32 1.0, %v3305_v59  ;;  %v1361_v23 = vmul.f32 %v1345_v12, %v1297_v20 }
 0x232   : > { %v3309_v13 = vpop.eup %3308  ;;  %1434 = vmatpush1.msra.mxu1 %v1366_v39  ;;  %v1342_v58 = vadd.f32 1.0, %v3307_v3  ;;  %v1360_v25 = vmul.f32 %v1344_v15, %v1296_v6  ;;  %v1393_v3 = vpop.permute.xlu1 %1392 }
 0x233   : > { %v3311_v18 = vpop.eup %3310  ;;  %1435 = vmatprep.subr.mxu1 %v1365_v45  ;;  %v1341_v24 = vadd.f32 1.0, %v3309_v13  ;;  %v1359_v7 = vmul.f32 %v1343_v21, %v1295_v22 }
 0x234   : > { %1436 = vmatpush1.msra.mxu1 %v1364_v51  ;;  %v1340_v27 = vadd.f32 1.0, %v3311_v18  ;;  %v1358_v8 = vmul.f32 %v1342_v58, %v1294_v63 }
 0x235   : > { %1437 = vmatprep.subr.mxu1 %v1363_v55  ;;  %v1357_v10 = vmul.f32 %v1341_v24, %v1293_v5 }
 0x236   : > { %1438 = vmatpush1.msra.mxu1 %v1362_v60  ;;  %v1356_v1 = vmul.f32 %v1340_v27, %v1292_v61 }
 0x237   : > { %1439 = vmatprep.subr.mxu1 %v1361_v23 }
 0x238   : > { %1440 = vmatpush1.msra.mxu1 %v1360_v25 }
 0x239   : > { %1441 = vmatprep.subr.mxu1 %v1359_v7 }
 0x23a   : > { %1442 = vmatpush1.msra.mxu1 %v1358_v8 }
 0x23b   : > { %1443 = vmatprep.subr.mxu1 %v1357_v10 }
 0x23c   : > { %1444 = vmatpush1.msra.mxu1 %v1356_v1 }
 0x23d   : > { %3016 = vmatmul.mubr.msk.f32.vlgmr.msra.gmra.mxu1 %vm1400_vm1, %v1372_v9  ;;  %2307 = vmatprep.subr.mxu1 %v2171_v30  ;;  %v1398_v30 = vpop.permute.xlu0 %1397 }
 0x23e   : > { %1483 = vmatprep.mubr.f32.mxu1 %v3557_v16  ;;  %2308 = vmatpush1.msra.mxu1 %v2170_v31 }
 0x23f   : > { %2309 = vmatprep.subr.mxu1 %v2167_v35 }
 0x240   : > { %2310 = vmatpush1.msra.mxu1 %v2166_v11 }
 0x241   : > { %3017 = vmatmul.mubr.msk.f32.gmra.mxu1 %vm1400_vm1, %v1373_v14 }
 0x242   : > { %1489 = vmatprep.mubr.f32.mxu1 %v3557_v16 }
 0x245   : > { %3018 = vmatmul.mubr.msk.f32.gmra.mxu1 %vm1400_vm1, %v1374_v17 }
 0x246   : > { %1495 = vmatprep.mubr.f32.mxu1 %v3557_v16 }
 0x249   : > { %3019 = vmatmul.mubr.msk.f32.gmra.mxu1 %vm1400_vm1, %v1375_v29 }
 0x24a   : > { %2371 = vmatprep.mubr.f32.mxu1 %v3557_v16 }
 0x2fd   : > { %v1479_v32 = vpop.f32.mrf.mxu1 }
 0x2fe   : > { %v1480_v36 = vadd.f32 %v1479_v32, %v1383_v19 }
 0x2ff   : > { %v1481_v37 = vpop.f32.mrf.mxu1 }
 0x300   : > { %v1502_v38 = vcombine.high %v1480_v36, %v3557_v16  ;;  %v1482_v2 = vadd.f32 %v1481_v37, %v1383_v19  ;;  %v1509_v48 = vrot.slane %v1480_v36, %v3918_v43 }
 0x301   : > { %v1485_v42 = vpop.f32.mrf.mxu1 }
 0x302   : > { %v1517_v49 = vcombine.high %v1482_v2, %v3557_v16  ;;  %v1524_v50 = vrot.slane %v1482_v2, %v3918_v43  ;;  %v1486_v53 = vadd.f32 %v1485_v42, %v1388_v41  ;;  %v1516_v54 = vrot.slane %v1502_v38, %v3918_v43 }
 0x303   : > { %v1487_v44 = vpop.f32.mrf.mxu1 }
 0x304   : > { %v1531_v56 = vrot.slane %v1517_v49, %v3918_v43  ;;  %v1532_v57 = vcombine.low %v1509_v48, %v1524_v50  ;;  %v1533_v40 = vcombine.high %v1509_v48, %v1524_v50  ;;  %v1568_v59 = vcombine.high %v1486_v53, %v3557_v16 }
 0x305   : > { %v1575_v62 = vrot.slane %v1486_v53, %v3918_v43  ;;  %v1488_v39 = vadd.f32 %v1487_v44, %v1388_v41  ;;  %v1491_v4 = vpop.f32.mrf.mxu1 }
 0x306   : > { %v1540_v47 = vrot.slane %v1532_v57, %v3924_v52  ;;  %v1547_v45 = vrot.slane %v1533_v40, %v3924_v52  ;;  %v1548_v12 = vcombine.low %v1516_v54, %v1531_v56  ;;  %v1549_v13 = vcombine.high %v1516_v54, %v1531_v56 }
 0x307   : > { %v1582_v46 = vrot.slane %v1568_v59, %v3918_v43  ;;  %v1583_v51 = vcombine.high %v1488_v39, %v3557_v16  ;;  %v1590_v15 = vrot.slane %v1488_v39, %v3918_v43  ;;  %v1492_v18 = vadd.f32 %v1491_v4, %v1393_v3  ;;  %v1493_v20 = vpop.f32.mrf.mxu1 }
 0x308   : > { %v1556_v55 = vrot.slane %v1548_v12, %v3924_v52  ;;  %v1563_v21 = vrot.slane %v1549_v13, %v3924_v52  ;;  %v1766_v6 = vcombine.low %v1540_v47, %v1547_v45  ;;  %v3020_v60 = vcombine.high %v1540_v47, %v1547_v45 }
 0x309   : > { %v1597_v58 = vrot.slane %v1583_v51, %v3918_v43  ;;  %v1598_v22 = vcombine.low %v1575_v62, %v1590_v15  ;;  %v1599_v23 = vcombine.high %v1575_v62, %v1590_v15  ;;  %v1634_v24 = vcombine.high %v1492_v18, %v3557_v16  ;;  %v1497_v63 = vpop.f32.mrf.mxu1 }
 0x30a   : > { %v1773_v25 = vrot.slane %v1766_v6, %v3918_v43  ;;  %v1781_v27 = vrot.slane %v3020_v60, %v3918_v43  ;;  %v1782_v5 = vcombine.low %v1556_v55, %v1563_v21  ;;  %v3021_v7 = vcombine.high %v1556_v55, %v1563_v21 }
 0x30b   : > { %v1606_v61 = vrot.slane %v1598_v22, %v3924_v52  ;;  %v1613_v8 = vrot.slane %v1599_v23, %v3924_v52  ;;  %v1614_v10 = vcombine.low %v1582_v46, %v1597_v58  ;;  %v1615_v1 = vcombine.high %v1582_v46, %v1597_v58  ;;  %v1499_v9 = vpop.f32.mrf.mxu1 }
 0x30c   : > { %v1789_v14 = vrot.slane %v1782_v5, %v3918_v43  ;;  %v1797_v17 = vrot.slane %v3021_v7, %v3918_v43  ;;  %v1798_v29 = vcombine.low %v1773_v25, %v1781_v27  ;;  %v1641_v28 = vrot.slane %v1492_v18, %v3918_v43 }
 0x30d   : > { %v1622_v33 = vrot.slane %v1614_v10, %v3924_v52  ;;  %v1629_v31 = vrot.slane %v1615_v1, %v3924_v52  ;;  %v1816_v34 = vcombine.low %v1606_v61, %v1613_v8  ;;  %v3022_v35 = vcombine.high %v1606_v61, %v1613_v8 }
 0x30e   : > { %v1648_v0 = vrot.slane %v1634_v24, %v3918_v43  ;;  %v1494_v11 = vadd.f32 %v1493_v20, %v1393_v3  ;;  %v1498_v19 = vadd.f32 %v1497_v63, %v1398_v30  ;;  %v1500_v32 = vadd.f32 %v1499_v9, %v1398_v30 }
 0x30f   : > { %v1823_v36 = vrot.slane %v1816_v34, %v3918_v43  ;;  %v1831_v37 = vrot.slane %v3022_v35, %v3918_v43  ;;  %v1832_v38 = vcombine.low %v1622_v33, %v1629_v31  ;;  %v3023_v2 = vcombine.high %v1622_v33, %v1629_v31 }
 0x310   : > { %v1649_v41 = vcombine.high %v1494_v11, %v3557_v16  ;;  %v1656_v42 = vrot.slane %v1494_v11, %v3918_v43  ;;  %v1700_v48 = vcombine.high %v1498_v19, %v3557_v16  ;;  %v1707_v49 = vrot.slane %v1498_v19, %v3918_v43  ;;  %v3392_v11 = vld [vmem:[%s3772_s11] sm:$0xff] }
 0x311   : > { %v1839_v50 = vrot.slane %v1832_v38, %v3918_v43  ;;  %v1847_v53 = vrot.slane %v3023_v2, %v3918_v43  ;;  %v1848_v54 = vcombine.low %v1823_v36, %v1831_v37  ;;  %v1715_v44 = vcombine.high %v1500_v32, %v3557_v16 }
 0x312   : > { %v1663_v56 = vrot.slane %v1649_v41, %v3918_v43  ;;  %v1664_v57 = vcombine.low %v1641_v28, %v1656_v42  ;;  %v1665_v40 = vcombine.high %v1641_v28, %v1656_v42  ;;  %v1714_v59 = vrot.slane %v1700_v48, %v3918_v43 }
 0x313   : > { %v1722_v62 = vrot.slane %v1500_v32, %v3918_v43  ;;  %v1729_v39 = vrot.slane %v1715_v44, %v3918_v43  ;;  %v4167_v4 = vrot.slane %v1798_v29, %v3924_v52  ;;  %v1806_v3 = vcombine.low %v1789_v14, %v1797_v17 }
 0x314   : > { %v1672_v47 = vrot.slane %v1664_v57, %v3924_v52  ;;  %v1679_v45 = vrot.slane %v1665_v40, %v3924_v52  ;;  %v1680_v12 = vcombine.low %v1648_v0, %v1663_v56  ;;  %v1681_v13 = vcombine.high %v1648_v0, %v1663_v56  ;;  %v3395_v57 = vld [vmem:[%s3772_s11 + $0x18] sm:$0xff] }
 0x315   : > { %v1730_v46 = vcombine.low %v1707_v49, %v1722_v62  ;;  %v1731_v51 = vcombine.high %v1707_v49, %v1722_v62  ;;  %v1746_v15 = vcombine.low %v1714_v59, %v1729_v39  ;;  %v1747_v18 = vcombine.high %v1714_v59, %v1729_v39  ;;  %v3393_v49 = vld [vmem:[%s3772_s11 + $0x8] sm:$0xff] }
 0x316   : > { %v1688_v20 = vrot.slane %v1680_v12, %v3924_v52  ;;  %v1695_v55 = vrot.slane %v1681_v13, %v3924_v52  ;;  %v1866_v21 = vcombine.low %v1672_v47, %v1679_v45  ;;  %v3024_v6 = vcombine.high %v1672_v47, %v1679_v45  ;;  %v2161_v39 = vld [vmem:[#allocation5 + $0x1a8] sm:$0xff]  ;;  %v2160_v47 = vld [vmem:[#allocation5 + $0x1a0] sm:$0xff]  ;;  %v2162_v45 = vld [vmem:[#allocation5 + $0x1b0] sm:$0xff] }
 0x317   : > { %v1738_v60 = vrot.slane %v1730_v46, %v3924_v52  ;;  %v1745_v58 = vrot.slane %v1731_v51, %v3924_v52  ;;  %v1754_v22 = vrot.slane %v1746_v15, %v3924_v52  ;;  %v1761_v23 = vrot.slane %v1747_v18, %v3924_v52  ;;  %2198 = vmatprep.subr.mxu0 %v2161_v39  ;;  %v3396_v12 = vld [vmem:[%s3772_s11 + $0x20] sm:$0xff]  ;;  %v2159_v51 = vld [vmem:[#allocation5 + $0x198] sm:$0xff]  ;;  %v2158_v18 = vld [vmem:[#allocation5 + $0x190] sm:$0xff] }
 0x318   : > { %v1873_v24 = vrot.slane %v1866_v21, %v3918_v43  ;;  %v1881_v63 = vrot.slane %v3024_v6, %v3918_v43  ;;  %v1882_v25 = vcombine.low %v1688_v20, %v1695_v55  ;;  %v3025_v27 = vcombine.high %v1688_v20, %v1695_v55  ;;  %2199 = vmatpush1.msra.mxu0 %v2160_v47  ;;  %v2156_v15 = vld [vmem:[#allocation5 + $0x180] sm:$0xff]  ;;  %v2153_v20 = vld [vmem:[#allocation5 + $0x168] sm:$0xff]  ;;  %v2155_v55 = vld [vmem:[#allocation5 + $0x178] sm:$0xff] }
 0x319   : > { %v1916_v5 = vcombine.low %v1738_v60, %v1745_v58  ;;  %v3026_v7 = vcombine.high %v1738_v60, %v1745_v58  ;;  %v1932_v61 = vcombine.low %v1754_v22, %v1761_v23  ;;  %v3027_v8 = vcombine.high %v1754_v22, %v1761_v23  ;;  %v2152_v21 = vld [vmem:[#allocation5 + $0x160] sm:$0xff]  ;;  %v2154_v6 = vld [vmem:[#allocation5 + $0x170] sm:$0xff]  ;;  %v3397_v58 = vld [vmem:[%s3772_s11 + $0x28] sm:$0xff] }
 0x31a   : > { %v1889_v10 = vrot.slane %v1882_v25, %v3918_v43  ;;  %v1897_v1 = vrot.slane %v3025_v27, %v3918_v43  ;;  %v1898_v9 = vcombine.low %v1873_v24, %v1881_v63  ;;  %v1813_v14 = vrot.slane %v1806_v3, %v3924_v52  ;;  %v2163_v3 = vld [vmem:[#allocation5 + $0x1b8] sm:$0xff]  ;;  %v2149_v24 = vld [vmem:[#allocation5 + $0x148] sm:$0xff]  ;;  %v2148_v25 = vld [vmem:[#allocation5 + $0x140] sm:$0xff] }
 0x31b   : > { %v1923_v17 = vrot.slane %v1916_v5, %v3918_v43  ;;  %v1931_v29 = vrot.slane %v3026_v7, %v3918_v43  ;;  %v1939_v28 = vrot.slane %v1932_v61, %v3918_v43  ;;  %v1947_v30 = vrot.slane %v3027_v8, %v3918_v43  ;;  %2311 = vmatprep.subr.mxu1 %v2163_v3  ;;  %v2151_v63 = vld [vmem:[#allocation5 + $0x158] sm:$0xff]  ;;  %v2150_v27 = vld [vmem:[#allocation5 + $0x150] sm:$0xff]  ;;  %v2145_v5 = vld [vmem:[#allocation5 + $0x128] sm:$0xff] }
 0x31c   : > { %v1814_v33 = vcombine.low %v4167_v4, %v1813_v14  ;;  %v1856_v31 = vcombine.low %v1839_v50, %v1847_v53  ;;  %v1906_v35 = vcombine.low %v1889_v10, %v1897_v1  ;;  %v1855_v32 = vrot.slane %v1848_v54, %v3924_v52  ;;  %v3394_v54 = vld [vmem:[%s3772_s11 + $0x10] sm:$0xff]  ;;  %2312 = vmatpush1.msra.mxu1 %v2162_v45  ;;  %v2147_v7 = vld [vmem:[#allocation5 + $0x138] sm:$0xff]  ;;  %v2117_v3 = vld [vmem:[#allocation5 + $0x48] sm:$0xff] }
 0x31d   : > { %v1948_v34 = vcombine.low %v1923_v17, %v1931_v29  ;;  %v1956_v0 = vcombine.low %v1939_v28, %v1947_v30  ;;  %v4193_v37 = vrot.slane %v1898_v9, %v3924_v52  ;;  %v1815_v59 = vcombine.high %v4167_v4, %v1813_v14  ;;  %v2157_v4 = vld [vmem:[#allocation5 + $0x188] sm:$0xff]  ;;  %2313 = vmatprep.subr.mxu1 %v2159_v51  ;;  %v3398_v8 = vld [vmem:[%s3772_s11 + $0x30] sm:$0xff]  ;;  %v2144_v9 = vld [vmem:[#allocation5 + $0x120] sm:$0xff] }
 0x31e   : > { %v4188_v19 = vadd.f32 %v3392_v11, %v1814_v33  ;;  %v1863_v36 = vrot.slane %v1856_v31, %v3924_v52  ;;  %v4196_v43 = vrot.slane %v1906_v35, %v3924_v52  ;;  %2200 = vmatprep.subr.mxu0 %v2157_v4  ;;  %2314 = vmatpush1.msra.mxu1 %v2158_v18  ;;  %v2146_v14 = vld [vmem:[#allocation5 + $0x130] sm:$0xff]  ;;  %v2141_v17 = vld [vmem:[#allocation5 + $0x108] sm:$0xff]  ;;  %v2143_v29 = vld [vmem:[#allocation5 + $0x118] sm:$0xff] }
 0x31f   : > { %v4199_v38 = vrot.slane %v1956_v0, %v3924_v52  ;;  %v4205_v42 = vrot.slane %v1948_v34, %v3924_v52  ;;  %v4230_v13 = vadd.f32 %v3396_v12, %v1815_v59  ;;  %2201 = vmatpush1.msra.mxu0 %v2156_v15  ;;  %2315 = vmatprep.subr.mxu1 %v2155_v55  ;;  %v2140_v28 = vld [vmem:[#allocation5 + $0x100] sm:$0xff]  ;;  %v2142_v30 = vld [vmem:[#allocation5 + $0x110] sm:$0xff]  ;;  %v3399_v31 = vld [vmem:[%s3772_s11 + $0x38] sm:$0xff]  ;;  %s2878_s11 = scalar_lea.sflag [#allocation4], %s3766_s30 }
 0x320   : > { %4810 = vst [vmem:[#allocation17_spill] sm:$0xff] %v4188_v19  ;;  %1976 = vadd.xlane.f32.xlu1 %v4188_v19  ;;  %v2000_v2 = vmul.f32 %v4188_v19, %v4188_v19  ;;  %v1864_v41 = vcombine.low %v1855_v32, %v1863_v36  ;;  %v1914_v48 = vcombine.low %v4193_v37, %v4196_v43  ;;  %v2137_v35 = vld [vmem:[#allocation5 + $0xe8] sm:$0xff]  ;;  %v2139_v0 = vld [vmem:[#allocation5 + $0xf8] sm:$0xff]  ;;  %v2136_v11 = vld [vmem:[#allocation5 + $0xe0] sm:$0xff] }
 0x321   : > { %v1964_v53 = vcombine.low %v4205_v42, %v4199_v38  ;;  %4814 = vst [vmem:[#allocation21_spill] sm:$0xff] %v4230_v13  ;;  %v1865_v46 = vcombine.high %v1855_v32, %v1863_v36  ;;  %v2004_v60 = vmul.f32 %v4230_v13, %v4230_v13  ;;  %v1915_v23 = vcombine.high %v4193_v37, %v4196_v43  ;;  %v2138_v32 = vld [vmem:[#allocation5 + $0xf0] sm:$0xff]  ;;  %v2133_v36 = vld [vmem:[#allocation5 + $0xc8] sm:$0xff]  ;;  %v2135_v37 = vld [vmem:[#allocation5 + $0xd8] sm:$0xff] }
 0x322   : > { %2008 = vadd.xlane.f32.xlu0 %v2000_v2  ;;  %v4210_v50 = vadd.f32 %v3393_v49, %v1864_v41  ;;  %v4215_v44 = vadd.f32 %v3394_v54, %v1914_v48  ;;  %2202 = vmatprep.subr.mxu0 %v2153_v20  ;;  %v1965_v1 = vcombine.high %v4205_v42, %v4199_v38  ;;  %v2132_v38 = vld [vmem:[#allocation5 + $0xc0] sm:$0xff]  ;;  %v2134_v2 = vld [vmem:[#allocation5 + $0xd0] sm:$0xff]  ;;  %v2129_v41 = vld [vmem:[#allocation5 + $0xa8] sm:$0xff] }
 0x323   : > { %v4223_v40 = vadd.f32 %v3395_v57, %v1964_v53  ;;  %v4236_v22 = vadd.f32 %v3397_v58, %v1865_v46  ;;  %2203 = vmatpush1.msra.mxu0 %v2152_v21  ;;  %2316 = vmatpush1.msra.mxu1 %v2154_v6  ;;  %v4244_v10 = vadd.f32 %v3398_v8, %v1915_v23  ;;  %v2131_v42 = vld [vmem:[#allocation5 + $0xb8] sm:$0xff]  ;;  %v2128_v48 = vld [vmem:[#allocation5 + $0xa0] sm:$0xff]  ;;  %v2130_v49 = vld [vmem:[#allocation5 + $0xb0] sm:$0xff] }
 0x324   : > { %4811 = vst [vmem:[#allocation18_spill] sm:$0xff] %v4210_v50  ;;  %4812 = vst [vmem:[#allocation19_spill] sm:$0xff] %v4215_v44  ;;  %v2001_v56 = vmul.f32 %v4210_v50, %v4210_v50  ;;  %v2002_v52 = vmul.f32 %v4215_v44, %v4215_v44  ;;  %2204 = vmatprep.subr.mxu0 %v2149_v24  ;;  %2317 = vmatprep.subr.mxu1 %v2151_v63  ;;  %v2125_v53 = vld [vmem:[#allocation5 + $0x88] sm:$0xff]  ;;  %v2127_v54 = vld [vmem:[#allocation5 + $0x98] sm:$0xff] }
 0x325   : > { %4813 = vst [vmem:[#allocation20_spill] sm:$0xff] %v4223_v40  ;;  %v2003_v62 = vmul.f32 %v4223_v40, %v4223_v40  ;;  %4815 = vst [vmem:[#allocation22_spill] sm:$0xff] %v4236_v22  ;;  %v2005_v61 = vmul.f32 %v4236_v22, %v4236_v22  ;;  %2205 = vmatpush1.msra.mxu0 %v2148_v25  ;;  %2318 = vmatpush1.msra.mxu1 %v2150_v27  ;;  %v2121_v57 = vld [vmem:[#allocation5 + $0x68] sm:$0xff]  ;;  %v2123_v59 = vld [vmem:[#allocation5 + $0x78] sm:$0xff] }
 0x326   : > { %1978 = vadd.xlane.f32.xlu0 %v4210_v50  ;;  %2010 = vadd.xlane.f32.xlu1 %v2001_v56  ;;  %4816 = vst [vmem:[#allocation23_spill] sm:$0xff] %v4244_v10  ;;  %v2006_v33 = vmul.f32 %v4244_v10, %v4244_v10  ;;  %v4252_v34 = vadd.f32 %v3399_v31, %v1965_v1  ;;  %v2124_v56 = vld [vmem:[#allocation5 + $0x80] sm:$0xff]  ;;  %v2122_v39 = vld [vmem:[#allocation5 + $0x70] sm:$0xff]  ;;  %v2119_v47 = vld [vmem:[#allocation5 + $0x58] sm:$0xff] }
 0x327   : > { %2206 = vmatprep.subr.mxu0 %v2145_v5  ;;  %2319 = vmatprep.subr.mxu1 %v2147_v7  ;;  %v2116_v45 = vld [vmem:[#allocation5 + $0x40] sm:$0xff]  ;;  %v2118_v12 = vld [vmem:[#allocation5 + $0x50] sm:$0xff]  ;;  %v2113_v46 = vld [vmem:[#allocation5 + $0x28] sm:$0xff] }
 0x328   : > { %2207 = vmatpush1.msra.mxu0 %v2144_v9  ;;  %2320 = vmatpush1.msra.mxu1 %v2146_v14  ;;  %4817 = vst [vmem:[#allocation24_spill] sm:$0xff] %v4252_v34  ;;  %v2007_v43 = vmul.f32 %v4252_v34, %v4252_v34  ;;  %v2115_v4 = vld [vmem:[#allocation5 + $0x38] sm:$0xff]  ;;  %v2112_v51 = vld [vmem:[#allocation5 + $0x20] sm:$0xff]  ;;  %v2114_v15 = vld [vmem:[#allocation5 + $0x30] sm:$0xff] }
 0x329   : > { %2208 = vmatprep.subr.mxu0 %v2141_v17  ;;  %2321 = vmatprep.subr.mxu1 %v2143_v29  ;;  %v2109_v18 = vld [vmem:[#allocation5 + $0x8] sm:$0xff]  ;;  %v2111_v20 = vld [vmem:[#allocation5 + $0x18] sm:$0xff]  ;;  %v2108_v55 = vld [vmem:[#allocation5] sm:$0xff] }
 0x32a   : > { %1980 = vadd.xlane.f32.xlu0 %v4215_v44  ;;  %2012 = vadd.xlane.f32.xlu1 %v2002_v52  ;;  %v2126_v52 = vld [vmem:[#allocation5 + $0x90] sm:$0xff]  ;;  %v2611_v6 = vld [vmem:[#allocation7 + $0xf8] sm:$0xff] }
 0x32b   : > { %2209 = vmatpush1.msra.mxu0 %v2140_v28  ;;  %2322 = vmatpush1.msra.mxu1 %v2142_v30  ;;  %v2110_v21 = vld [vmem:[#allocation5 + $0x10] sm:$0xff] }
 0x32c   : > { %2210 = vmatprep.subr.mxu0 %v2137_v35  ;;  %2323 = vmatprep.subr.mxu1 %v2139_v0 }
 0x32d   : > { %2211 = vmatpush1.msra.mxu0 %v2136_v11  ;;  %2324 = vmatpush1.msra.mxu1 %v2138_v32 }
 0x32e   : > { %1982 = vadd.xlane.f32.xlu0 %v4223_v40  ;;  %2014 = vadd.xlane.f32.xlu1 %v2003_v62  ;;  %v2120_v62 = vld [vmem:[#allocation5 + $0x60] sm:$0xff] }
 0x32f   : > { %2212 = vmatprep.subr.mxu0 %v2133_v36  ;;  %2325 = vmatprep.subr.mxu1 %v2135_v37 }
 0x330   : > { %2213 = vmatpush1.msra.mxu0 %v2132_v38  ;;  %2326 = vmatpush1.msra.mxu1 %v2134_v2 }
 0x331   : > { %2214 = vmatprep.subr.mxu0 %v2129_v41  ;;  %2327 = vmatprep.subr.mxu1 %v2131_v42 }
 0x332   : > { %1984 = vadd.xlane.f32.xlu0 %v4230_v13  ;;  %2016 = vadd.xlane.f32.xlu1 %v2004_v60 }
 0x333   : > { %2215 = vmatpush1.msra.mxu0 %v2128_v48  ;;  %2328 = vmatpush1.msra.mxu1 %v2130_v49 }
 0x334   : > { %2216 = vmatprep.subr.mxu0 %v2125_v53  ;;  %2329 = vmatprep.subr.mxu1 %v2127_v54 }
 0x335   : > { %2217 = vmatpush1.msra.mxu0 %v2124_v56  ;;  %2330 = vmatpush1.msra.mxu1 %v2126_v52 }
 0x336   : > { %1986 = vadd.xlane.f32.xlu0 %v4236_v22  ;;  %2018 = vadd.xlane.f32.xlu1 %v2005_v61 }
 0x337   : > { %2218 = vmatprep.subr.mxu0 %v2121_v57  ;;  %2331 = vmatprep.subr.mxu1 %v2123_v59 }
 0x338   : > { %2219 = vmatpush1.msra.mxu0 %v2120_v62  ;;  %2332 = vmatpush1.msra.mxu1 %v2122_v39  ;;  %v4276_v62 = vld [vmem:[%s4744_s7] ss:$0 sm:$0xff] }
 0x339   : > { %2220 = vmatprep.subr.mxu0 %v2117_v3  ;;  %2333 = vmatprep.subr.mxu1 %v2119_v47 }
 0x33a   : > { %1988 = vadd.xlane.f32.xlu0 %v4244_v10  ;;  %2020 = vadd.xlane.f32.xlu1 %v2006_v33 }
 0x33b   : > { %2221 = vmatpush1.msra.mxu0 %v2116_v45  ;;  %2334 = vmatpush1.msra.mxu1 %v2118_v12  ;;  %v4283_v12 = vld [vmem:[%s4745_s8] ss:$0 sm:$0xff] }
 0x33c   : > { %2222 = vmatprep.subr.mxu0 %v2113_v46  ;;  %2335 = vmatprep.subr.mxu1 %v2115_v4 }
 0x33d   : > { %2223 = vmatpush1.msra.mxu0 %v2112_v51  ;;  %2336 = vmatpush1.msra.mxu1 %v2114_v15 }
 0x33e   : > { %1990 = vadd.xlane.f32.xlu0 %v4252_v34  ;;  %2022 = vadd.xlane.f32.xlu1 %v2007_v43 }
 0x33f   : > { %2224 = vmatprep.subr.mxu0 %v2109_v18  ;;  %2337 = vmatprep.subr.mxu1 %v2111_v20 }
 0x340   : > { %2225 = vmatpush1.msra.mxu0 %v2108_v55  ;;  %2338 = vmatpush1.msra.mxu1 %v2110_v21 }
 0x341   : > { %3041 = vmatprep.subr.mxu0 %v2611_v6 }
 0x3a9   : > { %v1977_v60 = vpop.xlane.xlu1 %1976 }
 0x3aa   : > { %v1992_v58 = vmul.f32 0.0078125, %v1977_v60 }
 0x3ab   : > { %v2009_v23 = vpop.xlane.xlu0 %2008 }
 0x3ac   : > { %v2032_v24 = vmul.f32 %v1992_v58, %v1992_v58  ;;  %v2024_v63 = vmul.f32 0.0078125, %v2009_v23  ;;  %v2048_v54 = vsub.f32 %v4188_v19, %v1992_v58 }
 0x3ae   : > { %v2040_v25 = vsub.f32 %v2024_v63, %v2032_v24  ;;  %v2595_v24 = vld [vmem:[#allocation7 + $0x78] sm:$0xff] }
 0x3af   : > { %v2011_v27 = vpop.xlane.xlu1 %2010  ;;  %v1979_v5 = vpop.xlane.xlu0 %1978 }
 0x3b0   : > { %v2056_v7 = vadd.f32 1e-05, %v2040_v25  ;;  %v1993_v61 = vmul.f32 0.0078125, %v1979_v5  ;;  %v2025_v8 = vmul.f32 0.0078125, %v2011_v27  ;;  %v2610_v27 = vld [vmem:[#allocation7 + $0xf0] sm:$0xff] }
 0x3b2   : > { %3312 = vrsqrt.f32 %v2056_v7  ;;  %v2033_v1 = vmul.f32 %v1993_v61, %v1993_v61  ;;  %v2049_v15 = vsub.f32 %v4210_v50, %v1993_v61 }
 0x3b3   : > { %v2013_v9 = vpop.xlane.xlu1 %2012  ;;  %v1981_v14 = vpop.xlane.xlu0 %1980 }
 0x3b4   : > { %v2041_v17 = vsub.f32 %v2025_v8, %v2033_v1  ;;  %v4258_v29 = vmul.f32 0.0078125, %v1981_v14  ;;  %v2026_v30 = vmul.f32 0.0078125, %v2013_v9  ;;  %v2594_v8 = vld [vmem:[#allocation7 + $0x70] sm:$0xff]  ;;  %v2609_v14 = vld [vmem:[#allocation7 + $0xe8] sm:$0xff] }
 0x3b6   : > { %v2057_v28 = vadd.f32 1e-05, %v2041_v17  ;;  %v2034_v33 = vmul.f32 %v4258_v29, %v4258_v29  ;;  %v2050_v5 = vsub.f32 %v4215_v44, %v4258_v29 }
 0x3b7   : > { %v2015_v31 = vpop.xlane.xlu1 %2014  ;;  %v1983_v35 = vpop.xlane.xlu0 %1982 }
 0x3b8   : > { %3314 = vrsqrt.f32 %v2057_v28  ;;  %v2042_v0 = vsub.f32 %v2026_v30, %v2034_v33  ;;  %v4262_v11 = vmul.f32 0.0078125, %v1983_v35  ;;  %v2027_v36 = vmul.f32 0.0078125, %v2015_v31 }
 0x3ba   : > { %v2058_v32 = vadd.f32 1e-05, %v2042_v0  ;;  %v2035_v37 = vmul.f32 %v4262_v11, %v4262_v11  ;;  %v2051_v31 = vsub.f32 %v4223_v40, %v4262_v11 }
 0x3bb   : > { %v2017_v43 = vpop.xlane.xlu1 %2016  ;;  %v1985_v38 = vpop.xlane.xlu0 %1984 }
 0x3bc   : > { %3316 = vrsqrt.f32 %v2058_v32  ;;  %v2043_v2 = vsub.f32 %v2027_v36, %v2035_v37  ;;  %v4266_v41 = vmul.f32 0.0078125, %v1985_v38  ;;  %v2028_v48 = vmul.f32 0.0078125, %v2017_v43  ;;  %v2593_v32 = vld [vmem:[#allocation7 + $0x68] sm:$0xff] }
 0x3be   : > { %v2059_v42 = vadd.f32 1e-05, %v2043_v2  ;;  %v2036_v49 = vmul.f32 %v4266_v41, %v4266_v41  ;;  %v2052_v11 = vsub.f32 %v4230_v13, %v4266_v41 }
 0x3bf   : > { %v3313_v53 = vpop.eup %3312  ;;  %v2019_v56 = vpop.xlane.xlu1 %2018 }
 0x3c0   : > { %v1987_v52 = vpop.xlane.xlu0 %1986  ;;  %3318 = vrsqrt.f32 %v2059_v42  ;;  %v2044_v57 = vsub.f32 %v2028_v48, %v2036_v49  ;;  %v2072_v39 = vmul.f32 %v3313_v53, %v2048_v54  ;;  %v2029_v47 = vmul.f32 0.0078125, %v2019_v56 }
 0x3c1   : > { %v4271_v59 = vmul.f32 0.0078125, %v1987_v52 }
 0x3c2   : > { %v2060_v3 = vadd.f32 1e-05, %v2044_v57  ;;  %v2086_v51 = vmul.f32 %v4276_v62, %v2072_v39 }
 0x3c3   : > { %v2037_v45 = vmul.f32 %v4271_v59, %v4271_v59  ;;  %v2021_v46 = vpop.xlane.xlu1 %2020  ;;  %v2053_v53 = vsub.f32 %v4236_v22, %v4271_v59 }
 0x3c4   : > { %v1989_v4 = vpop.xlane.xlu0 %1988  ;;  %3320 = vrsqrt.f32 %v2060_v3  ;;  %v2100_v21 = vadd.f32 %v4283_v12, %v2086_v51  ;;  %v2030_v58 = vmul.f32 0.0078125, %v2021_v46 }
 0x3c5   : > { %v2045_v18 = vsub.f32 %v2029_v47, %v2037_v45  ;;  %v4287_v20 = vmul.f32 0.0078125, %v1989_v4  ;;  %v3315_v55 = vpop.eup %3314 }
 0x3c6   : > { %v2073_v6 = vmul.f32 %v3315_v55, %v2049_v15  ;;  %2259 = vmatmul.mubr.f32.vlgmr.msra.gmra.mxu0 %v2100_v21  ;;  %2372 = vmatmul.mubr.f32.vlgmr.msra.gmra.mxu1 %v2100_v21  ;;  %v2608_v55 = vld [vmem:[#allocation7 + $0xe0] sm:$0xff]  ;;  %v4336_v21 = vld [vmem:[#allocation7 + $0x1f8] sm:$0xff] }
 0x3c7   : > { %v2061_v60 = vadd.f32 1e-05, %v2045_v18  ;;  %v2038_v23 = vmul.f32 %v4287_v20, %v4287_v20  ;;  %v2023_v63 = vpop.xlane.xlu1 %2022  ;;  %2264 = vmatprep.mubr.f32.mxu0 %v3557_v16  ;;  %2377 = vmatprep.mubr.f32.mxu1 %v3557_v16  ;;  %v2054_v57 = vsub.f32 %v4244_v10, %v4287_v20 }
 0x3c8   : > { %v1991_v25 = vpop.xlane.xlu0 %1990  ;;  %v2087_v9 = vmul.f32 %v4276_v62, %v2073_v6  ;;  %3042 = vmatpush3.msra.mxu0 %v2595_v24  ;;  %v2031_v30 = vmul.f32 0.0078125, %v2023_v63  ;;  %3153 = vmatprep.subr.mxu1 %v4336_v21  ;;  %v2592_v6 = vld [vmem:[#allocation7 + $0x60] sm:$0xff]  ;;  %v4348_v24 = vld [vmem:[#allocation7 + $0x1e8] sm:$0xff]  ;;  %v2590_v63 = vld [vmem:[#allocation7 + $0x50] sm:$0xff] }
 0x3c9   : > { %3322 = vrsqrt.f32 %v2061_v60  ;;  %v2046_v7 = vsub.f32 %v2030_v58, %v2038_v23  ;;  %v4294_v61 = vmul.f32 0.0078125, %v1991_v25  ;;  %v3317_v1 = vpop.eup %3316  ;;  %3043 = vmatprep.subr.mxu0 %v2610_v27  ;;  %v4339_v60 = vld [vmem:[#allocation7 + $0x178] sm:$0xff]  ;;  %v4342_v58 = vld [vmem:[#allocation7 + $0x1f0] sm:$0xff]  ;;  %v4351_v25 = vld [vmem:[#allocation7 + $0x168] sm:$0xff] }
 0x3ca   : > { %v2074_v17 = vmul.f32 %v3317_v1, %v2050_v5  ;;  %v2101_v33 = vadd.f32 %v4283_v12, %v2087_v9  ;;  %3044 = vmatpush3.msra.mxu0 %v2594_v8  ;;  %3169 = vmatpush3.msra.mxu1 %v4339_v60  ;;  %v2606_v23 = vld [vmem:[#allocation7 + $0xd0] sm:$0xff]  ;;  %v2605_v27 = vld [vmem:[#allocation7 + $0xc8] sm:$0xff]  ;;  %v4354_v5 = vld [vmem:[#allocation7 + $0x1e0] sm:$0xff] }
 0x3cb   : > { %v2062_v28 = vadd.f32 1e-05, %v2046_v7  ;;  %v2039_v29 = vmul.f32 %v4294_v61, %v4294_v61  ;;  %3045 = vmatprep.subr.mxu0 %v2609_v14  ;;  %v2055_v45 = vsub.f32 %v4252_v34, %v4294_v61  ;;  %3154 = vmatprep.subr.mxu1 %v4342_v58  ;;  %v2589_v7 = vld [vmem:[#allocation7 + $0x48] sm:$0xff]  ;;  %v4357_v61 = vld [vmem:[#allocation7 + $0x160] sm:$0xff]  ;;  %v4360_v1 = vld [vmem:[#allocation7 + $0x1d8] sm:$0xff] }
 0x3cc   : > { %v2088_v0 = vmul.f32 %v4276_v62, %v2074_v17  ;;  %2265 = vmatmul.mubr.f32.gmra.mxu0 %v2101_v33  ;;  %2378 = vmatmul.mubr.f32.gmra.mxu1 %v2101_v33  ;;  %v2604_v8 = vld [vmem:[#allocation7 + $0xc0] sm:$0xff]  ;;  %v4363_v14 = vld [vmem:[#allocation7 + $0x158] sm:$0xff]  ;;  %v2602_v33 = vld [vmem:[#allocation7 + $0xb0] sm:$0xff] }
 0x3cd   : > { %3324 = vrsqrt.f32 %v2062_v28  ;;  %v2047_v35 = vsub.f32 %v2031_v30, %v2039_v29  ;;  %v3319_v36 = vpop.eup %3318  ;;  %2270 = vmatprep.mubr.f32.mxu0 %v3557_v16  ;;  %2383 = vmatprep.mubr.f32.mxu1 %v3557_v16  ;;  %v2588_v9 = vld [vmem:[#allocation7 + $0x40] sm:$0xff]  ;;  %v2603_v17 = vld [vmem:[#allocation7 + $0xb8] sm:$0xff]  ;;  %v4366_v28 = vld [vmem:[#allocation7 + $0x1d0] sm:$0xff] }
 0x3ce   : > { %v2075_v37 = vmul.f32 %v3319_v36, %v2051_v31  ;;  %v2102_v38 = vadd.f32 %v4283_v12, %v2088_v0  ;;  %3046 = vmatpush3.msra.mxu0 %v2593_v32  ;;  %v2587_v30 = vld [vmem:[#allocation7 + $0x38] sm:$0xff]  ;;  %v4369_v29 = vld [vmem:[#allocation7 + $0x150] sm:$0xff]  ;;  %v4372_v31 = vld [vmem:[#allocation7 + $0x1c8] sm:$0xff] }
 0x3cf   : > { %v2063_v43 = vadd.f32 1e-05, %v2047_v35  ;;  %3047 = vmatprep.subr.mxu0 %v2608_v55  ;;  %v2586_v35 = vld [vmem:[#allocation7 + $0x30] sm:$0xff]  ;;  %v4375_v0 = vld [vmem:[#allocation7 + $0x148] sm:$0xff]  ;;  %v4378_v36 = vld [vmem:[#allocation7 + $0x1c0] sm:$0xff] }
 0x3d0   : > { %v2089_v2 = vmul.f32 %v4276_v62, %v2075_v37  ;;  %2271 = vmatmul.mubr.f32.gmra.mxu0 %v2102_v38  ;;  %2384 = vmatmul.mubr.f32.gmra.mxu1 %v2102_v38  ;;  %v2601_v32 = vld [vmem:[#allocation7 + $0xa8] sm:$0xff]  ;;  %v2600_v38 = vld [vmem:[#allocation7 + $0xa0] sm:$0xff] }
 0x3d1   : > { %3326 = vrsqrt.f32 %v2063_v43  ;;  %v3321_v42 = vpop.eup %3320  ;;  %2276 = vmatprep.mubr.f32.mxu0 %v3557_v16  ;;  %2389 = vmatprep.mubr.f32.mxu1 %v3557_v16  ;;  %v2585_v37 = vld [vmem:[#allocation7 + $0x28] sm:$0xff]  ;;  %v4381_v43 = vld [vmem:[#allocation7 + $0x140] sm:$0xff] }
 0x3d2   : > { %v2076_v48 = vmul.f32 %v3321_v42, %v2052_v11  ;;  %v2103_v49 = vadd.f32 %v4283_v12, %v2089_v2  ;;  %3048 = vmatpush3.msra.mxu0 %v2592_v6  ;;  %v4384_v11 = vld [vmem:[#allocation7 + $0x1b8] sm:$0xff]  ;;  %v2584_v2 = vld [vmem:[#allocation7 + $0x20] sm:$0xff]  ;;  %v4424_v55 = vld [vmem:[#allocation7 + $0x108] sm:$0xff] }
 0x3d3   : > { %v4387_v42 = vld [vmem:[#allocation7 + $0x138] sm:$0xff]  ;;  %4829 = vst [vmem:[#allocation36_spill] sm:$0xff] %v4424_v55  ;;  %v4427_v6 = vld [vmem:[#allocation7 + $0x180] sm:$0xff] }
 0x3d4   : > { %v2090_v54 = vmul.f32 %v4276_v62, %v2076_v48  ;;  %2277 = vmatmul.mubr.f32.gmra.mxu0 %v2103_v49  ;;  %2390 = vmatmul.mubr.f32.gmra.mxu1 %v2103_v49  ;;  %v2599_v48 = vld [vmem:[#allocation7 + $0x98] sm:$0xff]  ;;  %v4390_v49 = vld [vmem:[#allocation7 + $0x1b0] sm:$0xff]  ;;  %4830 = vst [vmem:[#allocation37_spill] sm:$0xff] %v4427_v6 }
 0x3d5   : > { %2282 = vmatprep.mubr.f32.mxu0 %v3557_v16  ;;  %2395 = vmatprep.mubr.f32.mxu1 %v3557_v16  ;;  %4818 = vst [vmem:[#allocation25_spill] sm:$0xff] %v4390_v49 }
 0x3d6   : > { %v3323_v56 = vpop.eup %3322  ;;  %v2104_v52 = vadd.f32 %v4283_v12, %v2090_v54  ;;  %v4393_v54 = vld [vmem:[#allocation7 + $0x130] sm:$0xff] }
 0x3d7   : > { %v2077_v41 = vmul.f32 %v3323_v56, %v2053_v53  ;;  %v2583_v53 = vld [vmem:[#allocation7 + $0x18] sm:$0xff]  ;;  %4819 = vst [vmem:[#allocation26_spill] sm:$0xff] %v4393_v54  ;;  %v2598_v56 = vld [vmem:[#allocation7 + $0x90] sm:$0xff] }
 0x3d8   : > { %2283 = vmatmul.mubr.f32.gmra.mxu0 %v2104_v52  ;;  %2396 = vmatmul.mubr.f32.gmra.mxu1 %v2104_v52  ;;  %v2582_v52 = vld [vmem:[#allocation7 + $0x10] sm:$0xff] }
 0x3d9   : > { %v2091_v39 = vmul.f32 %v4276_v62, %v2077_v41  ;;  %2288 = vmatprep.mubr.f32.mxu0 %v3557_v16  ;;  %2401 = vmatprep.mubr.f32.mxu1 %v3557_v16  ;;  %v4396_v41 = vld [vmem:[#allocation7 + $0x1a8] sm:$0xff] }
 0x3da   : > { %v3325_v3 = vpop.eup %3324  ;;  %4820 = vst [vmem:[#allocation27_spill] sm:$0xff] %v4396_v41 }
 0x3db   : > { %v2078_v59 = vmul.f32 %v3325_v3, %v2054_v57  ;;  %v2105_v47 = vadd.f32 %v4283_v12, %v2091_v39  ;;  %v4399_v57 = vld [vmem:[#allocation7 + $0x128] sm:$0xff]  ;;  %v4402_v3 = vld [vmem:[#allocation7 + $0x1a0] sm:$0xff] }
 0x3dc   : > { %4821 = vst [vmem:[#allocation28_spill] sm:$0xff] %v4399_v57  ;;  %v2597_v39 = vld [vmem:[#allocation7 + $0x88] sm:$0xff]  ;;  %4822 = vst [vmem:[#allocation29_spill] sm:$0xff] %v4402_v3 }
 0x3dd   : > { %v2092_v46 = vmul.f32 %v4276_v62, %v2078_v59  ;;  %2289 = vmatmul.mubr.f32.gmra.mxu0 %v2105_v47  ;;  %2402 = vmatmul.mubr.f32.gmra.mxu1 %v2105_v47  ;;  %v2581_v59 = vld [vmem:[#allocation7 + $0x8] sm:$0xff]  ;;  %v4405_v47 = vld [vmem:[#allocation7 + $0x120] sm:$0xff] }
 0x3de   : > { %v3327_v4 = vpop.eup %3326  ;;  %2294 = vmatprep.mubr.f32.mxu0 %v3557_v16  ;;  %2407 = vmatprep.mubr.f32.mxu1 %v3557_v16  ;;  %4823 = vst [vmem:[#allocation30_spill] sm:$0xff] %v4405_v47 }
 0x3df   : > { %v2079_v51 = vmul.f32 %v3327_v4, %v2055_v45  ;;  %v2106_v15 = vadd.f32 %v4283_v12, %v2092_v46  ;;  %v2596_v45 = vld [vmem:[#allocation7 + $0x80] sm:$0xff]  ;;  %v4408_v46 = vld [vmem:[#allocation7 + $0x198] sm:$0xff] }
 0x3e0   : > { %4824 = vst [vmem:[#allocation31_spill] sm:$0xff] %v4408_v46  ;;  %v2580_v4 = vld [vmem:[#allocation7] sm:$0xff] }
 0x3e1   : > { %v2093_v18 = vmul.f32 %v4276_v62, %v2079_v51  ;;  %2295 = vmatmul.mubr.f32.gmra.mxu0 %v2106_v15  ;;  %2408 = vmatmul.mubr.f32.gmra.mxu1 %v2106_v15  ;;  %v2607_v62 = vld [vmem:[#allocation7 + $0xd8] sm:$0xff]  ;;  %v4415_v15 = vld [vmem:[#allocation7 + $0x190] sm:$0xff] }
 0x3e2   : > { %2300 = vmatprep.mubr.f32.mxu0 %v3557_v16  ;;  %2413 = vmatprep.mubr.f32.mxu1 %v3557_v16  ;;  %v2591_v16 = vld [vmem:[#allocation7 + $0x58] sm:$0xff]  ;;  %4826 = vst [vmem:[#allocation33_spill] sm:$0xff] %v4415_v15 }
 0x3e3   : > { %v2107_v20 = vadd.f32 %v4283_v12, %v2093_v18  ;;  %3049 = vmatprep.subr.mxu0 %v2607_v62  ;;  %v4345_v12 = vld [vmem:[#allocation7 + $0x170] sm:$0xff]  ;;  %v4411_v51 = vld [vmem:[#allocation7 + $0x118] sm:$0xff]  ;;  %v2176_v62 = vsub.s32 0, %v3898_v26 }
 0x3e4   : > { %3050 = vmatpush3.msra.mxu0 %v2591_v16  ;;  %3170 = vmatpush3.msra.mxu1 %v4345_v12  ;;  %4825 = vst [vmem:[#allocation32_spill] sm:$0xff] %v4411_v51  ;;  %v4418_v18 = vld [vmem:[#allocation7 + $0x110] sm:$0xff]  ;;  %v2172_v16 = vld [vmem:[%s4747_s10] sm:$0xf] }
 0x3e5   : > { %2301 = vmatmul.mubr.f32.gmra.mxu0 %v2107_v20  ;;  %2414 = vmatmul.mubr.f32.gmra.mxu1 %v2107_v20  ;;  %4827 = vst [vmem:[#allocation34_spill] sm:$0xff] %v4418_v18  ;;  %v4421_v20 = vld [vmem:[#allocation7 + $0x188] sm:$0xff] }
 0x3e6   : > { %3051 = vmatprep.subr.mxu0 %v2606_v23  ;;  %3155 = vmatprep.subr.mxu1 %v4348_v24  ;;  %4828 = vst [vmem:[#allocation35_spill] sm:$0xff] %v4421_v20  ;;  %v2180_v23 = vsub.s32 1, %v3898_v26 }
 0x3e7   : > { %3052 = vmatpush3.msra.mxu0 %v2590_v63  ;;  %3171 = vmatpush3.msra.mxu1 %v4351_v25  ;;  %v4438_v63 = vrot.slane %v2172_v16, %v2176_v62 }
 0x3e8   : > { %3053 = vmatprep.subr.mxu0 %v2605_v27  ;;  %3156 = vmatprep.subr.mxu1 %v4354_v5  ;;  %v2184_v27 = vsub.s32 2, %v3898_v26 }
 0x3e9   : > { %3054 = vmatpush3.msra.mxu0 %v2589_v7  ;;  %3172 = vmatpush3.msra.mxu1 %v4357_v61 }
 0x3ea   : > { %3055 = vmatprep.subr.mxu0 %v2604_v8  ;;  %3157 = vmatprep.subr.mxu1 %v4360_v1 }
 0x3eb   : > { %3056 = vmatpush3.msra.mxu0 %v2588_v9  ;;  %3173 = vmatpush3.msra.mxu1 %v4363_v14  ;;  %v4441_v9 = vrot.slane %v2172_v16, %v2180_v23 }
 0x3ec   : > { %3057 = vmatprep.subr.mxu0 %v2603_v17  ;;  %3158 = vmatprep.subr.mxu1 %v4366_v28 }
 0x3ed   : > { %3058 = vmatpush3.msra.mxu0 %v2587_v30  ;;  %3174 = vmatpush3.msra.mxu1 %v4369_v29 }
 0x3ee   : > { %3059 = vmatprep.subr.mxu0 %v2602_v33  ;;  %3159 = vmatprep.subr.mxu1 %v4372_v31  ;;  %v4444_v33 = vrot.slane %v2172_v16, %v2184_v27 }
 0x3ef   : > { %3060 = vmatpush3.msra.mxu0 %v2586_v35  ;;  %3175 = vmatpush3.msra.mxu1 %v4375_v0 }
 0x3f0   : > { %3061 = vmatprep.subr.mxu0 %v2601_v32  ;;  %3160 = vmatprep.subr.mxu1 %v4378_v36 }
 0x3f1   : > { %3062 = vmatpush3.msra.mxu0 %v2585_v37  ;;  %3176 = vmatpush3.msra.mxu1 %v4381_v43 }
 0x3f2   : > { %3063 = vmatprep.subr.mxu0 %v2600_v38  ;;  %3161 = vmatprep.subr.mxu1 %v4384_v11  ;;  %v2188_v38 = vsub.s32 3, %v3898_v26 }
 0x3f3   : > { %3064 = vmatpush3.msra.mxu0 %v2584_v2  ;;  %3177 = vmatpush3.msra.mxu1 %v4387_v42 }
 0x3f4   : > { %3065 = vmatprep.subr.mxu0 %v2599_v48  ;;  %3162 = vmatprep.subr.mxu1 %v4390_v49 }
 0x3f5   : > { %3066 = vmatpush3.msra.mxu0 %v2583_v53  ;;  %3178 = vmatpush3.msra.mxu1 %v4393_v54 }
 0x3f6   : > { %3067 = vmatprep.subr.mxu0 %v2598_v56  ;;  %3163 = vmatprep.subr.mxu1 %v4396_v41 }
 0x3f7   : > { %3068 = vmatpush3.msra.mxu0 %v2582_v52  ;;  %3179 = vmatpush3.msra.mxu1 %v4399_v57 }
 0x3f8   : > { %3069 = vmatprep.subr.mxu0 %v2597_v39  ;;  %3164 = vmatprep.subr.mxu1 %v4402_v3 }
 0x3f9   : > { %3070 = vmatpush3.msra.mxu0 %v2581_v59  ;;  %3180 = vmatpush3.msra.mxu1 %v4405_v47 }
 0x3fa   : > { %3071 = vmatprep.subr.mxu0 %v2596_v45  ;;  %3165 = vmatprep.subr.mxu1 %v4408_v46  ;;  %v4454_v45 = vrot.slane %v2172_v16, %v2188_v38 }
 0x3fb   : > { %3072 = vmatpush3.msra.mxu0 %v2580_v4  ;;  %3181 = vmatpush3.msra.mxu1 %v4411_v51 }
 0x3fc   : > { %3097 = vmatprep.subr.mxu0 %v4336_v21  ;;  %3166 = vmatprep.subr.mxu1 %v4415_v15  ;;  %v4430_v21 = vld [vmem:[#allocation7 + $0x100] sm:$0xff] }
 0x3fd   : > { %3182 = vmatpush3.msra.mxu1 %v4418_v18  ;;  %4831 = vst [vmem:[#allocation38_spill] sm:$0xff] %v4430_v21 }
 0x3fe   : > { %3167 = vmatprep.subr.mxu1 %v4421_v20 }
 0x3ff   : > { %3183 = vmatpush3.msra.mxu1 %v4424_v55 }
 0x400   : > { %3168 = vmatprep.subr.mxu1 %v4427_v6 }
 0x401   : > { %3184 = vmatpush3.msra.mxu1 %v4430_v21 }
 0x486   : > { %v2260_v7 = vpop.f32.mrf.mxu0  ;;  %v2373_v8 = vpop.f32.mrf.mxu1 }
 0x487   : > { %v2261_v17 = vadd.f32 %v2260_v7, %v4438_v63  ;;  %v4449_v56 = vadd.f32 %v2373_v8, %v4444_v33 }
 0x488   : > { %v2262_v30 = vpop.f32.mrf.mxu0  ;;  %v2375_v37 = vpop.f32.mrf.mxu1 }
 0x489   : > { %v2452_v35 = vmul.f32 0.70710677, %v2261_v17  ;;  %v2263_v32 = vadd.f32 %v2262_v30, %v4441_v9  ;;  %4832 = vst [vmem:[#allocation39_spill] sm:$0xff] %v4449_v56  ;;  %v2454_v27 = vmul.f32 0.70710677, %v4449_v56  ;;  %v4478_v13 = vadd.f32 %v2375_v37, %v4454_v45 }
 0x48b   : > { %v2453_v2 = vmul.f32 0.70710677, %v2263_v32  ;;  %3328 = verf.f32 %v2452_v35  ;;  %4833 = vst [vmem:[#allocation40_spill] sm:$0xff] %v4478_v13  ;;  %v2421_v50 = vmul.f32 0.5, %v2263_v32  ;;  %v4494_v55 = vmul.f32 0.70710677, %v4478_v13 }
 0x48c   : > { %v2266_v48 = vpop.f32.mrf.mxu0  ;;  %v2379_v53 = vpop.f32.mrf.mxu1 }
 0x48d   : > { %v4452_v52 = vadd.f32 %v2379_v53, %v4444_v33  ;;  %3330 = verf.f32 %v2453_v2  ;;  %v2267_v4 = vadd.f32 %v2266_v48, %v4438_v63 }
 0x48e   : > { %v2268_v39 = vpop.f32.mrf.mxu0  ;;  %v2381_v59 = vpop.f32.mrf.mxu1  ;;  %3332 = verf.f32 %v2454_v27 }
 0x48f   : > { %v2269_v62 = vadd.f32 %v2268_v39, %v4441_v9  ;;  %v2382_v7 = vadd.f32 %v2381_v59, %v4454_v45  ;;  %v2458_v8 = vmul.f32 0.70710677, %v4452_v52  ;;  %v2456_v2 = vmul.f32 0.70710677, %v2267_v4 }
 0x490   : > { %v2272_v26 = vpop.f32.mrf.mxu0  ;;  %v2385_v23 = vpop.f32.mrf.mxu1 }
 0x491   : > { %v4462_v30 = vadd.f32 %v2272_v26, %v4438_v63  ;;  %v4465_v16 = vadd.f32 %v2385_v23, %v4444_v33  ;;  %v2457_v38 = vmul.f32 0.70710677, %v2269_v62  ;;  %v2459_v34 = vmul.f32 0.70710677, %v2382_v7 }
 0x492   : > { %v2274_v35 = vpop.f32.mrf.mxu0  ;;  %v2387_v53 = vpop.f32.mrf.mxu1  ;;  %3334 = verf.f32 %v2458_v8  ;;  %v4516_v15 = vmul.f32 0.5, %v2269_v62  ;;  %v4518_v13 = vmul.f32 0.5, %v2382_v7 }
 0x493   : > { %v4468_v48 = vadd.f32 %v2274_v35, %v4441_v9  ;;  %v4471_v59 = vadd.f32 %v2387_v53, %v4454_v45  ;;  %v2460_v26 = vmul.f32 0.70710677, %v4462_v30  ;;  %3336 = verf.f32 %v2456_v2 }
 0x494   : > { %v2278_v39 = vpop.f32.mrf.mxu0  ;;  %v2391_v19 = vpop.f32.mrf.mxu1  ;;  %v2462_v35 = vmul.f32 0.70710677, %v4465_v16  ;;  %3338 = verf.f32 %v2457_v38  ;;  %v2420_v2 = vmul.f32 0.5, %v2261_v17  ;;  %v4527_v7 = vmul.f32 0.5, %v4462_v30 }
 0x495   : > { %v4475_v10 = vadd.f32 %v2278_v39, %v4438_v63  ;;  %v2461_v27 = vmul.f32 0.70710677, %v4468_v48  ;;  %v4483_v53 = vadd.f32 %v2391_v19, %v4444_v33  ;;  %3340 = verf.f32 %v2459_v34 }
 0x496   : > { %v2280_v22 = vpop.f32.mrf.mxu0  ;;  %v2393_v23 = vpop.f32.mrf.mxu1  ;;  %v2463_v44 = vmul.f32 0.70710677, %v4471_v59  ;;  %3342 = verf.f32 %v2460_v26  ;;  %v4545_v41 = vmul.f32 0.5, %v4468_v48 }
 0x497   : > { %v4486_v8 = vadd.f32 %v2280_v22, %v4441_v9  ;;  %v4490_v37 = vadd.f32 %v2393_v23, %v4454_v45  ;;  %v2464_v38 = vmul.f32 0.70710677, %v4475_v10  ;;  %v4496_v22 = vmul.f32 0.5, %v2267_v4 }
 0x498   : > { %v2284_v40 = vpop.f32.mrf.mxu0  ;;  %v2397_v39 = vpop.f32.mrf.mxu1  ;;  %3344 = verf.f32 %v2462_v35  ;;  %v2466_v23 = vmul.f32 0.70710677, %v4483_v53 }
 0x499   : > { %v3329_v19 = vpop.eup %3328  ;;  %v2465_v34 = vmul.f32 0.70710677, %v4486_v8  ;;  %3346 = verf.f32 %v2461_v27  ;;  %v2467_v17 = vmul.f32 0.70710677, %v4490_v37  ;;  %v4502_v32 = vadd.f32 %v2284_v40, %v4438_v63 }
 0x49a   : > { %v2286_v21 = vpop.f32.mrf.mxu0  ;;  %v2399_v6 = vpop.f32.mrf.mxu1  ;;  %3348 = verf.f32 %v2463_v44  ;;  %v4505_v18 = vadd.f32 %v2397_v39, %v4444_v33  ;;  %v4514_v27 = vmul.f32 0.5, %v4452_v52  ;;  %v2516_v44 = vadd.f32 1.0, %v3329_v19 }
 0x49b   : > { %v3331_v20 = vpop.eup %3330  ;;  %v4508_v4 = vadd.f32 %v2286_v21, %v4441_v9  ;;  %v4511_v35 = vadd.f32 %v2399_v6, %v4454_v45  ;;  %3350 = verf.f32 %v2464_v38  ;;  %v2468_v21 = vmul.f32 0.70710677, %v4502_v32 }
 0x49c   : > { %3352 = verf.f32 %v2465_v34  ;;  %v2517_v46 = vadd.f32 1.0, %v3331_v20  ;;  %v2470_v38 = vmul.f32 0.70710677, %v4505_v18  ;;  %v4533_v20 = vpop.eup %3332  ;;  %v4536_v34 = vmul.f32 0.5, %v4465_v16 }
 0x49d   : > { %v2290_v26 = vpop.f32.mrf.mxu0  ;;  %v2403_v56 = vpop.f32.mrf.mxu1  ;;  %v2469_v39 = vmul.f32 0.70710677, %v4508_v4  ;;  %3354 = verf.f32 %v2467_v17  ;;  %v2471_v6 = vmul.f32 0.70710677, %v4511_v35  ;;  %4834 = vst [vmem:[#allocation41_spill] sm:$0xff] %v4533_v20  ;;  %v2548_v57 = vmul.f32 %v2516_v44, %v2420_v2 }
 0x49e   : > { %v4524_v52 = vadd.f32 %v2290_v26, %v4438_v63  ;;  %3356 = verf.f32 %v2466_v23  ;;  %v4531_v19 = vadd.f32 %v2403_v56, %v4444_v33  ;;  %v2549_v56 = vmul.f32 %v2517_v46, %v2421_v50 }
 0x49f   : > { %v2292_v40 = vpop.f32.mrf.mxu0  ;;  %v2405_v51 = vpop.f32.mrf.mxu1  ;;  %3358 = verf.f32 %v2469_v39 }
 0x4a0   : > { %v4539_v17 = vadd.f32 %v2292_v40, %v4441_v9  ;;  %v4542_v26 = vadd.f32 %v2405_v51, %v4454_v45  ;;  %v3335_v23 = vpop.eup %3334  ;;  %3360 = verf.f32 %v2471_v6  ;;  %v2472_v16 = vmul.f32 0.70710677, %v4524_v52  ;;  %2715 = vmatprep.mubr.f32.mxu0 %v2549_v56 }
 0x4a1   : > { %v2296_v62 = vpop.f32.mrf.mxu0  ;;  %v2409_v47 = vpop.f32.mrf.mxu1  ;;  %3362 = verf.f32 %v2468_v21  ;;  %v2474_v49 = vmul.f32 0.70710677, %v4531_v19  ;;  %v2522_v44 = vadd.f32 1.0, %v3335_v23  ;;  %v4558_v21 = vmul.f32 0.5, %v4471_v59  ;;  %2716 = vmatmul.mubr.f32.vlgmr.msra.gmra.mxu0 %v2548_v57 }
 0x4a2   : > { %v3337_v20 = vpop.eup %3336  ;;  %v2473_v39 = vmul.f32 0.70710677, %v4539_v17  ;;  %v4550_v40 = vadd.f32 %v2296_v62, %v4438_v63  ;;  %3364 = verf.f32 %v2470_v38  ;;  %v2475_v2 = vmul.f32 0.70710677, %v4542_v26  ;;  %3098 = vmatpush3.msra.mxu0 %v4339_v60 }
 0x4a3   : > { %v2298_v30 = vpop.f32.mrf.mxu0  ;;  %v2411_v3 = vpop.f32.mrf.mxu1  ;;  %v4555_v48 = vadd.f32 %v2409_v47, %v4444_v33  ;;  %v4564_v38 = vmul.f32 0.5, %v4475_v10  ;;  %3099 = vmatprep.subr.mxu0 %v4342_v58 }
 0x4a4   : > { %4835 = vst [vmem:[#allocation42_spill] sm:$0xff] %v4550_v40  ;;  %v3339_v54 = vpop.eup %3338  ;;  %3366 = verf.f32 %v2473_v39  ;;  %v4561_v6 = vadd.f32 %v2298_v30, %v4441_v9  ;;  %v4567_v56 = vadd.f32 %v2411_v3, %v4454_v45  ;;  %v2476_v57 = vmul.f32 0.70710677, %v4550_v40  ;;  %3100 = vmatpush3.msra.mxu0 %v4345_v12 }
 0x4a5   : > { %v2302_v51 = vpop.f32.mrf.mxu0  ;;  %4836 = vst [vmem:[#allocation43_spill] sm:$0xff] %v4555_v48  ;;  %v2415_v50 = vpop.f32.mrf.mxu1  ;;  %3368 = verf.f32 %v2475_v2  ;;  %v2521_v23 = vadd.f32 1.0, %v3339_v54  ;;  %v2478_v3 = vmul.f32 0.70710677, %v4555_v48  ;;  %v2433_v40 = vmul.f32 0.5, %v4486_v8  ;;  %3101 = vmatprep.subr.mxu0 %v4348_v24 }
 0x4a6   : > { %v3341_v46 = vpop.eup %3340  ;;  %v4571_v47 = vadd.f32 %v2302_v51, %v4438_v63  ;;  %3370 = verf.f32 %v2472_v16  ;;  %v2477_v30 = vmul.f32 0.70710677, %v4561_v6  ;;  %v2479_v2 = vmul.f32 0.70710677, %v4567_v56  ;;  %3102 = vmatpush3.msra.mxu0 %v4351_v25 }
 0x4a7   : > { %v3343_v62 = vpop.eup %3342  ;;  %v2304_v10 = vpop.f32.mrf.mxu0  ;;  %3372 = verf.f32 %v2474_v49  ;;  %v4579_v60 = vadd.f32 %v2415_v50, %v4444_v33  ;;  %v2554_v51 = vmul.f32 %v2522_v44, %v4514_v27  ;;  %v2553_v54 = vmul.f32 %v2521_v23, %v4516_v15  ;;  %3103 = vmatprep.subr.mxu0 %v4354_v5 }
 0x4a8   : > { %v3345_v59 = vpop.eup %3344  ;;  %v2417_v63 = vpop.f32.mrf.mxu1  ;;  %3374 = verf.f32 %v2477_v30  ;;  %v2480_v58 = vmul.f32 0.70710677, %v4571_v47  ;;  %v2523_v48 = vadd.f32 1.0, %v3341_v46  ;;  %v4588_v33 = vadd.f32 %v2304_v10, %v4441_v9  ;;  %3104 = vmatpush3.msra.mxu0 %v4357_v61 }
 0x4a9   : > { %v3347_v39 = vpop.eup %3346  ;;  %3376 = verf.f32 %v2479_v2  ;;  %v4592_v27 = vadd.f32 %v2417_v63, %v4454_v45  ;;  %v2520_v8 = vadd.f32 1.0, %v3337_v20  ;;  %v2482_v44 = vmul.f32 0.70710677, %v4579_v60  ;;  %2720 = vmatprep.mubr.f32.mxu0 %v2553_v54  ;;  %3105 = vmatprep.subr.mxu0 %v4360_v1 }
 0x4aa   : > { %v3349_v16 = vpop.eup %3348  ;;  %3378 = verf.f32 %v2476_v57  ;;  %v2525_v50 = vadd.f32 1.0, %v3347_v39  ;;  %v2555_v15 = vmul.f32 %v2523_v48, %v4518_v13  ;;  %v2481_v9 = vmul.f32 0.70710677, %v4588_v33  ;;  %3106 = vmatpush3.msra.mxu0 %v4363_v14 }
 0x4ab   : > { %v3351_v49 = vpop.eup %3350  ;;  %3380 = verf.f32 %v2478_v3  ;;  %v2483_v45 = vmul.f32 0.70710677, %v4592_v27  ;;  %v2552_v20 = vmul.f32 %v2520_v8, %v4496_v22  ;;  %v2527_v57 = vadd.f32 1.0, %v3349_v16  ;;  %3107 = vmatprep.subr.mxu0 %v4366_v28 }
 0x4ac   : > { %v3353_v12 = vpop.eup %3352  ;;  %3382 = verf.f32 %v2480_v58  ;;  %v2557_v5 = vmul.f32 %v2525_v50, %v4545_v41  ;;  %2825 = vmatprep.mubr.f32.mxu1 %v2555_v15  ;;  %v2524_v30 = vadd.f32 1.0, %v3343_v62  ;;  %v2526_v13 = vadd.f32 1.0, %v3345_v59  ;;  %3108 = vmatpush3.msra.mxu0 %v4369_v29 }
 0x4ad   : > { %v3355_v24 = vpop.eup %3354  ;;  %3384 = verf.f32 %v2481_v9  ;;  %v2435_v61 = vmul.f32 0.5, %v4490_v37  ;;  %2721 = vmatmul.mubr.f32.gmra.mxu0 %v2552_v20  ;;  %2826 = vmatmul.mubr.f32.vlgmr.msra.gmra.mxu1 %v2554_v51  ;;  %v2529_v23 = vadd.f32 1.0, %v3353_v12  ;;  %v2559_v1 = vmul.f32 %v2527_v57, %v4558_v21 }
 0x4ae   : > { %v3357_v25 = vpop.eup %3356  ;;  %3386 = verf.f32 %v2483_v45  ;;  %v2531_v22 = vadd.f32 1.0, %v3355_v24  ;;  %2725 = vmatprep.mubr.f32.mxu0 %v2557_v5  ;;  %v2556_v41 = vmul.f32 %v2524_v30, %v4527_v7  ;;  %v2528_v62 = vadd.f32 1.0, %v3351_v49  ;;  %3109 = vmatprep.subr.mxu0 %v4372_v31  ;;  %v4837_v30 = vld [vmem:[#allocation25_spill] sm:$0xff] }
 0x4af   : > { %v3359_v46 = vpop.eup %3358  ;;  %v2530_v39 = vadd.f32 1.0, %v3357_v25  ;;  %v2558_v59 = vmul.f32 %v2526_v13, %v4536_v34  ;;  %v2561_v37 = vmul.f32 %v2529_v23, %v2433_v40  ;;  %v2434_v16 = vmul.f32 0.5, %v4483_v53  ;;  %2830 = vmatprep.mubr.f32.mxu1 %v2559_v1  ;;  %3110 = vmatpush3.msra.mxu0 %v4375_v0  ;;  %v4840_v1 = vld [vmem:[#allocation42_spill] sm:$0xff] }
 0x4b0   : > { %v3361_v48 = vpop.eup %3360  ;;  %v2563_v3 = vmul.f32 %v2531_v22, %v2435_v61  ;;  %v2533_v2 = vadd.f32 1.0, %v3359_v46  ;;  %v2437_v51 = vmul.f32 0.5, %v4508_v4  ;;  %3388 = verf.f32 %v2482_v44  ;;  %3111 = vmatprep.subr.mxu0 %v4378_v36  ;;  %v4838_v61 = vld [vmem:[#allocation26_spill] sm:$0xff]  ;;  %v4839_v22 = vld [vmem:[#allocation27_spill] sm:$0xff] }
 0x4b1   : > { %v3363_v10 = vpop.eup %3362  ;;  %v2535_v28 = vadd.f32 1.0, %v3361_v48  ;;  %3390 = verf.f32 %v4494_v55  ;;  %v2439_v34 = vmul.f32 0.5, %v4511_v35  ;;  %2726 = vmatmul.mubr.f32.gmra.mxu0 %v2556_v41  ;;  %2831 = vmatmul.mubr.f32.gmra.mxu1 %v2558_v59  ;;  %v2560_v40 = vmul.f32 %v2528_v62, %v4564_v38 }
 0x4b2   : > { %v3365_v14 = vpop.eup %3364  ;;  %2730 = vmatprep.mubr.f32.mxu0 %v2561_v37  ;;  %2835 = vmatprep.mubr.f32.mxu1 %v2563_v3  ;;  %v2562_v53 = vmul.f32 %v2530_v39, %v2434_v16  ;;  %v2565_v21 = vmul.f32 %v2533_v2, %v2437_v51  ;;  %v2532_v49 = vadd.f32 1.0, %v3363_v10  ;;  %v2441_v35 = vmul.f32 0.5, %v4539_v17  ;;  %v4842_v3 = vld [vmem:[#allocation28_spill] sm:$0xff]  ;;  %v4843_v2 = vld [vmem:[#allocation29_spill] sm:$0xff] }
 0x4b3   : > { %v3367_v63 = vpop.eup %3366  ;;  %v2567_v31 = vmul.f32 %v2535_v28, %v2439_v34  ;;  %v2534_v54 = vadd.f32 1.0, %v3365_v14  ;;  %v2436_v50 = vmul.f32 0.5, %v4502_v32  ;;  %v2438_v38 = vmul.f32 0.5, %v4505_v18  ;;  %3112 = vmatpush3.msra.mxu0 %v4381_v43  ;;  %v4841_v14 = vld [vmem:[#allocation43_spill] sm:$0xff]  ;;  %v4844_v28 = vld [vmem:[#allocation30_spill] sm:$0xff] }
 0x4b4   : > { %v3369_v7 = vpop.eup %3368  ;;  %v2537_v4 = vadd.f32 1.0, %v3367_v63  ;;  %v2443_v24 = vmul.f32 0.5, %v4542_v26  ;;  %3113 = vmatprep.subr.mxu0 %v4384_v11  ;;  %v2440_v26 = vmul.f32 0.5, %v4524_v52  ;;  %v2445_v5 = vmul.f32 0.5, %v4561_v6 }
 0x4b5   : > { %v3371_v29 = vpop.eup %3370  ;;  %v2539_v12 = vadd.f32 1.0, %v3369_v7  ;;  %2731 = vmatmul.mubr.f32.gmra.mxu0 %v2560_v40  ;;  %2836 = vmatmul.mubr.f32.gmra.mxu1 %v2562_v53  ;;  %v2564_v36 = vmul.f32 %v2532_v49, %v2436_v50  ;;  %v2566_v32 = vmul.f32 %v2534_v54, %v2438_v38  ;;  %v2442_v46 = vmul.f32 0.5, %v4531_v19  ;;  %v4845_v40 = vld [vmem:[#allocation31_spill] sm:$0xff]  ;;  %v4849_v54 = vld [vmem:[#allocation33_spill] sm:$0xff]  ;;  %v4853_v38 = vld [vmem:[#allocation36_spill] sm:$0xff] }
 0x4b6   : > { %v3373_v58 = vpop.eup %3372  ;;  %2735 = vmatprep.mubr.f32.mxu0 %v2565_v21  ;;  %v2569_v0 = vmul.f32 %v2537_v4, %v2441_v35  ;;  %v2536_v15 = vadd.f32 1.0, %v3371_v29  ;;  %2840 = vmatprep.mubr.f32.mxu1 %v2567_v31  ;;  %v2447_v57 = vmul.f32 0.5, %v4567_v56  ;;  %v2444_v41 = vmul.f32 0.5, %v4840_v1  ;;  %v4846_v21 = vld [vmem:[#allocation32_spill] sm:$0xff]  ;;  %v4847_v4 = vld [vmem:[#allocation41_spill] sm:$0xff]  ;;  %v4851_v35 = vld [vmem:[#allocation39_spill] sm:$0xff] }
 0x4b7   : > { %v3375_v55 = vpop.eup %3374  ;;  %v2538_v9 = vadd.f32 1.0, %v3373_v58  ;;  %v2571_v45 = vmul.f32 %v2539_v12, %v2443_v24  ;;  %3114 = vmatpush3.msra.mxu0 %v4387_v42  ;;  %v2449_v62 = vmul.f32 0.5, %v4588_v33  ;;  %v2446_v59 = vmul.f32 0.5, %v4841_v14  ;;  %v4848_v31 = vld [vmem:[#allocation40_spill] sm:$0xff]  ;;  %v4852_v50 = vld [vmem:[#allocation35_spill] sm:$0xff] }
 0x4b8   : > { %v3377_v8 = vpop.eup %3376  ;;  %v2541_v25 = vadd.f32 1.0, %v3375_v55  ;;  %3115 = vmatprep.subr.mxu0 %v4837_v30  ;;  %v2568_v13 = vmul.f32 %v2536_v15, %v2440_v26  ;;  %v2451_v37 = vmul.f32 0.5, %v4592_v27  ;;  %v2448_v29 = vmul.f32 0.5, %v4571_v47  ;;  %v4850_v55 = vld [vmem:[#allocation34_spill] sm:$0xff] }
 0x4b9   : > { %v3379_v44 = vpop.eup %3378  ;;  %v2543_v18 = vadd.f32 1.0, %v3377_v8  ;;  %2736 = vmatmul.mubr.f32.gmra.mxu0 %v2564_v36  ;;  %2841 = vmatmul.mubr.f32.gmra.mxu1 %v2566_v32  ;;  %v2570_v52 = vmul.f32 %v2538_v9, %v2442_v46  ;;  %v2450_v53 = vmul.f32 0.5, %v4579_v60  ;;  %v2518_v58 = vadd.f32 1.0, %v4847_v4 }
 0x4ba   : > { %v3381_v17 = vpop.eup %3380  ;;  %2740 = vmatprep.mubr.f32.mxu0 %v2569_v0  ;;  %v2573_v48 = vmul.f32 %v2541_v25, %v2445_v5  ;;  %3116 = vmatpush3.msra.mxu0 %v4838_v61  ;;  %v2540_v23 = vadd.f32 1.0, %v3379_v44  ;;  %v2423_v49 = vmul.f32 0.5, %v4848_v31  ;;  %v2422_v8 = vmul.f32 0.5, %v4851_v35  ;;  %v4854_v44 = vld [vmem:[#allocation37_spill] sm:$0xff]  ;;  %v4855_v0 = vld [vmem:[#allocation38_spill] sm:$0xff] }
 0x4bb   : > { %v3383_v20 = vpop.eup %3382  ;;  %2845 = vmatprep.mubr.f32.mxu1 %v2571_v45  ;;  %v2575_v6 = vmul.f32 %v2543_v18, %v2447_v57  ;;  %3117 = vmatprep.subr.mxu0 %v4839_v22  ;;  %v2542_v19 = vadd.f32 1.0, %v3381_v17  ;;  %v4657_v18 = vld [vmem:[%s4749_s12] ss:$0 sm:$0xff]  ;;  %v4856_v61 = vld [vmem:[#allocation18_spill] sm:$0xff] }
 0x4bc   : > { %v3385_v43 = vpop.eup %3384  ;;  %3118 = vmatpush3.msra.mxu0 %v4842_v3  ;;  %v2572_v63 = vmul.f32 %v2540_v23, %v2444_v41  ;;  %v2544_v51 = vadd.f32 1.0, %v3383_v20  ;;  %v2550_v24 = vmul.f32 %v2518_v58, %v2422_v8  ;;  %v4857_v41 = vld [vmem:[#allocation19_spill] sm:$0xff]  ;;  %v4860_v8 = vld [vmem:[#allocation22_spill] sm:$0xff] }
 0x4bd   : > { %v3387_v11 = vpop.eup %3386  ;;  %v2545_v42 = vadd.f32 1.0, %v3385_v43  ;;  %2741 = vmatmul.mubr.f32.gmra.mxu0 %v2568_v13  ;;  %2846 = vmatmul.mubr.f32.gmra.mxu1 %v2570_v52  ;;  %v2574_v7 = vmul.f32 %v2542_v19, %v2446_v59 }
 0x4be   : > { %v2547_v10 = vadd.f32 1.0, %v3387_v11  ;;  %v3389_v56 = vpop.eup %3388  ;;  %2745 = vmatprep.mubr.f32.mxu0 %v2573_v48  ;;  %3119 = vmatprep.subr.mxu0 %v4843_v2  ;;  %v2576_v12 = vmul.f32 %v2544_v51, %v2448_v29  ;;  %v4858_v51 = vld [vmem:[#allocation20_spill] sm:$0xff] }
 0x4bf   : > { %v3391_v39 = vpop.eup %3390  ;;  %2850 = vmatprep.mubr.f32.mxu1 %v2575_v6  ;;  %v2577_v16 = vmul.f32 %v2545_v42, %v2449_v62  ;;  %3120 = vmatpush3.msra.mxu0 %v4844_v28  ;;  %v2546_v34 = vadd.f32 1.0, %v3389_v56 }
 0x4c0   : > { %v2579_v33 = vmul.f32 %v2547_v10, %v2451_v37  ;;  %3121 = vmatprep.subr.mxu0 %v4845_v40  ;;  %v2519_v27 = vadd.f32 1.0, %v3391_v39 }
 0x4c1   : > { %2746 = vmatmul.mubr.f32.gmra.mxu0 %v2572_v63  ;;  %2851 = vmatmul.mubr.f32.gmra.mxu1 %v2574_v7  ;;  %v2578_v47 = vmul.f32 %v2546_v34, %v2450_v53 }
 0x4c2   : > { %3122 = vmatpush3.msra.mxu0 %v4846_v21  ;;  %2750 = vmatprep.mubr.f32.mxu0 %v2577_v16  ;;  %v2551_v60 = vmul.f32 %v2519_v27, %v2423_v49  ;;  %v4859_v21 = vld [vmem:[#allocation21_spill] sm:$0xff] }
 0x4c3   : > { %3123 = vmatprep.subr.mxu0 %v4849_v54  ;;  %2855 = vmatprep.mubr.f32.mxu1 %v2579_v33 }
 0x4c4   : > { %3124 = vmatpush3.msra.mxu0 %v4850_v55 }
 0x4c5   : > { %3125 = vmatprep.subr.mxu0 %v4852_v50  ;;  %2751 = vmatmul.mubr.f32.gmra.mxu0 %v2576_v12 }
 0x4c6   : > { %3126 = vmatpush3.msra.mxu0 %v4853_v38  ;;  %2856 = vmatmul.mubr.f32.gmra.mxu1 %v2578_v47 }
 0x4c7   : > { %3127 = vmatprep.subr.mxu0 %v4854_v44  ;;  %2820 = vmatprep.mubr.f32.mxu0 %v2551_v60 }
 0x4c8   : > { %3128 = vmatpush3.msra.mxu0 %v4855_v0 }
 0x4c9   : > { %2821 = vmatmul.mubr.f32.vlgmr.msra.gmra.mxu0 %v2550_v24 }
 0x561   : > { %v4652_v15 = vpop.f32.mrf.mxu0 }
 0x563   : > { %v3074_v9 = vpop.f32.mrf.mxu0 }
 0x564   : > { %v3075_v0 = vadd.f32 %v3074_v9, %v4652_v15  ;;  %v4862_v9 = vld [vmem:[#allocation24_spill] sm:$0xff] }
 0x56d   : > { %v3076_v25 = vpop.f32.mrf.mxu0  ;;  %v3132_v17 = vpop.f32.mrf.mxu1 }
 0x56f   : > { %v3077_v36 = vpop.f32.mrf.mxu0  ;;  %v3133_v32 = vpop.f32.mrf.mxu1 }
 0x570   : > { %v3078_v45 = vadd.f32 %v3077_v36, %v3076_v25  ;;  %v3134_v43 = vadd.f32 %v3133_v32, %v3132_v17 }
 0x571   : > { %v3079_v20 = vpop.f32.mrf.mxu0  ;;  %v3135_v26 = vpop.f32.mrf.mxu1 }
 0x572   : > { %v2723_v5 = vadd.f32 %v3078_v45, %v4657_v18  ;;  %v4861_v45 = vld [vmem:[#allocation23_spill] sm:$0xff] }
 0x573   : > { %v3080_v46 = vpop.f32.mrf.mxu0  ;;  %v3136_v57 = vpop.f32.mrf.mxu1 }
 0x574   : > { %v2828_v11 = vadd.f32 %v3134_v43, %v2723_v5  ;;  %v3081_v30 = vadd.f32 %v3080_v46, %v3079_v20  ;;  %v3137_v23 = vadd.f32 %v3136_v57, %v3135_v26  ;;  %v2718_v46 = vadd.f32 %v3075_v0, %v4657_v18 }
 0x575   : > { %v3082_v13 = vpop.f32.mrf.mxu0  ;;  %v3138_v48 = vpop.f32.mrf.mxu1 }
 0x576   : > { %v2862_v52 = vadd.f32 %v2828_v11, %v4856_v61  ;;  %v2728_v6 = vadd.f32 %v3081_v30, %v4657_v18 }
 0x577   : > { %v3083_v42 = vpop.f32.mrf.mxu0  ;;  %v3139_v22 = vpop.f32.mrf.mxu1 }
 0x578   : > { %2870 = vst [vmem:[%s4664_s23 + $0x8] sm:$0xff] %v2862_v52  ;;  %v2833_v19 = vadd.f32 %v3137_v23, %v2728_v6  ;;  %v3084_v10 = vadd.f32 %v3083_v42, %v3082_v13  ;;  %v3140_v14 = vadd.f32 %v3139_v22, %v3138_v48 }
 0x579   : > { %v3085_v56 = vpop.f32.mrf.mxu0  ;;  %v3141_v1 = vpop.f32.mrf.mxu1 }
 0x57a   : > { %v2863_v62 = vadd.f32 %v2833_v19, %v4857_v41  ;;  %v2733_v39 = vadd.f32 %v3084_v10, %v4657_v18 }
 0x57b   : > { %v3086_v59 = vpop.f32.mrf.mxu0  ;;  %v3142_v37 = vpop.f32.mrf.mxu1 }
 0x57c   : > { %2871 = vst [vmem:[%s4664_s23 + $0x10] sm:$0xff] %v2863_v62  ;;  %v2838_v3 = vadd.f32 %v3140_v14, %v2733_v39  ;;  %v3087_v2 = vadd.f32 %v3086_v59, %v3085_v56  ;;  %v3143_v33 = vadd.f32 %v3142_v37, %v3141_v1 }
 0x57d   : > { %v3088_v63 = vpop.f32.mrf.mxu0  ;;  %v3144_v16 = vpop.f32.mrf.mxu1 }
 0x57e   : > { %v2864_v28 = vadd.f32 %v2838_v3, %v4858_v51  ;;  %v2738_v7 = vadd.f32 %v3087_v2, %v4657_v18 }
 0x57f   : > { %v3089_v34 = vpop.f32.mrf.mxu0  ;;  %v3145_v29 = vpop.f32.mrf.mxu1 }
 0x580   : > { %2872 = vst [vmem:[%s4664_s23 + $0x18] sm:$0xff] %v2864_v28  ;;  %v2843_v40 = vadd.f32 %v3143_v33, %v2738_v7  ;;  %v3090_v27 = vadd.f32 %v3089_v34, %v3088_v63  ;;  %v3146_v31 = vadd.f32 %v3145_v29, %v3144_v16 }
 0x581   : > { %v3091_v53 = vpop.f32.mrf.mxu0  ;;  %v3147_v49 = vpop.f32.mrf.mxu1 }
 0x582   : > { %v2865_v4 = vadd.f32 %v2843_v40, %v4859_v21  ;;  %v2743_v58 = vadd.f32 %v3090_v27, %v4657_v18 }
 0x583   : > { %v3092_v54 = vpop.f32.mrf.mxu0  ;;  %v3148_v47 = vpop.f32.mrf.mxu1 }
 0x584   : > { %2873 = vst [vmem:[%s4664_s23 + $0x20] sm:$0xff] %v2865_v4  ;;  %v2848_v12 = vadd.f32 %v3146_v31, %v2743_v58  ;;  %v3093_v55 = vadd.f32 %v3092_v54, %v3091_v53  ;;  %v3149_v38 = vadd.f32 %v3148_v47, %v3147_v49 }
 0x585   : > { %v3094_v35 = vpop.f32.mrf.mxu0 }
 0x586   : > { %v2866_v50 = vadd.f32 %v2848_v12, %v4860_v8  ;;  %v2748_v60 = vadd.f32 %v3093_v55, %v4657_v18  ;;  %v3150_v24 = vpop.f32.mrf.mxu1 }
 0x587   : > { %v3095_v44 = vpop.f32.mrf.mxu0 }
 0x588   : > { %2874 = vst [vmem:[%s4664_s23 + $0x28] sm:$0xff] %v2866_v50  ;;  %v2853_v25 = vadd.f32 %v3149_v38, %v2748_v60  ;;  %v3096_v17 = vadd.f32 %v3095_v44, %v3094_v35  ;;  %v3151_v36 = vpop.f32.mrf.mxu1 }
 0x589   : > { %v3129_v32 = vpop.f32.mrf.mxu0  ;;  %v3152_v5 = vadd.f32 %v3151_v36, %v3150_v24 }
 0x58a   : > { %v2867_v20 = vadd.f32 %v2853_v25, %v4861_v45  ;;  %v2753_v26 = vadd.f32 %v3096_v17, %v4657_v18  ;;  %v4863_v18 = vld [vmem:[#allocation17_spill] sm:$0xff] }
 0x58b   : > { %v3130_v43 = vpop.f32.mrf.mxu0 }
 0x58c   : > { %2875 = vst [vmem:[%s4664_s23 + $0x30] sm:$0xff] %v2867_v20  ;;  %v2858_v57 = vadd.f32 %v3152_v5, %v2753_v26  ;;  %v3131_v15 = vadd.f32 %v3130_v43, %v3129_v32 }
 0x58e   : > { %v2868_v11 = vadd.f32 %v2858_v57, %v4862_v9  ;;  %v2823_v30 = vadd.f32 %v3131_v15, %v2718_v46 }
 0x590   : > { %2876 = vst [vmem:[%s4664_s23 + $0x38] sm:$0xff] %v2868_v11  ;;  %v2861_v13 = vadd.f32 %v2823_v30, %v4863_v18 }
 0x592   : > { %2869 = vst [vmem:[%s4664_s23] sm:$0xff] %v2861_v13 }
 0x593   : > { %3493 = shalt.err (!%p3490_p9)
}
 0x594   : > { %s3494_s15 = scalar_lea.hbm %s4690_s18, 1024  ;;  %s3498_s21 = scalar_lea.hbm %s4750_s13, 4096 }
 0x595   : > { %p3495_p12 = scmp.ne.s32.totalorder %s4690_s18, %s3494_s15  ;;  %p3499_p4 = scmp.lt.s32.totalorder %s4690_s18, %s4750_s13 }
 0x596   : > { %p3500_p8 = scmp.lt.s32.totalorder %s3498_s21, %s3494_s15 }
 0x597   : > { %p3496_p3 = pnand %p3495_p12, %p4864_p0 }
 0x598   : > { %p3501_p7 = por %p3500_p8, %p3499_p4 }
 0x599   : > { %p3497_p13 = pneg %p3496_p3 }
 0x59b   : > { %p3502_p10 = pnand %p3501_p7, %p3497_p13 }
 0x59d   : > { %3505 = shalt.err (!%p3502_p10)
}
 0x59e   : > { %s3562_s14 = smov 128   ;;  %s3563_s16 = smov 8  }
 0x59f   : > { %3195 = dma.vmem_to_hbm [thread:$0]  (%p4864_p0), %s4692_s9, 1024, %s4690_s18, %s2878_s11, %s3562_s14, %s3562_s14, %s3563_s16  }
 0x5a0 PF: > { %s4865_s29 = sld [smem:[#allocation12_spill]]  ;;  %p3217_p1 = scmp.ge.s32.totalorder %s3548_s28, 2 }
 0x5a1   : > { %s4866_s20 = sld [smem:[#allocation14_spill]] }
 0x5a6   : > { %s2907_s24 = sand.u32 1, %s4865_s29  }
 0x5a7   : > { %p4867_p2 = scmp.ne.s32.totalorder %s4866_s20, 0  ;;  %s2908_s17 = scalar_lea.sflag [#allocation4], %s2907_s24 }
 0x5a9   : > { %p3209_p6 = pnand %p3217_p1, %p4867_p2 }
 0x5ab   : > { %p3210_p11 = pneg %p3209_p6 }
 0x5ad   : > { %3531 = dma.done.wait (%p3210_p11), %s2908_s17, 1024  }
 0x5ae   : > { %3533 = vsyncadd (%p3210_p11), %s2908_s17, 4294966272  ;;  %s4868_s28 = sld [smem:[#allocation15_spill]]  ;;  %s4871_s25 = smov %s3540_s26 }
 0x5af   : > { %s4869_s15 = sld [smem:[#allocation13_spill]] }
 0x5b0   : > { %s4870_s27 = sld [smem:[#allocation16_spill]] }
 0x5b4   : > { %p27_p5 = scmp.ge.s32.totalorder %s4868_s28, 6  }
 0x5b5   : > { %s4872_s26 = smov %s4869_s15 }
 0x5b6   :  { %29 = sbr.rel (!%p27_p5) target bundleno = 9 (0x9), region = 125 }
 0x5bb   :  { %2913 = vsyncpa [#allocation3], 1 }
 0x5bc   :  { %2915 = vsyncpa [#allocation3 + $0x1], 1 }
 0x5bd   :  { %2916 = vsyncpa [#allocation6], 1 }
 0x5be   :  { %2917 = vsyncpa [#allocation4], 1 }
 0x5bf   :  { %2919 = vsyncpa [#allocation4 + $0x1], 1 }

</bundles_post_ra>
